<compile_context>
chip_gen: v6e
topology: v6e:2x2x1
jax: 0.10.0
libtpu: 0.0.40
codegen_flags: <defaults>
</compile_context>

<pallas_src>
import functools

import jax
import jax.numpy as jnp
from jax import lax
from jax.experimental import pallas as pl
from jax.experimental.pallas import tpu as pltpu

_TN_CANDIDATES = (1024, 512, 256, 128, 64, 32, 16, 8)


def _pick_tile(n):
    for t in _TN_CANDIDATES:
        if n % t == 0:
            return t
    return n  # TODO(synk): pad ragged N to a multiple of 8 instead of full-N.


def _fused_kernel(x_ref, wfx_ref, bfx_ref, wx_ref, bx_ref,
                  ws_ref, bs_ref, wq_ref, wk_ref, wv_ref,
                  wout_ref, bout_ref, o_ref,
                  st_acc, norm_acc, attn_out):
    """Physics_Attention_1D forward, two passes over N tiles per batch element.

    grid = (B, 2, NT).  Block shapes:
      x_ref    : (1, TN, C)  f32/bf16
      wfx/wx   : (C, H*Dh)   bf16       bfx/bx : (1, H*Dh) f32
      ws_ref   : (H, Dh, G)  bf16 (1/temperature folded in)
      bs_ref   : (H, G)      f32  (1/temperature folded in)
      wq/wk/wv : (Dh, Dh)    bf16 (Dh**-0.5 folded into wq)
      wout     : (H*Dh, C)   bf16       bout   : (1, C) f32
      o_ref    : (1, TN, C)
    VMEM scratch (persists across grid steps of one batch element / core):
      st_acc   : (Dh, H*G) f32   sum_n fx^T sw   (slice_token, transposed)
      norm_acc : (1,  H*G) f32   sum_n sw        (slice_norm)
      attn_out : (Dh, H*G) bf16  out_slice_token (transposed)
    """
    H, Dh, G = ws_ref.shape
    f32, bf16 = jnp.float32, jnp.bfloat16
    p = pl.program_id(1)   # 0: accumulate slice tokens, 1: attend + project
    n = pl.program_id(2)   # N-tile index

    CONTRACT_0 = (((0,), (0,)), ((), ()))   # a^T @ b (contract leading dims)
    CONTRACT_1 = (((1,), (1,)), ((), ()))   # a @ b^T (contract trailing dims)

    x = x_ref[0].astype(bf16)                                         # (TN, C)
    # x_mid projection: needed by both passes to (re)compute slice_weights.
    x_all = (jnp.dot(x, wx_ref[...], preferred_element_type=f32)
             + bx_ref[...])                                           # (TN, H*Dh) f32
    x16 = x_all.astype(bf16)
    bs_all = bs_ref[...]                                              # (H, G) f32

    def slice_softmax(h):
        """slice_weights for head h on this N tile, f32 (TN, G)."""
        xh = lax.slice_in_dim(x16, h * Dh, (h + 1) * Dh, axis=1)      # (TN, Dh)
        logits = (jnp.dot(xh, ws_ref[h], preferred_element_type=f32)
                  + lax.slice_in_dim(bs_all, h, h + 1, axis=0))       # (TN, G)
        logits = logits - jnp.max(logits, axis=-1, keepdims=True)
        e = jnp.exp(logits)
        return e * pl.reciprocal(jnp.sum(e, axis=-1, keepdims=True),
                                 approx=True)

    # ------------------------------------------------------------------ pass 0
    @pl.when(p == 0)
    def _pass0_accumulate():
        @pl.when(n == 0)
        def _init():
            st_acc[...] = jnp.zeros_like(st_acc)
            norm_acc[...] = jnp.zeros_like(norm_acc)

        fx_all = (jnp.dot(x, wfx_ref[...], preferred_element_type=f32)
                  + bfx_ref[...])                                     # (TN, H*Dh)
        fx16 = fx_all.astype(bf16)
        for h in range(H):                                            # static unroll
            lo = h * G
            sw = slice_softmax(h)                                     # (TN, G) f32
            fxh = lax.slice_in_dim(fx16, h * Dh, (h + 1) * Dh, axis=1)
            # partial slice_token^T: (Dh, G) = fx^T @ sw  (f32 accumulation)
            st_part = lax.dot_general(fxh, sw.astype(bf16), CONTRACT_0,
                                      preferred_element_type=f32)
            st_acc[:, lo:lo + G] += st_part
            # slice_norm accumulated exactly in f32 (review correctness note).
            norm_acc[:, lo:lo + G] += jnp.sum(sw, axis=0, keepdims=True)

    # ------------------------------------------------------------------ pass 1
    @pl.when(p == 1)
    def _pass1_attend_and_project():
        @pl.when(n == 0)
        def _slice_attention():
            # Normalize slice tokens: exact divide, natural (1, H*G) broadcast.
            st = st_acc[...] / (norm_acc[...] + 1e-5)                 # (Dh, H*G) f32
            st16 = st.astype(bf16)
            # q/k/v batched over all heads' slices (Dh x Dh) @ (Dh x H*G).
            q = lax.dot_general(wq_ref[...], st16, CONTRACT_0,
                                preferred_element_type=f32).astype(bf16)
            k = lax.dot_general(wk_ref[...], st16, CONTRACT_0,
                                preferred_element_type=f32).astype(bf16)
            v = lax.dot_general(wv_ref[...], st16, CONTRACT_0,
                                preferred_element_type=f32).astype(bf16)
            for h in range(H):
                lo = h * G
                qh = lax.slice_in_dim(q, lo, lo + G, axis=1)          # (Dh, G)
                kh = lax.slice_in_dim(k, lo, lo + G, axis=1)
                vh = lax.slice_in_dim(v, lo, lo + G, axis=1)
                dots = lax.dot_general(qh, kh, CONTRACT_0,
                                       preferred_element_type=f32)    # (G, G)
                dots = dots - jnp.max(dots, axis=-1, keepdims=True)
                e = jnp.exp(dots)
                attn = e * pl.reciprocal(jnp.sum(e, axis=-1, keepdims=True),
                                         approx=True)
                out_t = lax.dot_general(vh, attn.astype(bf16), CONTRACT_1,
                                        preferred_element_type=f32)   # (Dh, G)
                attn_out[:, lo:lo + G] = out_t.astype(bf16)

        # De-slice this N tile (recompute sw) and project with ONE K=H*Dh matmul.
        ao = attn_out[...]                                            # (Dh, H*G) bf16
        heads_out = []
        for h in range(H):
            lo = h * G
            sw16 = slice_softmax(h).astype(bf16)                      # (TN, G)
            aoh = lax.slice_in_dim(ao, lo, lo + G, axis=1)            # (Dh, G)
            oh = lax.dot_general(sw16, aoh, CONTRACT_1,
                                 preferred_element_type=f32)          # (TN, Dh)
            heads_out.append(oh.astype(bf16))
        out_all = jnp.concatenate(heads_out, axis=1)                  # (TN, H*Dh)
        y = (jnp.dot(out_all, wout_ref[...], preferred_element_type=f32)
             + bout_ref[...])                                         # (TN, C) f32
        o_ref[0] = y.astype(o_ref.dtype)


@functools.partial(jax.jit, static_argnames=("heads", "dim_head", "slice_num"))
def physics_attention_1d(x, params, *, heads, dim_head, slice_num):
    B, N, C = x.shape
    H, Dh, G = heads, dim_head, slice_num
    inner = H * Dh
    bf16 = jnp.bfloat16

    TN = _pick_tile(N)
    NT = N // TN

    # Host-side weight prep: bf16 casts, fold 1/temperature into the slice
    # projection and dim_head**-0.5 into w_q.  Biases stay f32.
    temp = params["temperature"].reshape(H)                                  # (H,)
    ws16 = (params["w_slice"][None, :, :] / temp[:, None, None]).astype(bf16)  # (H,Dh,G)
    bs = params["b_slice"][None, :] / temp[:, None]                          # (H, G) f32
    wq16 = (params["w_q"] * (Dh ** -0.5)).astype(bf16)
    wk16 = params["w_k"].astype(bf16)
    wv16 = params["w_v"].astype(bf16)
    wfx16 = params["w_fx"].astype(bf16)
    wx16 = params["w_x"].astype(bf16)
    wout16 = params["w_out"].astype(bf16)
    bfx = params["b_fx"].reshape(1, inner)
    bx = params["b_x"].reshape(1, inner)
    bout = params["b_out"].reshape(1, C)

    grid = (B, 2, NT)   # (batch, pass, N tile)

    return pl.pallas_call(
        _fused_kernel,
        out_shape=jax.ShapeDtypeStruct((B, N, C), x.dtype),
        grid=grid,
        in_specs=[
            pl.BlockSpec((1, TN, C), lambda b, p, n: (b, n, 0)),             # x
            pl.BlockSpec((C, inner), lambda b, p, n: (0, 0)),                # w_fx
            pl.BlockSpec((1, inner), lambda b, p, n: (0, 0)),                # b_fx
            pl.BlockSpec((C, inner), lambda b, p, n: (0, 0)),                # w_x
            pl.BlockSpec((1, inner), lambda b, p, n: (0, 0)),                # b_x
            pl.BlockSpec((H, Dh, G), lambda b, p, n: (0, 0, 0)),             # w_slice/temp
            pl.BlockSpec((H, G), lambda b, p, n: (0, 0)),                    # b_slice/temp
            pl.BlockSpec((Dh, Dh), lambda b, p, n: (0, 0)),                  # w_q (scaled)
            pl.BlockSpec((Dh, Dh), lambda b, p, n: (0, 0)),                  # w_k
            pl.BlockSpec((Dh, Dh), lambda b, p, n: (0, 0)),                  # w_v
            pl.BlockSpec((inner, C), lambda b, p, n: (0, 0)),                # w_out
            pl.BlockSpec((1, C), lambda b, p, n: (0, 0)),                    # b_out
        ],
        # Pass 0 parks the (unwritten) output buffer on tile 0; pass 1 writes
        # every tile exactly once, so each HBM tile is flushed with pass-1 data.
        out_specs=pl.BlockSpec((1, TN, C), lambda b, p, n: (b, n * p, 0)),
        scratch_shapes=[
            pltpu.VMEM((Dh, H * G), jnp.float32),    # slice_token^T accumulator
            pltpu.VMEM((1, H * G), jnp.float32),     # slice_norm accumulator
            pltpu.VMEM((Dh, H * G), jnp.bfloat16),   # attention output (transposed)
        ],
        compiler_params=pltpu.CompilerParams(
            dimension_semantics=("parallel", "arbitrary", "arbitrary"),
            # 48 MiB: headroom under v7x's 64 MiB physical VMEM, ample for
            # TN<=1024 tiles on v5e/v6e (128 MiB physical).
            vmem_limit_bytes=48 * 1024 * 1024),
    )(x, wfx16, bfx, wx16, bx, ws16, bs, wq16, wk16, wv16, wout16, bout)


def _reference(x, params, *, heads, dim_head, slice_num):
    """Pure-JAX f32 reference mirroring the PyTorch forward (eval mode)."""
    B, N, C = x.shape
    H, Dh, G = heads, dim_head, slice_num
    fx_mid = (x @ params["w_fx"] + params["b_fx"]).reshape(B, N, H, Dh).transpose(0, 2, 1, 3)
    x_mid = (x @ params["w_x"] + params["b_x"]).reshape(B, N, H, Dh).transpose(0, 2, 1, 3)
    temp = params["temperature"].reshape(1, H, 1, 1)
    logits = (x_mid @ params["w_slice"] + params["b_slice"]) / temp
    slice_weights = jax.nn.softmax(logits, axis=-1)                      # (B,H,N,G)
    slice_norm = slice_weights.sum(2)                                    # (B,H,G)
    slice_token = jnp.einsum("bhnc,bhng->bhgc", fx_mid, slice_weights)
    slice_token = slice_token / (slice_norm + 1e-5)[..., None]
    q = slice_token @ params["w_q"]
    k = slice_token @ params["w_k"]
    v = slice_token @ params["w_v"]
    dots = jnp.einsum("bhgc,bhkc->bhgk", q, k) * (Dh ** -0.5)
    attn = jax.nn.softmax(dots, axis=-1)
    out_slice = attn @ v
    out_x = jnp.einsum("bhgc,bhng->bhnc", out_slice, slice_weights)
    out_x = out_x.transpose(0, 2, 1, 3).reshape(B, N, H * Dh)
    return out_x @ params["w_out"] + params["b_out"]


def _init_params(key, dim, heads, dim_head, slice_num):
    inner = heads * dim_head
    ks = jax.random.split(key, 12)

    def lin(k, fan_in, shape):
        bound = 1.0 / (fan_in ** 0.5)
        return jax.random.uniform(k, shape, jnp.float32, -bound, bound)

    # Orthogonal init for in_project_slice weight (deterministic via QR).
    m = max(dim_head, slice_num)
    a = jax.random.normal(ks[10], (m, m), jnp.float32)
    q_mat, _ = jnp.linalg.qr(a)
    w_slice = q_mat[:dim_head, :slice_num]                               # (Dh, G)

    return {
        "w_fx": lin(ks[0], dim, (dim, inner)),
        "b_fx": lin(ks[1], dim, (inner,)),
        "w_x": lin(ks[2], dim, (dim, inner)),
        "b_x": lin(ks[3], dim, (inner,)),
        "w_slice": w_slice,
        "b_slice": lin(ks[4], dim_head, (slice_num,)),
        "temperature": jnp.full((1, heads, 1, 1), 0.5, jnp.float32),
        "w_q": lin(ks[5], dim_head, (dim_head, dim_head)),
        "w_k": lin(ks[6], dim_head, (dim_head, dim_head)),
        "w_v": lin(ks[7], dim_head, (dim_head, dim_head)),
        "w_out": lin(ks[8], inner, (inner, dim)),
        "b_out": lin(ks[9], inner, (dim,)),
    }


if __name__ == "__main__":
    B, N, dim = 2, 64, 32
    heads, dim_head, slice_num = 4, 16, 16

    key = jax.random.PRNGKey(0)
    kx, kp = jax.random.split(key)
    x = jax.random.normal(kx, (B, N, dim), jnp.float32)
    params = _init_params(kp, dim, heads, dim_head, slice_num)

    y = physics_attention_1d(x, params, heads=heads, dim_head=dim_head,
                             slice_num=slice_num)
    y = jax.block_until_ready(y)

    y_ref = _reference(x, params, heads=heads, dim_head=dim_head,
                       slice_num=slice_num)
    assert y.shape == (B, N, dim)
    # bf16 MXU operands + approx softmax reciprocals -> looser tolerance.
    assert jnp.allclose(y, y_ref, atol=5e-2, rtol=5e-2), "mismatch vs reference"

    print("KERNEL_OK")
</pallas_src>

<mosaic_0001>
module attributes {stable_mosaic.version = 11 : i64} {
  func.func @_fused_kernel(%arg0: i32, %arg1: i32, %arg2: i32, %arg3: memref<1x64x32xf32, #tpu.memory_space<vmem>>, %arg4: memref<32x64xbf16, #tpu.memory_space<vmem>>, %arg5: memref<1x64xf32, #tpu.memory_space<vmem>>, %arg6: memref<32x64xbf16, #tpu.memory_space<vmem>>, %arg7: memref<1x64xf32, #tpu.memory_space<vmem>>, %arg8: memref<4x16x16xbf16, #tpu.memory_space<vmem>>, %arg9: memref<4x16xf32, #tpu.memory_space<vmem>>, %arg10: memref<16x16xbf16, #tpu.memory_space<vmem>>, %arg11: memref<16x16xbf16, #tpu.memory_space<vmem>>, %arg12: memref<16x16xbf16, #tpu.memory_space<vmem>>, %arg13: memref<64x32xbf16, #tpu.memory_space<vmem>>, %arg14: memref<1x32xf32, #tpu.memory_space<vmem>>, %arg15: memref<1x64x32xf32, #tpu.memory_space<vmem>>, %arg16: memref<16x64xf32, #tpu.memory_space<vmem>>, %arg17: memref<1x64xf32, #tpu.memory_space<vmem>>, %arg18: memref<16x64xbf16, #tpu.memory_space<vmem>>) attributes {dimension_semantics = [#tpu.dimension_semantics<parallel>, #tpu.dimension_semantics<arbitrary>, #tpu.dimension_semantics<arbitrary>], iteration_bounds = array<i64: 2, 2, 1>, scalar_prefetch = 0 : i64, scratch_operands = 3 : i64, tpu.core_type = #tpu.core_type<tc>, window_params = [{transform_indices = @transform_0, window_bounds = array<i64: 1, 64, 32>}, {pipeline_mode = #tpu.pipeline_mode<synchronous>, transform_indices = @transform_1, window_bounds = array<i64: 32, 64>}, {pipeline_mode = #tpu.pipeline_mode<synchronous>, transform_indices = @transform_2, window_bounds = array<i64: 1, 64>}, {pipeline_mode = #tpu.pipeline_mode<synchronous>, transform_indices = @transform_3, window_bounds = array<i64: 32, 64>}, {pipeline_mode = #tpu.pipeline_mode<synchronous>, transform_indices = @transform_4, window_bounds = array<i64: 1, 64>}, {pipeline_mode = #tpu.pipeline_mode<synchronous>, transform_indices = @transform_5, window_bounds = array<i64: 4, 16, 16>}, {pipeline_mode = #tpu.pipeline_mode<synchronous>, transform_indices = @transform_6, window_bounds = array<i64: 4, 16>}, {pipeline_mode = #tpu.pipeline_mode<synchronous>, transform_indices = @transform_7, window_bounds = array<i64: 16, 16>}, {pipeline_mode = #tpu.pipeline_mode<synchronous>, transform_indices = @transform_8, window_bounds = array<i64: 16, 16>}, {pipeline_mode = #tpu.pipeline_mode<synchronous>, transform_indices = @transform_9, window_bounds = array<i64: 16, 16>}, {pipeline_mode = #tpu.pipeline_mode<synchronous>, transform_indices = @transform_10, window_bounds = array<i64: 64, 32>}, {pipeline_mode = #tpu.pipeline_mode<synchronous>, transform_indices = @transform_11, window_bounds = array<i64: 1, 32>}, {transform_indices = @transform_12, window_bounds = array<i64: 1, 64, 32>}]} {
    %c0 = arith.constant 0 : index
    %c0_0 = arith.constant 0 : index
    %c0_1 = arith.constant 0 : index
    %0 = vector.load %arg3[%c0, %c0_0, %c0_1] : memref<1x64x32xf32, #tpu.memory_space<vmem>>, vector<1x64x32xf32>
    %1 = vector.shape_cast %0 : vector<1x64x32xf32> to vector<64x32xf32>
    %2 = arith.truncf %1 : vector<64x32xf32> to vector<64x32xbf16>
    %c0_2 = arith.constant 0 : index
    %c0_3 = arith.constant 0 : index
    %3 = vector.load %arg6[%c0_2, %c0_3] : memref<32x64xbf16, #tpu.memory_space<vmem>>, vector<32x64xbf16>
    %cst = arith.constant dense<0.000000e+00> : vector<64x64xf32>
    %4 = tpu.matmul %2, %3, %cst {dimension_numbers = #tpu.dot_dimension_numbers<[1], [0], [0], [1], [0, 0, 1, 1], [], []>} : vector<64x32xbf16>, vector<32x64xbf16>, vector<64x64xf32> -> vector<64x64xf32>
    %c0_4 = arith.constant 0 : index
    %c0_5 = arith.constant 0 : index
    %5 = vector.load %arg7[%c0_4, %c0_5] : memref<1x64xf32, #tpu.memory_space<vmem>>, vector<1x64xf32>
    %6 = vector.broadcast %5 : vector<1x64xf32> to vector<64x64xf32>
    %7 = arith.addf %4, %6 : vector<64x64xf32>
    %8 = arith.truncf %7 : vector<64x64xf32> to vector<64x64xbf16>
    %c0_6 = arith.constant 0 : index
    %c0_7 = arith.constant 0 : index
    %9 = vector.load %arg9[%c0_6, %c0_7] : memref<4x16xf32, #tpu.memory_space<vmem>>, vector<4x16xf32>
    %c0_i32 = arith.constant 0 : i32
    %10 = arith.cmpi eq, %arg1, %c0_i32 : i32
    %11 = arith.extui %10 : i1 to i32
    %c0_i32_8 = arith.constant 0 : i32
    %12 = arith.cmpi ne, %11, %c0_i32_8 : i32
    scf.if %12 {
      %c0_i32_10 = arith.constant 0 : i32
      %16 = arith.cmpi eq, %arg2, %c0_i32_10 : i32
      %17 = arith.extui %16 : i1 to i32
      %c0_i32_11 = arith.constant 0 : i32
      %18 = arith.cmpi ne, %17, %c0_i32_11 : i32
      scf.if %18 {
        %cst_75 = arith.constant 0.000000e+00 : f32
        %137 = vector.broadcast %cst_75 : f32 to vector<16x64xf32>
        %c0_76 = arith.constant 0 : index
        %c0_77 = arith.constant 0 : index
        %138 = vector.load %arg16[%c0_76, %c0_77] : memref<16x64xf32, #tpu.memory_space<vmem>>, vector<16x64xf32>
        tpu.vector_store %arg16[%c0_76, %c0_77], %137 {strides = array<i32>} : memref<16x64xf32, #tpu.memory_space<vmem>>, vector<16x64xf32>,
        %cst_78 = arith.constant 0.000000e+00 : f32
        %139 = vector.broadcast %cst_78 : f32 to vector<1x64xf32>
        %c0_79 = arith.constant 0 : index
        %c0_80 = arith.constant 0 : index
        %140 = vector.load %arg17[%c0_79, %c0_80] : memref<1x64xf32, #tpu.memory_space<vmem>>, vector<1x64xf32>
        tpu.vector_store %arg17[%c0_79, %c0_80], %139 {strides = array<i32>} : memref<1x64xf32, #tpu.memory_space<vmem>>, vector<1x64xf32>,
      } else {
      }
      %c0_12 = arith.constant 0 : index
      %c0_13 = arith.constant 0 : index
      %19 = vector.load %arg4[%c0_12, %c0_13] : memref<32x64xbf16, #tpu.memory_space<vmem>>, vector<32x64xbf16>
      %cst_14 = arith.constant dense<0.000000e+00> : vector<64x64xf32>
      %20 = tpu.matmul %2, %19, %cst_14 {dimension_numbers = #tpu.dot_dimension_numbers<[1], [0], [0], [1], [0, 0, 1, 1], [], []>} : vector<64x32xbf16>, vector<32x64xbf16>, vector<64x64xf32> -> vector<64x64xf32>
      %c0_15 = arith.constant 0 : index
      %c0_16 = arith.constant 0 : index
      %21 = vector.load %arg5[%c0_15, %c0_16] : memref<1x64xf32, #tpu.memory_space<vmem>>, vector<1x64xf32>
      %22 = vector.broadcast %21 : vector<1x64xf32> to vector<64x64xf32>
      %23 = arith.addf %20, %22 : vector<64x64xf32>
      %24 = arith.truncf %23 : vector<64x64xf32> to vector<64x64xbf16>
      %25 = vector.extract_strided_slice %8 {offsets = [0, 0], sizes = [64, 16], strides = [1, 1]} : vector<64x64xbf16> to vector<64x16xbf16>
      %c0_17 = arith.constant 0 : index
      %c0_18 = arith.constant 0 : index
      %c0_19 = arith.constant 0 : index
      %26 = vector.load %arg8[%c0_17, %c0_18, %c0_19] : memref<4x16x16xbf16, #tpu.memory_space<vmem>>, vector<1x16x16xbf16>
      %27 = vector.shape_cast %26 : vector<1x16x16xbf16> to vector<16x16xbf16>
      %cst_20 = arith.constant dense<0.000000e+00> : vector<64x16xf32>
      %28 = tpu.matmul %25, %27, %cst_20 {dimension_numbers = #tpu.dot_dimension_numbers<[1], [0], [0], [1], [0, 0, 1, 1], [], []>} : vector<64x16xbf16>, vector<16x16xbf16>, vector<64x16xf32> -> vector<64x16xf32>
      %29 = vector.extract_strided_slice %9 {offsets = [0, 0], sizes = [1, 16], strides = [1, 1]} : vector<4x16xf32> to vector<1x16xf32>
      %30 = vector.broadcast %29 : vector<1x16xf32> to vector<64x16xf32>
      %31 = arith.addf %28, %30 : vector<64x16xf32>
      %cst_21 = arith.constant dense<0xFF800000> : vector<64xf32>
      %32 = vector.multi_reduction <maximumf>, %31, %cst_21 [1] : vector<64x16xf32> to vector<64xf32>
      %33 = vector.shape_cast %32 : vector<64xf32> to vector<64x1xf32>
      %34 = vector.broadcast %33 : vector<64x1xf32> to vector<64x16xf32>
      %35 = arith.subf %31, %34 : vector<64x16xf32>
      %36 = math.exp %35 : vector<64x16xf32>
      %cst_22 = arith.constant dense<0.000000e+00> : vector<64xf32>
      %37 = vector.multi_reduction <add>, %36, %cst_22 [1] : vector<64x16xf32> to vector<64xf32>
      %38 = vector.shape_cast %37 : vector<64xf32> to vector<64x1xf32>
      %39 = tpu.reciprocal %38 {approx = true} : vector<64x1xf32> -> vector<64x1xf32>
      %40 = vector.broadcast %39 : vector<64x1xf32> to vector<64x16xf32>
      %41 = arith.mulf %36, %40 : vector<64x16xf32>
      %42 = vector.extract_strided_slice %24 {offsets = [0, 0], sizes = [64, 16], strides = [1, 1]} : vector<64x64xbf16> to vector<64x16xbf16>
      %43 = arith.truncf %41 : vector<64x16xf32> to vector<64x16xbf16>
      %cst_23 = arith.constant dense<0.000000e+00> : vector<16x16xf32>
      %44 = tpu.matmul %42, %43, %cst_23 {dimension_numbers = #tpu.dot_dimension_numbers<[0], [0], [1], [1], [0, 1, 1, 1], [], []>} : vector<64x16xbf16>, vector<64x16xbf16>, vector<16x16xf32> -> vector<16x16xf32>
      %c0_24 = arith.constant 0 : index
      %c0_25 = arith.constant 0 : index
      %45 = vector.load %arg16[%c0_24, %c0_25] : memref<16x64xf32, #tpu.memory_space<vmem>>, vector<16x16xf32>
      %46 = arith.addf %45, %44 : vector<16x16xf32>
      %c0_26 = arith.constant 0 : index
      %c0_27 = arith.constant 0 : index
      %47 = vector.load %arg16[%c0_26, %c0_27] : memref<16x64xf32, #tpu.memory_space<vmem>>, vector<16x16xf32>
      tpu.vector_store %arg16[%c0_26, %c0_27], %46 {strides = array<i32>} : memref<16x64xf32, #tpu.memory_space<vmem>>, vector<16x16xf32>,
      %c0_28 = arith.constant 0 : index
      %c0_29 = arith.constant 0 : index
      %48 = vector.load %arg17[%c0_28, %c0_29] : memref<1x64xf32, #tpu.memory_space<vmem>>, vector<1x16xf32>
      %cst_30 = arith.constant dense<0.000000e+00> : vector<16xf32>
      %49 = vector.multi_reduction <add>, %41, %cst_30 [0] : vector<64x16xf32> to vector<16xf32>
      %50 = vector.shape_cast %49 : vector<16xf32> to vector<1x16xf32>
      %51 = arith.addf %48, %50 : vector<1x16xf32>
      %c0_31 = arith.constant 0 : index
      %c0_32 = arith.constant 0 : index
      %52 = vector.load %arg17[%c0_31, %c0_32] : memref<1x64xf32, #tpu.memory_space<vmem>>, vector<1x16xf32>
      tpu.vector_store %arg17[%c0_31, %c0_32], %51 {strides = array<i32>} : memref<1x64xf32, #tpu.memory_space<vmem>>, vector<1x16xf32>,
      %53 = vector.extract_strided_slice %8 {offsets = [0, 16], sizes = [64, 16], strides = [1, 1]} : vector<64x64xbf16> to vector<64x16xbf16>
      %c1 = arith.constant 1 : index
      %c0_33 = arith.constant 0 : index
      %c0_34 = arith.constant 0 : index
      %54 = vector.load %arg8[%c1, %c0_33, %c0_34] : memref<4x16x16xbf16, #tpu.memory_space<vmem>>, vector<1x16x16xbf16>
      %55 = vector.shape_cast %54 : vector<1x16x16xbf16> to vector<16x16xbf16>
      %cst_35 = arith.constant dense<0.000000e+00> : vector<64x16xf32>
      %56 = tpu.matmul %53, %55, %cst_35 {dimension_numbers = #tpu.dot_dimension_numbers<[1], [0], [0], [1], [0, 0, 1, 1], [], []>} : vector<64x16xbf16>, vector<16x16xbf16>, vector<64x16xf32> -> vector<64x16xf32>
      %57 = vector.extract_strided_slice %9 {offsets = [1, 0], sizes = [1, 16], strides = [1, 1]} : vector<4x16xf32> to vector<1x16xf32>
      %58 = vector.broadcast %57 : vector<1x16xf32> to vector<64x16xf32>
      %59 = arith.addf %56, %58 : vector<64x16xf32>
      %cst_36 = arith.constant dense<0xFF800000> : vector<64xf32>
      %60 = vector.multi_reduction <maximumf>, %59, %cst_36 [1] : vector<64x16xf32> to vector<64xf32>
      %61 = vector.shape_cast %60 : vector<64xf32> to vector<64x1xf32>
      %62 = vector.broadcast %61 : vector<64x1xf32> to vector<64x16xf32>
      %63 = arith.subf %59, %62 : vector<64x16xf32>
      %64 = math.exp %63 : vector<64x16xf32>
      %cst_37 = arith.constant dense<0.000000e+00> : vector<64xf32>
      %65 = vector.multi_reduction <add>, %64, %cst_37 [1] : vector<64x16xf32> to vector<64xf32>
      %66 = vector.shape_cast %65 : vector<64xf32> to vector<64x1xf32>
      %67 = tpu.reciprocal %66 {approx = true} : vector<64x1xf32> -> vector<64x1xf32>
      %68 = vector.broadcast %67 : vector<64x1xf32> to vector<64x16xf32>
      %69 = arith.mulf %64, %68 : vector<64x16xf32>
      %70 = vector.extract_strided_slice %24 {offsets = [0, 16], sizes = [64, 16], strides = [1, 1]} : vector<64x64xbf16> to vector<64x16xbf16>
      %71 = arith.truncf %69 : vector<64x16xf32> to vector<64x16xbf16>
      %cst_38 = arith.constant dense<0.000000e+00> : vector<16x16xf32>
      %72 = tpu.matmul %70, %71, %cst_38 {dimension_numbers = #tpu.dot_dimension_numbers<[0], [0], [1], [1], [0, 1, 1, 1], [], []>} : vector<64x16xbf16>, vector<64x16xbf16>, vector<16x16xf32> -> vector<16x16xf32>
      %c0_39 = arith.constant 0 : index
      %c16 = arith.constant 16 : index
      %73 = vector.load %arg16[%c0_39, %c16] : memref<16x64xf32, #tpu.memory_space<vmem>>, vector<16x16xf32>
      %74 = arith.addf %73, %72 : vector<16x16xf32>
      %c0_40 = arith.constant 0 : index
      %c16_41 = arith.constant 16 : index
      %75 = vector.load %arg16[%c0_40, %c16_41] : memref<16x64xf32, #tpu.memory_space<vmem>>, vector<16x16xf32>
      tpu.vector_store %arg16[%c0_40, %c16_41], %74 {strides = array<i32>} : memref<16x64xf32, #tpu.memory_space<vmem>>, vector<16x16xf32>,
      %c0_42 = arith.constant 0 : index
      %c16_43 = arith.constant 16 : index
      %76 = vector.load %arg17[%c0_42, %c16_43] : memref<1x64xf32, #tpu.memory_space<vmem>>, vector<1x16xf32>
      %cst_44 = arith.constant dense<0.000000e+00> : vector<16xf32>
      %77 = vector.multi_reduction <add>, %69, %cst_44 [0] : vector<64x16xf32> to vector<16xf32>
      %78 = vector.shape_cast %77 : vector<16xf32> to vector<1x16xf32>
      %79 = arith.addf %76, %78 : vector<1x16xf32>
      %c0_45 = arith.constant 0 : index
      %c16_46 = arith.constant 16 : index
      %80 = vector.load %arg17[%c0_45, %c16_46] : memref<1x64xf32, #tpu.memory_space<vmem>>, vector<1x16xf32>
      tpu.vector_store %arg17[%c0_45, %c16_46], %79 {strides = array<i32>} : memref<1x64xf32, #tpu.memory_space<vmem>>, vector<1x16xf32>,
      %81 = vector.extract_strided_slice %8 {offsets = [0, 32], sizes = [64, 16], strides = [1, 1]} : vector<64x64xbf16> to vector<64x16xbf16>
      %c2 = arith.constant 2 : index
      %c0_47 = arith.constant 0 : index
      %c0_48 = arith.constant 0 : index
      %82 = vector.load %arg8[%c2, %c0_47, %c0_48] : memref<4x16x16xbf16, #tpu.memory_space<vmem>>, vector<1x16x16xbf16>
      %83 = vector.shape_cast %82 : vector<1x16x16xbf16> to vector<16x16xbf16>
      %cst_49 = arith.constant dense<0.000000e+00> : vector<64x16xf32>
      %84 = tpu.matmul %81, %83, %cst_49 {dimension_numbers = #tpu.dot_dimension_numbers<[1], [0], [0], [1], [0, 0, 1, 1], [], []>} : vector<64x16xbf16>, vector<16x16xbf16>, vector<64x16xf32> -> vector<64x16xf32>
      %85 = vector.extract_strided_slice %9 {offsets = [2, 0], sizes = [1, 16], strides = [1, 1]} : vector<4x16xf32> to vector<1x16xf32>
      %86 = vector.broadcast %85 : vector<1x16xf32> to vector<64x16xf32>
      %87 = arith.addf %84, %86 : vector<64x16xf32>
      %cst_50 = arith.constant dense<0xFF800000> : vector<64xf32>
      %88 = vector.multi_reduction <maximumf>, %87, %cst_50 [1] : vector<64x16xf32> to vector<64xf32>
      %89 = vector.shape_cast %88 : vector<64xf32> to vector<64x1xf32>
      %90 = vector.broadcast %89 : vector<64x1xf32> to vector<64x16xf32>
      %91 = arith.subf %87, %90 : vector<64x16xf32>
      %92 = math.exp %91 : vector<64x16xf32>
      %cst_51 = arith.constant dense<0.000000e+00> : vector<64xf32>
      %93 = vector.multi_reduction <add>, %92, %cst_51 [1] : vector<64x16xf32> to vector<64xf32>
      %94 = vector.shape_cast %93 : vector<64xf32> to vector<64x1xf32>
      %95 = tpu.reciprocal %94 {approx = true} : vector<64x1xf32> -> vector<64x1xf32>
      %96 = vector.broadcast %95 : vector<64x1xf32> to vector<64x16xf32>
      %97 = arith.mulf %92, %96 : vector<64x16xf32>
      %98 = vector.extract_strided_slice %24 {offsets = [0, 32], sizes = [64, 16], strides = [1, 1]} : vector<64x64xbf16> to vector<64x16xbf16>
      %99 = arith.truncf %97 : vector<64x16xf32> to vector<64x16xbf16>
      %cst_52 = arith.constant dense<0.000000e+00> : vector<16x16xf32>
      %100 = tpu.matmul %98, %99, %cst_52 {dimension_numbers = #tpu.dot_dimension_numbers<[0], [0], [1], [1], [0, 1, 1, 1], [], []>} : vector<64x16xbf16>, vector<64x16xbf16>, vector<16x16xf32> -> vector<16x16xf32>
      %c0_53 = arith.constant 0 : index
      %c32 = arith.constant 32 : index
      %101 = vector.load %arg16[%c0_53, %c32] : memref<16x64xf32, #tpu.memory_space<vmem>>, vector<16x16xf32>
      %102 = arith.addf %101, %100 : vector<16x16xf32>
      %c0_54 = arith.constant 0 : index
      %c32_55 = arith.constant 32 : index
      %103 = vector.load %arg16[%c0_54, %c32_55] : memref<16x64xf32, #tpu.memory_space<vmem>>, vector<16x16xf32>
      tpu.vector_store %arg16[%c0_54, %c32_55], %102 {strides = array<i32>} : memref<16x64xf32, #tpu.memory_space<vmem>>, vector<16x16xf32>,
      %c0_56 = arith.constant 0 : index
      %c32_57 = arith.constant 32 : index
      %104 = vector.load %arg17[%c0_56, %c32_57] : memref<1x64xf32, #tpu.memory_space<vmem>>, vector<1x16xf32>
      %cst_58 = arith.constant dense<0.000000e+00> : vector<16xf32>
      %105 = vector.multi_reduction <add>, %97, %cst_58 [0] : vector<64x16xf32> to vector<16xf32>
      %106 = vector.shape_cast %105 : vector<16xf32> to vector<1x16xf32>
      %107 = arith.addf %104, %106 : vector<1x16xf32>
      %c0_59 = arith.constant 0 : index
      %c32_60 = arith.constant 32 : index
      %108 = vector.load %arg17[%c0_59, %c32_60] : memref<1x64xf32, #tpu.memory_space<vmem>>, vector<1x16xf32>
      tpu.vector_store %arg17[%c0_59, %c32_60], %107 {strides = array<i32>} : memref<1x64xf32, #tpu.memory_space<vmem>>, vector<1x16xf32>,
      %109 = vector.extract_strided_slice %8 {offsets = [0, 48], sizes = [64, 16], strides = [1, 1]} : vector<64x64xbf16> to vector<64x16xbf16>
      %c3 = arith.constant 3 : index
      %c0_61 = arith.constant 0 : index
      %c0_62 = arith.constant 0 : index
      %110 = vector.load %arg8[%c3, %c0_61, %c0_62] : memref<4x16x16xbf16, #tpu.memory_space<vmem>>, vector<1x16x16xbf16>
      %111 = vector.shape_cast %110 : vector<1x16x16xbf16> to vector<16x16xbf16>
      %cst_63 = arith.constant dense<0.000000e+00> : vector<64x16xf32>
      %112 = tpu.matmul %109, %111, %cst_63 {dimension_numbers = #tpu.dot_dimension_numbers<[1], [0], [0], [1], [0, 0, 1, 1], [], []>} : vector<64x16xbf16>, vector<16x16xbf16>, vector<64x16xf32> -> vector<64x16xf32>
      %113 = vector.extract_strided_slice %9 {offsets = [3, 0], sizes = [1, 16], strides = [1, 1]} : vector<4x16xf32> to vector<1x16xf32>
      %114 = vector.broadcast %113 : vector<1x16xf32> to vector<64x16xf32>
      %115 = arith.addf %112, %114 : vector<64x16xf32>
      %cst_64 = arith.constant dense<0xFF800000> : vector<64xf32>
      %116 = vector.multi_reduction <maximumf>, %115, %cst_64 [1] : vector<64x16xf32> to vector<64xf32>
      %117 = vector.shape_cast %116 : vector<64xf32> to vector<64x1xf32>
      %118 = vector.broadcast %117 : vector<64x1xf32> to vector<64x16xf32>
      %119 = arith.subf %115, %118 : vector<64x16xf32>
      %120 = math.exp %119 : vector<64x16xf32>
      %cst_65 = arith.constant dense<0.000000e+00> : vector<64xf32>
      %121 = vector.multi_reduction <add>, %120, %cst_65 [1] : vector<64x16xf32> to vector<64xf32>
      %122 = vector.shape_cast %121 : vector<64xf32> to vector<64x1xf32>
      %123 = tpu.reciprocal %122 {approx = true} : vector<64x1xf32> -> vector<64x1xf32>
      %124 = vector.broadcast %123 : vector<64x1xf32> to vector<64x16xf32>
      %125 = arith.mulf %120, %124 : vector<64x16xf32>
      %126 = vector.extract_strided_slice %24 {offsets = [0, 48], sizes = [64, 16], strides = [1, 1]} : vector<64x64xbf16> to vector<64x16xbf16>
      %127 = arith.truncf %125 : vector<64x16xf32> to vector<64x16xbf16>
      %cst_66 = arith.constant dense<0.000000e+00> : vector<16x16xf32>
      %128 = tpu.matmul %126, %127, %cst_66 {dimension_numbers = #tpu.dot_dimension_numbers<[0], [0], [1], [1], [0, 1, 1, 1], [], []>} : vector<64x16xbf16>, vector<64x16xbf16>, vector<16x16xf32> -> vector<16x16xf32>
      %c0_67 = arith.constant 0 : index
      %c48 = arith.constant 48 : index
      %129 = vector.load %arg16[%c0_67, %c48] : memref<16x64xf32, #tpu.memory_space<vmem>>, vector<16x16xf32>
      %130 = arith.addf %129, %128 : vector<16x16xf32>
      %c0_68 = arith.constant 0 : index
      %c48_69 = arith.constant 48 : index
      %131 = vector.load %arg16[%c0_68, %c48_69] : memref<16x64xf32, #tpu.memory_space<vmem>>, vector<16x16xf32>
      tpu.vector_store %arg16[%c0_68, %c48_69], %130 {strides = array<i32>} : memref<16x64xf32, #tpu.memory_space<vmem>>, vector<16x16xf32>,
      %c0_70 = arith.constant 0 : index
      %c48_71 = arith.constant 48 : index
      %132 = vector.load %arg17[%c0_70, %c48_71] : memref<1x64xf32, #tpu.memory_space<vmem>>, vector<1x16xf32>
      %cst_72 = arith.constant dense<0.000000e+00> : vector<16xf32>
      %133 = vector.multi_reduction <add>, %125, %cst_72 [0] : vector<64x16xf32> to vector<16xf32>
      %134 = vector.shape_cast %133 : vector<16xf32> to vector<1x16xf32>
      %135 = arith.addf %132, %134 : vector<1x16xf32>
      %c0_73 = arith.constant 0 : index
      %c48_74 = arith.constant 48 : index
      %136 = vector.load %arg17[%c0_73, %c48_74] : memref<1x64xf32, #tpu.memory_space<vmem>>, vector<1x16xf32>
      tpu.vector_store %arg17[%c0_73, %c48_74], %135 {strides = array<i32>} : memref<1x64xf32, #tpu.memory_space<vmem>>, vector<1x16xf32>,
    } else {
    }
    %c1_i32 = arith.constant 1 : i32
    %13 = arith.cmpi eq, %arg1, %c1_i32 : i32
    %14 = arith.extui %13 : i1 to i32
    %c0_i32_9 = arith.constant 0 : i32
    %15 = arith.cmpi ne, %14, %c0_i32_9 : i32
    scf.if %15 {
      %c0_i32_10 = arith.constant 0 : i32
      %16 = arith.cmpi eq, %arg2, %c0_i32_10 : i32
      %17 = arith.extui %16 : i1 to i32
      %c0_i32_11 = arith.constant 0 : i32
      %18 = arith.cmpi ne, %17, %c0_i32_11 : i32
      scf.if %18 {
        %c0_47 = arith.constant 0 : index
        %c0_48 = arith.constant 0 : index
        %113 = vector.load %arg16[%c0_47, %c0_48] : memref<16x64xf32, #tpu.memory_space<vmem>>, vector<16x64xf32>
        %c0_49 = arith.constant 0 : index
        %c0_50 = arith.constant 0 : index
        %114 = vector.load %arg17[%c0_49, %c0_50] : memref<1x64xf32, #tpu.memory_space<vmem>>, vector<1x64xf32>
        %cst_51 = arith.constant 9.99999974E-6 : f32
        %115 = vector.broadcast %cst_51 : f32 to vector<1x64xf32>
        %116 = arith.addf %114, %115 : vector<1x64xf32>
        %117 = vector.broadcast %116 : vector<1x64xf32> to vector<16x64xf32>
        %118 = arith.divf %113, %117 : vector<16x64xf32>
        %119 = arith.truncf %118 : vector<16x64xf32> to vector<16x64xbf16>
        %c0_52 = arith.constant 0 : index
        %c0_53 = arith.constant 0 : index
        %120 = vector.load %arg10[%c0_52, %c0_53] : memref<16x16xbf16, #tpu.memory_space<vmem>>, vector<16x16xbf16>
        %cst_54 = arith.constant dense<0.000000e+00> : vector<16x64xf32>
        %121 = tpu.matmul %120, %119, %cst_54 {dimension_numbers = #tpu.dot_dimension_numbers<[0], [0], [1], [1], [0, 1, 1, 1], [], []>} : vector<16x16xbf16>, vector<16x64xbf16>, vector<16x64xf32> -> vector<16x64xf32>
        %122 = arith.truncf %121 : vector<16x64xf32> to vector<16x64xbf16>
        %c0_55 = arith.constant 0 : index
        %c0_56 = arith.constant 0 : index
        %123 = vector.load %arg11[%c0_55, %c0_56] : memref<16x16xbf16, #tpu.memory_space<vmem>>, vector<16x16xbf16>
        %cst_57 = arith.constant dense<0.000000e+00> : vector<16x64xf32>
        %124 = tpu.matmul %123, %119, %cst_57 {dimension_numbers = #tpu.dot_dimension_numbers<[0], [0], [1], [1], [0, 1, 1, 1], [], []>} : vector<16x16xbf16>, vector<16x64xbf16>, vector<16x64xf32> -> vector<16x64xf32>
        %125 = arith.truncf %124 : vector<16x64xf32> to vector<16x64xbf16>
        %c0_58 = arith.constant 0 : index
        %c0_59 = arith.constant 0 : index
        %126 = vector.load %arg12[%c0_58, %c0_59] : memref<16x16xbf16, #tpu.memory_space<vmem>>, vector<16x16xbf16>
        %cst_60 = arith.constant dense<0.000000e+00> : vector<16x64xf32>
        %127 = tpu.matmul %126, %119, %cst_60 {dimension_numbers = #tpu.dot_dimension_numbers<[0], [0], [1], [1], [0, 1, 1, 1], [], []>} : vector<16x16xbf16>, vector<16x64xbf16>, vector<16x64xf32> -> vector<16x64xf32>
        %128 = arith.truncf %127 : vector<16x64xf32> to vector<16x64xbf16>
        %129 = vector.extract_strided_slice %122 {offsets = [0, 0], sizes = [16, 16], strides = [1, 1]} : vector<16x64xbf16> to vector<16x16xbf16>
        %130 = vector.extract_strided_slice %125 {offsets = [0, 0], sizes = [16, 16], strides = [1, 1]} : vector<16x64xbf16> to vector<16x16xbf16>
        %131 = vector.extract_strided_slice %128 {offsets = [0, 0], sizes = [16, 16], strides = [1, 1]} : vector<16x64xbf16> to vector<16x16xbf16>
        %cst_61 = arith.constant dense<0.000000e+00> : vector<16x16xf32>
        %132 = tpu.matmul %129, %130, %cst_61 {dimension_numbers = #tpu.dot_dimension_numbers<[0], [0], [1], [1], [0, 1, 1, 1], [], []>} : vector<16x16xbf16>, vector<16x16xbf16>, vector<16x16xf32> -> vector<16x16xf32>
        %cst_62 = arith.constant dense<0xFF800000> : vector<16xf32>
        %133 = vector.multi_reduction <maximumf>, %132, %cst_62 [1] : vector<16x16xf32> to vector<16xf32>
        %134 = vector.shape_cast %133 : vector<16xf32> to vector<16x1xf32>
        %135 = vector.broadcast %134 : vector<16x1xf32> to vector<16x16xf32>
        %136 = arith.subf %132, %135 : vector<16x16xf32>
        %137 = math.exp %136 : vector<16x16xf32>
        %cst_63 = arith.constant dense<0.000000e+00> : vector<16xf32>
        %138 = vector.multi_reduction <add>, %137, %cst_63 [1] : vector<16x16xf32> to vector<16xf32>
        %139 = vector.shape_cast %138 : vector<16xf32> to vector<16x1xf32>
        %140 = tpu.reciprocal %139 {approx = true} : vector<16x1xf32> -> vector<16x1xf32>
        %141 = vector.broadcast %140 : vector<16x1xf32> to vector<16x16xf32>
        %142 = arith.mulf %137, %141 : vector<16x16xf32>
        %143 = arith.truncf %142 : vector<16x16xf32> to vector<16x16xbf16>
        %cst_64 = arith.constant dense<0.000000e+00> : vector<16x16xf32>
        %144 = tpu.matmul %131, %143, %cst_64 {dimension_numbers = #tpu.dot_dimension_numbers<[1], [1], [0], [0], [0, 0, 1, 0], [], []>} : vector<16x16xbf16>, vector<16x16xbf16>, vector<16x16xf32> -> vector<16x16xf32>
        %145 = arith.truncf %144 : vector<16x16xf32> to vector<16x16xbf16>
        %c0_65 = arith.constant 0 : index
        %c0_66 = arith.constant 0 : index
        %146 = vector.load %arg18[%c0_65, %c0_66] : memref<16x64xbf16, #tpu.memory_space<vmem>>, vector<16x16xbf16>
        tpu.vector_store %arg18[%c0_65, %c0_66], %145 {strides = array<i32>} : memref<16x64xbf16, #tpu.memory_space<vmem>>, vector<16x16xbf16>,
        %147 = vector.extract_strided_slice %122 {offsets = [0, 16], sizes = [16, 16], strides = [1, 1]} : vector<16x64xbf16> to vector<16x16xbf16>
        %148 = vector.extract_strided_slice %125 {offsets = [0, 16], sizes = [16, 16], strides = [1, 1]} : vector<16x64xbf16> to vector<16x16xbf16>
        %149 = vector.extract_strided_slice %128 {offsets = [0, 16], sizes = [16, 16], strides = [1, 1]} : vector<16x64xbf16> to vector<16x16xbf16>
        %cst_67 = arith.constant dense<0.000000e+00> : vector<16x16xf32>
        %150 = tpu.matmul %147, %148, %cst_67 {dimension_numbers = #tpu.dot_dimension_numbers<[0], [0], [1], [1], [0, 1, 1, 1], [], []>} : vector<16x16xbf16>, vector<16x16xbf16>, vector<16x16xf32> -> vector<16x16xf32>
        %cst_68 = arith.constant dense<0xFF800000> : vector<16xf32>
        %151 = vector.multi_reduction <maximumf>, %150, %cst_68 [1] : vector<16x16xf32> to vector<16xf32>
        %152 = vector.shape_cast %151 : vector<16xf32> to vector<16x1xf32>
        %153 = vector.broadcast %152 : vector<16x1xf32> to vector<16x16xf32>
        %154 = arith.subf %150, %153 : vector<16x16xf32>
        %155 = math.exp %154 : vector<16x16xf32>
        %cst_69 = arith.constant dense<0.000000e+00> : vector<16xf32>
        %156 = vector.multi_reduction <add>, %155, %cst_69 [1] : vector<16x16xf32> to vector<16xf32>
        %157 = vector.shape_cast %156 : vector<16xf32> to vector<16x1xf32>
        %158 = tpu.reciprocal %157 {approx = true} : vector<16x1xf32> -> vector<16x1xf32>
        %159 = vector.broadcast %158 : vector<16x1xf32> to vector<16x16xf32>
        %160 = arith.mulf %155, %159 : vector<16x16xf32>
        %161 = arith.truncf %160 : vector<16x16xf32> to vector<16x16xbf16>
        %cst_70 = arith.constant dense<0.000000e+00> : vector<16x16xf32>
        %162 = tpu.matmul %149, %161, %cst_70 {dimension_numbers = #tpu.dot_dimension_numbers<[1], [1], [0], [0], [0, 0, 1, 0], [], []>} : vector<16x16xbf16>, vector<16x16xbf16>, vector<16x16xf32> -> vector<16x16xf32>
        %163 = arith.truncf %162 : vector<16x16xf32> to vector<16x16xbf16>
        %c0_71 = arith.constant 0 : index
        %c16 = arith.constant 16 : index
        %164 = vector.load %arg18[%c0_71, %c16] : memref<16x64xbf16, #tpu.memory_space<vmem>>, vector<16x16xbf16>
        tpu.vector_store %arg18[%c0_71, %c16], %163 {strides = array<i32>} : memref<16x64xbf16, #tpu.memory_space<vmem>>, vector<16x16xbf16>,
        %165 = vector.extract_strided_slice %122 {offsets = [0, 32], sizes = [16, 16], strides = [1, 1]} : vector<16x64xbf16> to vector<16x16xbf16>
        %166 = vector.extract_strided_slice %125 {offsets = [0, 32], sizes = [16, 16], strides = [1, 1]} : vector<16x64xbf16> to vector<16x16xbf16>
        %167 = vector.extract_strided_slice %128 {offsets = [0, 32], sizes = [16, 16], strides = [1, 1]} : vector<16x64xbf16> to vector<16x16xbf16>
        %cst_72 = arith.constant dense<0.000000e+00> : vector<16x16xf32>
        %168 = tpu.matmul %165, %166, %cst_72 {dimension_numbers = #tpu.dot_dimension_numbers<[0], [0], [1], [1], [0, 1, 1, 1], [], []>} : vector<16x16xbf16>, vector<16x16xbf16>, vector<16x16xf32> -> vector<16x16xf32>
        %cst_73 = arith.constant dense<0xFF800000> : vector<16xf32>
        %169 = vector.multi_reduction <maximumf>, %168, %cst_73 [1] : vector<16x16xf32> to vector<16xf32>
        %170 = vector.shape_cast %169 : vector<16xf32> to vector<16x1xf32>
        %171 = vector.broadcast %170 : vector<16x1xf32> to vector<16x16xf32>
        %172 = arith.subf %168, %171 : vector<16x16xf32>
        %173 = math.exp %172 : vector<16x16xf32>
        %cst_74 = arith.constant dense<0.000000e+00> : vector<16xf32>
        %174 = vector.multi_reduction <add>, %173, %cst_74 [1] : vector<16x16xf32> to vector<16xf32>
        %175 = vector.shape_cast %174 : vector<16xf32> to vector<16x1xf32>
        %176 = tpu.reciprocal %175 {approx = true} : vector<16x1xf32> -> vector<16x1xf32>
        %177 = vector.broadcast %176 : vector<16x1xf32> to vector<16x16xf32>
        %178 = arith.mulf %173, %177 : vector<16x16xf32>
        %179 = arith.truncf %178 : vector<16x16xf32> to vector<16x16xbf16>
        %cst_75 = arith.constant dense<0.000000e+00> : vector<16x16xf32>
        %180 = tpu.matmul %167, %179, %cst_75 {dimension_numbers = #tpu.dot_dimension_numbers<[1], [1], [0], [0], [0, 0, 1, 0], [], []>} : vector<16x16xbf16>, vector<16x16xbf16>, vector<16x16xf32> -> vector<16x16xf32>
        %181 = arith.truncf %180 : vector<16x16xf32> to vector<16x16xbf16>
        %c0_76 = arith.constant 0 : index
        %c32 = arith.constant 32 : index
        %182 = vector.load %arg18[%c0_76, %c32] : memref<16x64xbf16, #tpu.memory_space<vmem>>, vector<16x16xbf16>
        tpu.vector_store %arg18[%c0_76, %c32], %181 {strides = array<i32>} : memref<16x64xbf16, #tpu.memory_space<vmem>>, vector<16x16xbf16>,
        %183 = vector.extract_strided_slice %122 {offsets = [0, 48], sizes = [16, 16], strides = [1, 1]} : vector<16x64xbf16> to vector<16x16xbf16>
        %184 = vector.extract_strided_slice %125 {offsets = [0, 48], sizes = [16, 16], strides = [1, 1]} : vector<16x64xbf16> to vector<16x16xbf16>
        %185 = vector.extract_strided_slice %128 {offsets = [0, 48], sizes = [16, 16], strides = [1, 1]} : vector<16x64xbf16> to vector<16x16xbf16>
        %cst_77 = arith.constant dense<0.000000e+00> : vector<16x16xf32>
        %186 = tpu.matmul %183, %184, %cst_77 {dimension_numbers = #tpu.dot_dimension_numbers<[0], [0], [1], [1], [0, 1, 1, 1], [], []>} : vector<16x16xbf16>, vector<16x16xbf16>, vector<16x16xf32> -> vector<16x16xf32>
        %cst_78 = arith.constant dense<0xFF800000> : vector<16xf32>
        %187 = vector.multi_reduction <maximumf>, %186, %cst_78 [1] : vector<16x16xf32> to vector<16xf32>
        %188 = vector.shape_cast %187 : vector<16xf32> to vector<16x1xf32>
        %189 = vector.broadcast %188 : vector<16x1xf32> to vector<16x16xf32>
        %190 = arith.subf %186, %189 : vector<16x16xf32>
        %191 = math.exp %190 : vector<16x16xf32>
        %cst_79 = arith.constant dense<0.000000e+00> : vector<16xf32>
        %192 = vector.multi_reduction <add>, %191, %cst_79 [1] : vector<16x16xf32> to vector<16xf32>
        %193 = vector.shape_cast %192 : vector<16xf32> to vector<16x1xf32>
        %194 = tpu.reciprocal %193 {approx = true} : vector<16x1xf32> -> vector<16x1xf32>
        %195 = vector.broadcast %194 : vector<16x1xf32> to vector<16x16xf32>
        %196 = arith.mulf %191, %195 : vector<16x16xf32>
        %197 = arith.truncf %196 : vector<16x16xf32> to vector<16x16xbf16>
        %cst_80 = arith.constant dense<0.000000e+00> : vector<16x16xf32>
        %198 = tpu.matmul %185, %197, %cst_80 {dimension_numbers = #tpu.dot_dimension_numbers<[1], [1], [0], [0], [0, 0, 1, 0], [], []>} : vector<16x16xbf16>, vector<16x16xbf16>, vector<16x16xf32> -> vector<16x16xf32>
        %199 = arith.truncf %198 : vector<16x16xf32> to vector<16x16xbf16>
        %c0_81 = arith.constant 0 : index
        %c48 = arith.constant 48 : index
        %200 = vector.load %arg18[%c0_81, %c48] : memref<16x64xbf16, #tpu.memory_space<vmem>>, vector<16x16xbf16>
        tpu.vector_store %arg18[%c0_81, %c48], %199 {strides = array<i32>} : memref<16x64xbf16, #tpu.memory_space<vmem>>, vector<16x16xbf16>,
      } else {
      }
      %c0_12 = arith.constant 0 : index
      %c0_13 = arith.constant 0 : index
      %19 = vector.load %arg18[%c0_12, %c0_13] : memref<16x64xbf16, #tpu.memory_space<vmem>>, vector<16x64xbf16>
      %20 = vector.extract_strided_slice %8 {offsets = [0, 0], sizes = [64, 16], strides = [1, 1]} : vector<64x64xbf16> to vector<64x16xbf16>
      %c0_14 = arith.constant 0 : index
      %c0_15 = arith.constant 0 : index
      %c0_16 = arith.constant 0 : index
      %21 = vector.load %arg8[%c0_14, %c0_15, %c0_16] : memref<4x16x16xbf16, #tpu.memory_space<vmem>>, vector<1x16x16xbf16>
      %22 = vector.shape_cast %21 : vector<1x16x16xbf16> to vector<16x16xbf16>
      %cst_17 = arith.constant dense<0.000000e+00> : vector<64x16xf32>
      %23 = tpu.matmul %20, %22, %cst_17 {dimension_numbers = #tpu.dot_dimension_numbers<[1], [0], [0], [1], [0, 0, 1, 1], [], []>} : vector<64x16xbf16>, vector<16x16xbf16>, vector<64x16xf32> -> vector<64x16xf32>
      %24 = vector.extract_strided_slice %9 {offsets = [0, 0], sizes = [1, 16], strides = [1, 1]} : vector<4x16xf32> to vector<1x16xf32>
      %25 = vector.broadcast %24 : vector<1x16xf32> to vector<64x16xf32>
      %26 = arith.addf %23, %25 : vector<64x16xf32>
      %cst_18 = arith.constant dense<0xFF800000> : vector<64xf32>
      %27 = vector.multi_reduction <maximumf>, %26, %cst_18 [1] : vector<64x16xf32> to vector<64xf32>
      %28 = vector.shape_cast %27 : vector<64xf32> to vector<64x1xf32>
      %29 = vector.broadcast %28 : vector<64x1xf32> to vector<64x16xf32>
      %30 = arith.subf %26, %29 : vector<64x16xf32>
      %31 = math.exp %30 : vector<64x16xf32>
      %cst_19 = arith.constant dense<0.000000e+00> : vector<64xf32>
      %32 = vector.multi_reduction <add>, %31, %cst_19 [1] : vector<64x16xf32> to vector<64xf32>
      %33 = vector.shape_cast %32 : vector<64xf32> to vector<64x1xf32>
      %34 = tpu.reciprocal %33 {approx = true} : vector<64x1xf32> -> vector<64x1xf32>
      %35 = vector.broadcast %34 : vector<64x1xf32> to vector<64x16xf32>
      %36 = arith.mulf %31, %35 : vector<64x16xf32>
      %37 = arith.truncf %36 : vector<64x16xf32> to vector<64x16xbf16>
      %38 = vector.extract_strided_slice %19 {offsets = [0, 0], sizes = [16, 16], strides = [1, 1]} : vector<16x64xbf16> to vector<16x16xbf16>
      %cst_20 = arith.constant dense<0.000000e+00> : vector<64x16xf32>
      %39 = tpu.matmul %37, %38, %cst_20 {dimension_numbers = #tpu.dot_dimension_numbers<[1], [1], [0], [0], [0, 0, 1, 0], [], []>} : vector<64x16xbf16>, vector<16x16xbf16>, vector<64x16xf32> -> vector<64x16xf32>
      %40 = arith.truncf %39 : vector<64x16xf32> to vector<64x16xbf16>
      %41 = vector.extract_strided_slice %8 {offsets = [0, 16], sizes = [64, 16], strides = [1, 1]} : vector<64x64xbf16> to vector<64x16xbf16>
      %c1 = arith.constant 1 : index
      %c0_21 = arith.constant 0 : index
      %c0_22 = arith.constant 0 : index
      %42 = vector.load %arg8[%c1, %c0_21, %c0_22] : memref<4x16x16xbf16, #tpu.memory_space<vmem>>, vector<1x16x16xbf16>
      %43 = vector.shape_cast %42 : vector<1x16x16xbf16> to vector<16x16xbf16>
      %cst_23 = arith.constant dense<0.000000e+00> : vector<64x16xf32>
      %44 = tpu.matmul %41, %43, %cst_23 {dimension_numbers = #tpu.dot_dimension_numbers<[1], [0], [0], [1], [0, 0, 1, 1], [], []>} : vector<64x16xbf16>, vector<16x16xbf16>, vector<64x16xf32> -> vector<64x16xf32>
      %45 = vector.extract_strided_slice %9 {offsets = [1, 0], sizes = [1, 16], strides = [1, 1]} : vector<4x16xf32> to vector<1x16xf32>
      %46 = vector.broadcast %45 : vector<1x16xf32> to vector<64x16xf32>
      %47 = arith.addf %44, %46 : vector<64x16xf32>
      %cst_24 = arith.constant dense<0xFF800000> : vector<64xf32>
      %48 = vector.multi_reduction <maximumf>, %47, %cst_24 [1] : vector<64x16xf32> to vector<64xf32>
      %49 = vector.shape_cast %48 : vector<64xf32> to vector<64x1xf32>
      %50 = vector.broadcast %49 : vector<64x1xf32> to vector<64x16xf32>
      %51 = arith.subf %47, %50 : vector<64x16xf32>
      %52 = math.exp %51 : vector<64x16xf32>
      %cst_25 = arith.constant dense<0.000000e+00> : vector<64xf32>
      %53 = vector.multi_reduction <add>, %52, %cst_25 [1] : vector<64x16xf32> to vector<64xf32>
      %54 = vector.shape_cast %53 : vector<64xf32> to vector<64x1xf32>
      %55 = tpu.reciprocal %54 {approx = true} : vector<64x1xf32> -> vector<64x1xf32>
      %56 = vector.broadcast %55 : vector<64x1xf32> to vector<64x16xf32>
      %57 = arith.mulf %52, %56 : vector<64x16xf32>
      %58 = arith.truncf %57 : vector<64x16xf32> to vector<64x16xbf16>
      %59 = vector.extract_strided_slice %19 {offsets = [0, 16], sizes = [16, 16], strides = [1, 1]} : vector<16x64xbf16> to vector<16x16xbf16>
      %cst_26 = arith.constant dense<0.000000e+00> : vector<64x16xf32>
      %60 = tpu.matmul %58, %59, %cst_26 {dimension_numbers = #tpu.dot_dimension_numbers<[1], [1], [0], [0], [0, 0, 1, 0], [], []>} : vector<64x16xbf16>, vector<16x16xbf16>, vector<64x16xf32> -> vector<64x16xf32>
      %61 = arith.truncf %60 : vector<64x16xf32> to vector<64x16xbf16>
      %62 = vector.extract_strided_slice %8 {offsets = [0, 32], sizes = [64, 16], strides = [1, 1]} : vector<64x64xbf16> to vector<64x16xbf16>
      %c2 = arith.constant 2 : index
      %c0_27 = arith.constant 0 : index
      %c0_28 = arith.constant 0 : index
      %63 = vector.load %arg8[%c2, %c0_27, %c0_28] : memref<4x16x16xbf16, #tpu.memory_space<vmem>>, vector<1x16x16xbf16>
      %64 = vector.shape_cast %63 : vector<1x16x16xbf16> to vector<16x16xbf16>
      %cst_29 = arith.constant dense<0.000000e+00> : vector<64x16xf32>
      %65 = tpu.matmul %62, %64, %cst_29 {dimension_numbers = #tpu.dot_dimension_numbers<[1], [0], [0], [1], [0, 0, 1, 1], [], []>} : vector<64x16xbf16>, vector<16x16xbf16>, vector<64x16xf32> -> vector<64x16xf32>
      %66 = vector.extract_strided_slice %9 {offsets = [2, 0], sizes = [1, 16], strides = [1, 1]} : vector<4x16xf32> to vector<1x16xf32>
      %67 = vector.broadcast %66 : vector<1x16xf32> to vector<64x16xf32>
      %68 = arith.addf %65, %67 : vector<64x16xf32>
      %cst_30 = arith.constant dense<0xFF800000> : vector<64xf32>
      %69 = vector.multi_reduction <maximumf>, %68, %cst_30 [1] : vector<64x16xf32> to vector<64xf32>
      %70 = vector.shape_cast %69 : vector<64xf32> to vector<64x1xf32>
      %71 = vector.broadcast %70 : vector<64x1xf32> to vector<64x16xf32>
      %72 = arith.subf %68, %71 : vector<64x16xf32>
      %73 = math.exp %72 : vector<64x16xf32>
      %cst_31 = arith.constant dense<0.000000e+00> : vector<64xf32>
      %74 = vector.multi_reduction <add>, %73, %cst_31 [1] : vector<64x16xf32> to vector<64xf32>
      %75 = vector.shape_cast %74 : vector<64xf32> to vector<64x1xf32>
      %76 = tpu.reciprocal %75 {approx = true} : vector<64x1xf32> -> vector<64x1xf32>
      %77 = vector.broadcast %76 : vector<64x1xf32> to vector<64x16xf32>
      %78 = arith.mulf %73, %77 : vector<64x16xf32>
      %79 = arith.truncf %78 : vector<64x16xf32> to vector<64x16xbf16>
      %80 = vector.extract_strided_slice %19 {offsets = [0, 32], sizes = [16, 16], strides = [1, 1]} : vector<16x64xbf16> to vector<16x16xbf16>
      %cst_32 = arith.constant dense<0.000000e+00> : vector<64x16xf32>
      %81 = tpu.matmul %79, %80, %cst_32 {dimension_numbers = #tpu.dot_dimension_numbers<[1], [1], [0], [0], [0, 0, 1, 0], [], []>} : vector<64x16xbf16>, vector<16x16xbf16>, vector<64x16xf32> -> vector<64x16xf32>
      %82 = arith.truncf %81 : vector<64x16xf32> to vector<64x16xbf16>
      %83 = vector.extract_strided_slice %8 {offsets = [0, 48], sizes = [64, 16], strides = [1, 1]} : vector<64x64xbf16> to vector<64x16xbf16>
      %c3 = arith.constant 3 : index
      %c0_33 = arith.constant 0 : index
      %c0_34 = arith.constant 0 : index
      %84 = vector.load %arg8[%c3, %c0_33, %c0_34] : memref<4x16x16xbf16, #tpu.memory_space<vmem>>, vector<1x16x16xbf16>
      %85 = vector.shape_cast %84 : vector<1x16x16xbf16> to vector<16x16xbf16>
      %cst_35 = arith.constant dense<0.000000e+00> : vector<64x16xf32>
      %86 = tpu.matmul %83, %85, %cst_35 {dimension_numbers = #tpu.dot_dimension_numbers<[1], [0], [0], [1], [0, 0, 1, 1], [], []>} : vector<64x16xbf16>, vector<16x16xbf16>, vector<64x16xf32> -> vector<64x16xf32>
      %87 = vector.extract_strided_slice %9 {offsets = [3, 0], sizes = [1, 16], strides = [1, 1]} : vector<4x16xf32> to vector<1x16xf32>
      %88 = vector.broadcast %87 : vector<1x16xf32> to vector<64x16xf32>
      %89 = arith.addf %86, %88 : vector<64x16xf32>
      %cst_36 = arith.constant dense<0xFF800000> : vector<64xf32>
      %90 = vector.multi_reduction <maximumf>, %89, %cst_36 [1] : vector<64x16xf32> to vector<64xf32>
      %91 = vector.shape_cast %90 : vector<64xf32> to vector<64x1xf32>
      %92 = vector.broadcast %91 : vector<64x1xf32> to vector<64x16xf32>
      %93 = arith.subf %89, %92 : vector<64x16xf32>
      %94 = math.exp %93 : vector<64x16xf32>
      %cst_37 = arith.constant dense<0.000000e+00> : vector<64xf32>
      %95 = vector.multi_reduction <add>, %94, %cst_37 [1] : vector<64x16xf32> to vector<64xf32>
      %96 = vector.shape_cast %95 : vector<64xf32> to vector<64x1xf32>
      %97 = tpu.reciprocal %96 {approx = true} : vector<64x1xf32> -> vector<64x1xf32>
      %98 = vector.broadcast %97 : vector<64x1xf32> to vector<64x16xf32>
      %99 = arith.mulf %94, %98 : vector<64x16xf32>
      %100 = arith.truncf %99 : vector<64x16xf32> to vector<64x16xbf16>
      %101 = vector.extract_strided_slice %19 {offsets = [0, 48], sizes = [16, 16], strides = [1, 1]} : vector<16x64xbf16> to vector<16x16xbf16>
      %cst_38 = arith.constant dense<0.000000e+00> : vector<64x16xf32>
      %102 = tpu.matmul %100, %101, %cst_38 {dimension_numbers = #tpu.dot_dimension_numbers<[1], [1], [0], [0], [0, 0, 1, 0], [], []>} : vector<64x16xbf16>, vector<16x16xbf16>, vector<64x16xf32> -> vector<64x16xf32>
      %103 = arith.truncf %102 : vector<64x16xf32> to vector<64x16xbf16>
      %104 = tpu.concatenate %40, %61, %82, %103 in 1 : vector<64x16xbf16>, vector<64x16xbf16>, vector<64x16xbf16>, vector<64x16xbf16> -> vector<64x64xbf16>
      %c0_39 = arith.constant 0 : index
      %c0_40 = arith.constant 0 : index
      %105 = vector.load %arg13[%c0_39, %c0_40] : memref<64x32xbf16, #tpu.memory_space<vmem>>, vector<64x32xbf16>
      %cst_41 = arith.constant dense<0.000000e+00> : vector<64x32xf32>
      %106 = tpu.matmul %104, %105, %cst_41 {dimension_numbers = #tpu.dot_dimension_numbers<[1], [0], [0], [1], [0, 0, 1, 1], [], []>} : vector<64x64xbf16>, vector<64x32xbf16>, vector<64x32xf32> -> vector<64x32xf32>
      %c0_42 = arith.constant 0 : index
      %c0_43 = arith.constant 0 : index
      %107 = vector.load %arg14[%c0_42, %c0_43] : memref<1x32xf32, #tpu.memory_space<vmem>>, vector<1x32xf32>
      %108 = vector.broadcast %107 : vector<1x32xf32> to vector<64x32xf32>
      %109 = arith.addf %106, %108 : vector<64x32xf32>
      %c0_44 = arith.constant 0 : index
      %c0_45 = arith.constant 0 : index
      %c0_46 = arith.constant 0 : index
      %110 = vector.load %arg15[%c0_44, %c0_45, %c0_46] : memref<1x64x32xf32, #tpu.memory_space<vmem>>, vector<1x64x32xf32>
      %111 = vector.shape_cast %110 : vector<1x64x32xf32> to vector<64x32xf32>
      %112 = vector.shape_cast %109 : vector<64x32xf32> to vector<1x64x32xf32>
      tpu.vector_store %arg15[%c0_44, %c0_45, %c0_46], %112 {strides = array<i32>} : memref<1x64x32xf32, #tpu.memory_space<vmem>>, vector<1x64x32xf32>,
    } else {
    }
    return
  }
  func.func @transform_0(%arg0: i32, %arg1: i32, %arg2: i32) -> (i32, i32, i32) {
    %c0_i32 = arith.constant 0 : i32
    %c0_i32_0 = arith.constant 0 : i32
    return %arg0, %arg2, %c0_i32 : i32, i32, i32
  }
  func.func @transform_1(%arg0: i32, %arg1: i32, %arg2: i32) -> (i32, i32) {
    %c0_i32 = arith.constant 0 : i32
    %c0_i32_0 = arith.constant 0 : i32
    %c0_i32_1 = arith.constant 0 : i32
    return %c0_i32, %c0_i32_0 : i32, i32
  }
  func.func @transform_2(%arg0: i32, %arg1: i32, %arg2: i32) -> (i32, i32) {
    %c0_i32 = arith.constant 0 : i32
    %c0_i32_0 = arith.constant 0 : i32
    %c0_i32_1 = arith.constant 0 : i32
    return %c0_i32, %c0_i32_0 : i32, i32
  }
  func.func @transform_3(%arg0: i32, %arg1: i32, %arg2: i32) -> (i32, i32) {
    %c0_i32 = arith.constant 0 : i32
    %c0_i32_0 = arith.constant 0 : i32
    %c0_i32_1 = arith.constant 0 : i32
    return %c0_i32, %c0_i32_0 : i32, i32
  }
  func.func @transform_4(%arg0: i32, %arg1: i32, %arg2: i32) -> (i32, i32) {
    %c0_i32 = arith.constant 0 : i32
    %c0_i32_0 = arith.constant 0 : i32
    %c0_i32_1 = arith.constant 0 : i32
    return %c0_i32, %c0_i32_0 : i32, i32
  }
  func.func @transform_5(%arg0: i32, %arg1: i32, %arg2: i32) -> (i32, i32, i32) {
    %c0_i32 = arith.constant 0 : i32
    %c0_i32_0 = arith.constant 0 : i32
    %c0_i32_1 = arith.constant 0 : i32
    %c0_i32_2 = arith.constant 0 : i32
    return %c0_i32, %c0_i32_0, %c0_i32_1 : i32, i32, i32
  }
  func.func @transform_6(%arg0: i32, %arg1: i32, %arg2: i32) -> (i32, i32) {
    %c0_i32 = arith.constant 0 : i32
    %c0_i32_0 = arith.constant 0 : i32
    %c0_i32_1 = arith.constant 0 : i32
    return %c0_i32, %c0_i32_0 : i32, i32
  }
  func.func @transform_7(%arg0: i32, %arg1: i32, %arg2: i32) -> (i32, i32) {
    %c0_i32 = arith.constant 0 : i32
    %c0_i32_0 = arith.constant 0 : i32
    %c0_i32_1 = arith.constant 0 : i32
    return %c0_i32, %c0_i32_0 : i32, i32
  }
  func.func @transform_8(%arg0: i32, %arg1: i32, %arg2: i32) -> (i32, i32) {
    %c0_i32 = arith.constant 0 : i32
    %c0_i32_0 = arith.constant 0 : i32
    %c0_i32_1 = arith.constant 0 : i32
    return %c0_i32, %c0_i32_0 : i32, i32
  }
  func.func @transform_9(%arg0: i32, %arg1: i32, %arg2: i32) -> (i32, i32) {
    %c0_i32 = arith.constant 0 : i32
    %c0_i32_0 = arith.constant 0 : i32
    %c0_i32_1 = arith.constant 0 : i32
    return %c0_i32, %c0_i32_0 : i32, i32
  }
  func.func @transform_10(%arg0: i32, %arg1: i32, %arg2: i32) -> (i32, i32) {
    %c0_i32 = arith.constant 0 : i32
    %c0_i32_0 = arith.constant 0 : i32
    %c0_i32_1 = arith.constant 0 : i32
    return %c0_i32, %c0_i32_0 : i32, i32
  }
  func.func @transform_11(%arg0: i32, %arg1: i32, %arg2: i32) -> (i32, i32) {
    %c0_i32 = arith.constant 0 : i32
    %c0_i32_0 = arith.constant 0 : i32
    %c0_i32_1 = arith.constant 0 : i32
    return %c0_i32, %c0_i32_0 : i32, i32
  }
  func.func @transform_12(%arg0: i32, %arg1: i32, %arg2: i32) -> (i32, i32, i32) {
    %0 = arith.muli %arg2, %arg1 : i32
    %c0_i32 = arith.constant 0 : i32
    %c0_i32_0 = arith.constant 0 : i32
    return %arg0, %0, %c0_i32 : i32, i32, i32
  }
}

</mosaic_0001>

<bundles_post_ra>
// kernel: physics_attention_1d.1
= control target key start
LH: loop header
LB: loop body
LE: loop exit
PB: predicated region body
PF: predicated region fallthrough
CT: control target
= control target key end

     0   :  { %s5187_s21 = smov 0   ;;  %s5189_s22 = smov 0   ;;  %s6692_s0 = inlined_call_operand.vmem [shape: f32[2,64,32], index: 0, kind: input, shape index: {}]   ;;  %s6693_s1 = inlined_call_operand.vmem [shape: bf16[32,64], index: 1, kind: input, shape index: {}]   ;;  %s6694_s2 = inlined_call_operand.vmem [shape: f32[1,64], index: 2, kind: input, shape index: {}]   ;;  %s6695_s3 = inlined_call_operand.vmem [shape: bf16[32,64], index: 3, kind: input, shape index: {}]   ;;  %s6696_s4 = inlined_call_operand.vmem [shape: f32[1,64], index: 4, kind: input, shape index: {}]   ;;  %s6697_s5 = inlined_call_operand.vmem [shape: bf16[4,16,16], index: 5, kind: input, shape index: {}]   ;;  %s6698_s6 = inlined_call_operand.vmem [shape: f32[4,16], index: 6, kind: input, shape index: {}]   ;;  %s6699_s7 = inlined_call_operand.vmem [shape: bf16[16,16], index: 7, kind: input, shape index: {}]   ;;  %s6700_s8 = inlined_call_operand.vmem [shape: bf16[16,16], index: 8, kind: input, shape index: {}]   ;;  %s6701_s9 = inlined_call_operand.vmem [shape: bf16[16,16], index: 9, kind: input, shape index: {}]   ;;  %s6702_s10 = inlined_call_operand.vmem [shape: bf16[64,32], index: 10, kind: input, shape index: {}]   ;;  %s6703_s11 = inlined_call_operand.vmem [shape: f32[1,32], index: 11, kind: input, shape index: {}]   ;;  %s6704_s12 = inlined_call_operand.vmem [shape: f32[2,64,32], index: 12, kind: output, shape index: {}]  }
   0x1   :  { %s5191_s23 = smov 0   ;;  %s5193_s24 = smov 0  }
   0x2   :  { %s5195_s25 = smov 0  }
   0x3 LB: > { %s37_s26 = sadd.s32 1, %s5095_s23  ;;  %s41_s27 = sadd.s32 1, %s5099_s24  ;;  %s5103_s25 = sphi %s5195_s25, %s22_s25   ;;  %s5099_s24 = sphi %s5193_s24, %s6723_s24   ;;  %s5095_s23 = sphi %s5191_s23, %s6722_s23   ;;  %s5091_s22 = sphi %s5189_s22, %s6721_s22   ;;  %s5087_s21 = sphi %s5187_s21, %s6720_s21  }
   0x4   : > { %p39_p0 = scmp.ge.s32.totalorder %s37_s26, 2  ;;  %p4155_p1 = scmp.ge.s32.totalorder %s5103_s25, 1 }
   0x5   : > { %p392_p2 = scmp.lt.s32.totalorder %s5103_s25, 5 }
   0x6   : > { %s6725_s26 = smov (%p39_p0, %s37_s26), 0  ;;  %s6727_s27 = smov (!%p39_p0, %s41_s27), %s5099_s24 }
   0x7   : > { %p393_p3 = pnand %p4155_p1, %p392_p2  ;;  %p43_p4 = scmp.ge.s32.totalorder %s6727_s27, 2 }
   0x9   : > { %s6729_s27 = smov (%p43_p4, %s6727_s27), 0  ;;  %396 = sbr.rel (%p393_p3) target bundleno = 3485 (0xd9d), region = 68 }
   0xe   : > { %v4755_v0 = vld [vmem:[%s6695_s3 + $0x8] sm:$0xff]   ;;  %p444_p5 = scmp.lt.s32.totalorder %s5091_s22, 1  ;;  %v4756_v1 = vld [vmem:[%s6695_s3] sm:$0xff]   ;;  %vm501_vm0 = vcmask 261120   ;;  %p4167_p6 = scmp.ne.s32.totalorder %s5087_s21, 0 }
   0xf   : > { %4414 = vmatprep.subr.bf16.mxu0 %v4755_v0  ;;  %4688 = vmatprep.subr.bf16.mxu1 %v4755_v0  ;;  %v5240_v14 = vld [vmem:[%s6698_s6] sm:$0xf]  ;;  %s5106_s29 = smov (!%p4167_p6), 96   ;;  %s5113_s28 = smov (!%p4167_p6), 48  }
  0x10   : > { %s6731_s22 = smov (!%p444_p5, %s5091_s22), 1  ;;  %4415 = vmatpush3.bf16.msra.mxu0 %v4755_v0  ;;  %4690 = vmatpush3.bf16.msra.mxu1 %v4755_v0  ;;  %6713 = vst [vmem:[#allocation5_spill] sm:$0xff] %v5240_v14  ;;  %v4160_v17 = vld [vmem:[%s6696_s4] ss:$0 sm:$0xff] }
  0x11   : > { %4416 = vmatprep.subr.bf16.mxu0 %v4756_v1  ;;  %4689 = vmatprep.subr.bf16.mxu1 %v4756_v1  ;;  %s4282_s14 = sshll.u32 %s6731_s22, 6  ;;  %s5112_s22 = smov (!%p4167_p6), 32  }
  0x12   : > { %s451_s17 = scalar_lea.vmem %s6692_s0, %s4282_s14  ;;  %s5231_s20 = scalar_lea.vmem %s6704_s12, %s4282_s14 }
  0x13   : > { %v466_v2 = vld [vmem:[%s451_s17] sm:$0xff]  ;;  %v467_v3 = vld [vmem:[%s451_s17 + $0x8] sm:$0xff]  ;;  %v468_v7 = vld [vmem:[%s451_s17 + $0x10] sm:$0xff]  ;;  %s5107_s14 = smov (!%p4167_p6), 80  }
  0x14   : > { %v470_v4 = vld [vmem:[%s451_s17 + $0x20] sm:$0xff]  ;;  %4417 = vmatpush3.bf16.msra.mxu0 %v4756_v1  ;;  %4691 = vmatpush3.bf16.msra.mxu1 %v4756_v1  ;;  %v474_v5 = vpack.c.bf16 %v467_v3, %v466_v2  ;;  %v471_v6 = vld [vmem:[%s451_s17 + $0x28] sm:$0xff]  ;;  %v469_v8 = vld [vmem:[%s451_s17 + $0x18] sm:$0xff] }
  0x15   : > { %v476_v9 = vpack.c.bf16 %v471_v6, %v470_v4  ;;  %v475_v10 = vpack.c.bf16 %v469_v8, %v468_v7  ;;  %v472_v11 = vld [vmem:[%s451_s17 + $0x30] sm:$0xff]  ;;  %v473_v12 = vld [vmem:[%s451_s17 + $0x38] sm:$0xff]  ;;  %s5105_s17 = smov (!%p4167_p6), 112  }
  0x16   : > { %4418 = vmatprep.mubr.msk.bf16.mxu0 %vm501_vm0, %v474_v5  ;;  %v477_v13 = vpack.c.bf16 %v473_v12, %v472_v11 }
  0x17   : > { %4422 = vmatprep.mubr.msk.bf16.mxu1 %vm501_vm0, %v476_v9  ;;  %4419 = vmatmul.mubr.msk.bf16.vlgmr.msra.gmra.mxu0 %vm501_vm0, %v475_v10 }
  0x18   : > { %4423 = vmatmul.mubr.msk.bf16.vlgmr.msra.gmra.mxu1 %vm501_vm0, %v477_v13 }
  0xd7   : > { %v4420_v15 = vpop.f32.mrf.mxu0 }
  0xd8   : > { %v4424_v16 = vpop.f32.mrf.mxu1  ;;  %v557_v21 = vadd.f32 %v4420_v15, %v4160_v17 }
  0xd9   : > { %v548_v18 = vpop.f32.mrf.mxu0  ;;  %v573_v24 = vadd.f32 %v4424_v16, %v4160_v17 }
  0xda   : > { %v564_v19 = vpop.f32.mrf.mxu1  ;;  %v549_v27 = vadd.f32 %v4160_v17, %v548_v18 }
  0xdb   : > { %v4421_v20 = vpop.f32.mrf.mxu0  ;;  %v565_v31 = vadd.f32 %v4160_v17, %v564_v19 }
  0xdc   : > { %v560_v22 = vadd.f32 %v4421_v20, %v4160_v17  ;;  %v4425_v23 = vpop.f32.mrf.mxu1 }
  0xdd   : > { %v576_v25 = vadd.f32 %v4425_v23, %v4160_v17  ;;  %v551_v26 = vpop.f32.mrf.mxu0  ;;  %587 = sbr.rel (%p4167_p6) target bundleno = 1278 (0x4fe), region = 72 }
  0xde   : > { %v5245_v28 = vpack.c.bf16 %v560_v22, %v557_v21  ;;  %v552_v29 = vadd.f32 %v4160_v17, %v551_v26  ;;  %v567_v30 = vpop.f32.mrf.mxu1 }
  0xdf   : > { %v5247_v32 = vpack.c.bf16 %v576_v25, %v573_v24  ;;  %v568_v33 = vadd.f32 %v4160_v17, %v567_v30 }
  0xe0   : > { %6714 = vst [vmem:[#allocation6_spill] sm:$0xff] %v5245_v28  ;;  %v5249_v34 = vpack.c.bf16 %v552_v29, %v549_v27 }
  0xe1   : > { %6715 = vst [vmem:[#allocation7_spill] sm:$0xff] %v5247_v32  ;;  %v5251_v35 = vpack.c.bf16 %v568_v33, %v565_v31 }
  0xe2   : > { %v4757_v36 = vld [vmem:[%s6697_s5] sm:$0xff]   ;;  %vm701_vm1 = vcmask 130048   ;;  %4430 = vmatprep.mubr.msk.bf16.mxu0 %vm501_vm0, %v474_v5  ;;  %v4758_v37 = vld [vmem:[%s6693_s1 + $0x8] sm:$0xff]   ;;  %974 = vrot.lane.b32.xlu0 %v5249_v34, %s5105_s17  ;;  %v4761_v40 = vld [vmem:[%s6697_s5 + $0x10] sm:$0xff]   ;;  %v691_v54 = vlaneseq  ;;  %vm595_vm2 = vcmask 516096   ;;  %vm592_vm3 = vcmask 523264  }
  0xe3   : > { %4440 = vmatprep.mubr.msk.bf16.mxu1 %vm701_vm1, %v5249_v34  ;;  %4438 = vmatprep.subr.bf16.mxu1 %v4757_v36  ;;  %v4759_v38 = vld [vmem:[%s6693_s1] sm:$0xff]   ;;  %v4760_v39 = vld [vmem:[%s6697_s5 + $0x8] sm:$0xff]   ;;  %v4762_v42 = vld [vmem:[%s6697_s5 + $0x18] sm:$0xff]   ;;  %vm5109_vm4 = vmmov 0   ;;  %vm961_vm5 = vcmask 122880   ;;  %vm1289_vm6 = vcmask 254080  }
  0xe4   : > { %4439 = vmatpush3.bf16.msra.mxu1 %v4757_v36  ;;  %4426 = vmatprep.subr.bf16.mxu0 %v4758_v37  ;;  %v5320_v55 = vshrl.u32 %v691_v54, 7  ;;  %v4168_v12 = vld [vmem:[%s6694_s2] ss:$0 sm:$0xff]  ;;  %vm1245_vm7 = vcmask 261248   ;;  %vm1565_vm8 = vcmask 392448   ;;  %vm1609_vm9 = vcmask 385280  }
  0xe5   : > { %4427 = vmatpush3.bf16.msra.mxu0 %v4758_v37  ;;  %978 = vrot.lane.b32.xlu1 %v5251_v35, %s5105_s17  ;;  %vm1885_vm10 = vcmask 523648   ;;  %vm1929_vm11 = vcmask 516480  }
  0xe6   : > { %4428 = vmatprep.subr.bf16.mxu0 %v4759_v38  ;;  %976 = vrot.lane.b32.xlu0 %v5245_v28, %s5105_s17  ;;  %v693_v56 = vsub.s32 0, %v5320_v55 }
  0xe7   : > { %4441 = vmatmul.mubr.msk.bf16.vlgmr.msra.gmra.mxu1 %vm701_vm1, %v5245_v28 }
  0xe8   : > { %4444 = vmatprep.mubr.msk.bf16.mxu1 %vm701_vm1, %v5251_v35  ;;  %v694_v57 = vrot.slane %v5240_v14, %v693_v56 }
  0xe9   : > { %4429 = vmatpush3.bf16.msra.mxu0 %v4759_v38  ;;  %980 = vrot.lane.b32.xlu1 %v5247_v32, %s5105_s17 }
  0xea   : > { %4460 = vmatprep.subr.bf16.mxu0 %v4760_v39  ;;  %1298 = vrot.lane.b32.xlu0 %v5249_v34, %s5106_s29 }
  0xec   : > { %4431 = vmatmul.mubr.msk.bf16.vlgmr.msra.gmra.mxu0 %vm501_vm0, %v475_v10 }
  0xed   : > { %1300 = vrot.lane.b32.xlu1 %v5245_v28, %s5106_s29  ;;  %4434 = vmatprep.mubr.msk.bf16.mxu0 %vm501_vm0, %v476_v9 }
  0xee   : > { %4461 = vmatpush3.bf16.msra.mxu0 %v4760_v39  ;;  %1302 = vrot.lane.b32.xlu0 %v5251_v35, %s5106_s29 }
  0xef   : > { %4445 = vmatmul.mubr.msk.bf16.gmra.mxu1 %vm701_vm1, %v5247_v32  ;;  %4482 = vmatprep.subr.bf16.mxu0 %v4761_v40 }
  0xf1   : > { %1304 = vrot.lane.b32.xlu1 %v5247_v32, %s5106_s29 }
  0xf2   : > { %1618 = vrot.lane.b32.xlu0 %v5249_v34, %s5107_s14 }
  0xf4   : > { %4435 = vmatmul.mubr.msk.bf16.gmra.mxu0 %vm501_vm0, %v477_v13 }
  0xf5   : > { %1620 = vrot.lane.b32.xlu1 %v5245_v28, %s5107_s14 }
  0xf6   : > { %1622 = vrot.lane.b32.xlu0 %v5251_v35, %s5107_s14 }
  0xf9   : > { %1624 = vrot.lane.b32.xlu1 %v5247_v32, %s5107_s14 }
 0x154   : > { %v975_v41 = vpop.permute.xlu0 %974 }
 0x155   : > { %4462 = vmatprep.mubr.msk.bf16.mxu0 %vm701_vm1, %v975_v41 }
 0x157   : > { %v979_v44 = vpop.permute.xlu1 %978 }
 0x158   : > { %v977_v43 = vpop.permute.xlu0 %976 }
 0x159   : > { %4463 = vmatmul.mubr.msk.bf16.vlgmr.msra.gmra.mxu0 %vm701_vm1, %v977_v43 }
 0x15a   : > { %4483 = vmatpush3.bf16.msra.mxu0 %v4761_v40  ;;  %4466 = vmatprep.mubr.msk.bf16.mxu0 %vm701_vm1, %v979_v44  ;;  %v968_v44 = vsub.s32 1, %v5320_v55 }
 0x15b   : > { %4504 = vmatprep.subr.bf16.mxu0 %v4762_v42  ;;  %v981_v45 = vpop.permute.xlu1 %980 }
 0x15c   : > { %v1299_v46 = vpop.permute.xlu0 %1298 }
 0x15f   : > { %v1301_v47 = vpop.permute.xlu1 %1300 }
 0x160   : > { %v1303_v48 = vpop.permute.xlu0 %1302 }
 0x161   : > { %4467 = vmatmul.mubr.msk.bf16.gmra.mxu0 %vm701_vm1, %v981_v45 }
 0x162   : > { %4484 = vmatprep.mubr.msk.bf16.mxu0 %vm701_vm1, %v1299_v46 }
 0x163   : > { %v1305_v49 = vpop.permute.xlu1 %1304 }
 0x164   : > { %v1619_v50 = vpop.permute.xlu0 %1618 }
 0x167   : > { %v1621_v51 = vpop.permute.xlu1 %1620 }
 0x168   : > { %v1623_v52 = vpop.permute.xlu0 %1622 }
 0x169   : > { %4485 = vmatmul.mubr.msk.bf16.vlgmr.msra.gmra.mxu0 %vm701_vm1, %v1301_v47  ;;  %v969_v47 = vrot.slane %v5240_v14, %v968_v44 }
 0x16a   : > { %4505 = vmatpush3.bf16.msra.mxu0 %v4762_v42  ;;  %4488 = vmatprep.mubr.msk.bf16.mxu0 %vm701_vm1, %v1303_v48 }
 0x16b   : > { %v1625_v53 = vpop.permute.xlu1 %1624 }
 0x171   : > { %4489 = vmatmul.mubr.msk.bf16.gmra.mxu0 %vm701_vm1, %v1305_v49 }
 0x172   : > { %4506 = vmatprep.mubr.msk.bf16.mxu0 %vm701_vm1, %v1619_v50 }
 0x179   : > { %4507 = vmatmul.mubr.msk.bf16.vlgmr.msra.gmra.mxu0 %vm701_vm1, %v1621_v51 }
 0x17a   : > { %4510 = vmatprep.mubr.msk.bf16.mxu0 %vm701_vm1, %v1623_v52 }
 0x181   : > { %4511 = vmatmul.mubr.msk.bf16.gmra.mxu0 %vm701_vm1, %v1625_v53 }
 0x1a7   : > { %v4442_v58 = vpop.f32.mrf.mxu1 }
 0x1a8   : > { %v5324_v59 = vadd.f32 %v4442_v58, %v694_v57 }
 0x1a9   : > { %v748_v60 = vpop.f32.mrf.mxu1 }
 0x1aa   : > { %v5326_v61 = vadd.f32 %v748_v60, %v694_v57  ;;  %v785_v62 = vsel %vm701_vm1, %v5324_v59, -inf }
 0x1ab   : > { %786 = vmax.xlane.f32.xlu1 %v785_v62  ;;  %v4443_v63 = vpop.f32.mrf.mxu1  ;;  %v1296_v62 = vsub.s32 2, %v5320_v55 }
 0x1ac   : > { %v5330_v0 = vadd.f32 %v4443_v63, %v694_v57  ;;  %v4432_v1 = vpop.f32.mrf.mxu0  ;;  %v779_v5 = vsel %vm701_vm1, %v5326_v61, -inf }
 0x1ad   : > { %v751_v2 = vpop.f32.mrf.mxu1  ;;  %v663_v18 = vadd.f32 %v4432_v1, %v4168_v12 }
 0x1ae   : > { %v5332_v3 = vadd.f32 %v751_v2, %v694_v57  ;;  %v788_v4 = vsel %vm701_vm1, %v5330_v0, -inf  ;;  %v654_v7 = vpop.f32.mrf.mxu0 }
 0x1af   : > { %789 = vmax.xlane.f32.xlu0 %v788_v4  ;;  %v4446_v6 = vpop.f32.mrf.mxu1  ;;  %780 = vmax.xlane.f32.xlu1 %v779_v5  ;;  %v655_v15 = vadd.f32 %v4168_v12, %v654_v7 }
 0x1b0   : > { %v5338_v8 = vadd.f32 %v4446_v6, %v694_v57  ;;  %v782_v9 = vsel %vm701_vm1, %v5332_v3, -inf  ;;  %v4433_v10 = vpop.f32.mrf.mxu0  ;;  %v1297_v6 = vrot.slane %v5240_v14, %v1296_v62 }
 0x1b1   : > { %v666_v19 = vadd.f32 %v4433_v10, %v4168_v12  ;;  %v764_v21 = vpop.f32.mrf.mxu1 }
 0x1b2   : > { %v797_v11 = vsel %vm701_vm1, %v5338_v8, -inf  ;;  %v657_v13 = vpop.f32.mrf.mxu0  ;;  %v5367_v27 = vadd.f32 %v764_v21, %v694_v57 }
 0x1b3   : > { %783 = vmax.xlane.f32.xlu0 %v782_v9  ;;  %v658_v16 = vadd.f32 %v4168_v12, %v657_v13  ;;  %v5355_v20 = vpack.c.bf16 %v666_v19, %v663_v18  ;;  %v4447_v22 = vpop.f32.mrf.mxu1 }
 0x1b4   : > { %v5363_v23 = vadd.f32 %v4447_v22, %v694_v57  ;;  %v4436_v24 = vpop.f32.mrf.mxu0  ;;  %v791_v33 = vsel %vm701_vm1, %v5367_v27, -inf }
 0x1b5   : > { %v5347_v17 = vpack.c.bf16 %v658_v16, %v655_v15  ;;  %v767_v29 = vpop.f32.mrf.mxu1  ;;  %v679_v41 = vadd.f32 %v4436_v24, %v4168_v12 }
 0x1b6   : > { %v800_v25 = vsel %vm701_vm1, %v5363_v23, -inf  ;;  %v670_v26 = vpop.f32.mrf.mxu0  ;;  %v5369_v31 = vadd.f32 %v767_v29, %v694_v57 }
 0x1b7   : > { %798 = vmax.xlane.f32.xlu0 %v797_v11  ;;  %v671_v37 = vadd.f32 %v4168_v12, %v670_v26 }
 0x1b8   : > { %v4437_v30 = vpop.f32.mrf.mxu0  ;;  %v794_v39 = vsel %vm701_vm1, %v5369_v31, -inf }
 0x1b9   : > { %v682_v42 = vadd.f32 %v4437_v30, %v4168_v12 }
 0x1ba   : > { %v673_v36 = vpop.f32.mrf.mxu0 }
 0x1bb   : > { %v674_v38 = vadd.f32 %v4168_v12, %v673_v36  ;;  %v5383_v43 = vpack.c.bf16 %v682_v42, %v679_v41  ;;  %v1616_v36 = vsub.s32 3, %v5320_v55 }
 0x1bd   : > { %v5375_v40 = vpack.c.bf16 %v674_v38, %v671_v37 }
 0x1c0   : > { %1161 = vrot.lane.b32.xlu1 %v5347_v17, %s5105_s17 }
 0x1c4   : > { %1481 = vrot.lane.b32.xlu1 %v5347_v17, %s5106_s29 }
 0x1c8   : > { %1801 = vrot.lane.b32.xlu1 %v5347_v17, %s5107_s14 }
 0x1cd   : > { %1163 = vrot.lane.b32.xlu0 %v5355_v20, %s5105_s17 }
 0x1d1   : > { %1483 = vrot.lane.b32.xlu0 %v5355_v20, %s5106_s29 }
 0x1d5   : > { %1803 = vrot.lane.b32.xlu0 %v5355_v20, %s5107_s14 }
 0x1ec   : > { %801 = vmax.xlane.f32.xlu1 %v800_v25 }
 0x1f4   : > { %792 = vmax.xlane.f32.xlu0 %v791_v33 }
 0x1f8   : > { %795 = vmax.xlane.f32.xlu0 %v794_v39 }
 0x1fd   : > { %1165 = vrot.lane.b32.xlu1 %v5375_v40, %s5105_s17 }
 0x201   : > { %1485 = vrot.lane.b32.xlu1 %v5375_v40, %s5106_s29 }
 0x205   : > { %1805 = vrot.lane.b32.xlu1 %v5375_v40, %s5107_s14 }
 0x20e   : > { %1167 = vrot.lane.b32.xlu0 %v5383_v43, %s5105_s17  ;;  %s5111_s17 = smov 16  }
 0x212   : > { %1487 = vrot.lane.b32.xlu0 %v5383_v43, %s5106_s29 }
 0x219   : > { %v4464_v45 = vpop.f32.mrf.mxu0 }
 0x21a   : > { %v5391_v50 = vadd.f32 %v4464_v45, %v969_v47  ;;  %v1617_v45 = vrot.slane %v5240_v14, %v1616_v36 }
 0x21b   : > { %v1034_v46 = vpop.f32.mrf.mxu0 }
 0x21c   : > { %v5393_v53 = vadd.f32 %v1034_v46, %v969_v47  ;;  %v1071_v54 = vsel %vm701_vm1, %v5391_v50, -inf }
 0x21d   : > { %v4465_v48 = vpop.f32.mrf.mxu0 }
 0x21e   : > { %v1065_v60 = vsel %vm701_vm1, %v5393_v53, -inf  ;;  %v5402_v1 = vadd.f32 %v4465_v48, %v969_v47 }
 0x21f   : > { %v1037_v49 = vpop.f32.mrf.mxu0 }
 0x220   : > { %v5409_v9 = vadd.f32 %v1037_v49, %v969_v47  ;;  %v1074_v10 = vsel %vm701_vm1, %v5402_v1, -inf }
 0x221   : > { %v4468_v51 = vpop.f32.mrf.mxu0 }
 0x222   : > { %v5397_v58 = vadd.f32 %v4468_v51, %v969_v47  ;;  %v1068_v18 = vsel %vm701_vm1, %v5409_v9, -inf }
 0x223   : > { %v1050_v52 = vpop.f32.mrf.mxu0 }
 0x224   : > { %v5404_v4 = vadd.f32 %v1050_v52, %v969_v47  ;;  %v1083_v5 = vsel %vm701_vm1, %v5397_v58, -inf }
 0x225   : > { %v4469_v56 = vpop.f32.mrf.mxu0 }
 0x226   : > { %v1077_v13 = vsel %vm701_vm1, %v5404_v4, -inf  ;;  %v5417_v16 = vadd.f32 %v4469_v56, %v969_v47 }
 0x227   : > { %v1053_v57 = vpop.f32.mrf.mxu0 }
 0x228   : > { %v5425_v25 = vadd.f32 %v1053_v57, %v969_v47  ;;  %v1086_v26 = vsel %vm701_vm1, %v5417_v16, -inf }
 0x229   : > { %1072 = vmax.xlane.f32.xlu1 %v1071_v54  ;;  %v4486_v63 = vpop.f32.mrf.mxu0 }
 0x22a   : > { %v5413_v12 = vadd.f32 %v4486_v63, %v1297_v6  ;;  %v1080_v39 = vsel %vm701_vm1, %v5425_v25, -inf }
 0x22b   : > { %v1358_v2 = vpop.f32.mrf.mxu0 }
 0x22c   : > { %v5421_v21 = vadd.f32 %v1358_v2, %v1297_v6  ;;  %v1395_v22 = vsel %vm701_vm1, %v5413_v12, -inf }
 0x22d   : > { %1066 = vmax.xlane.f32.xlu1 %v1065_v60  ;;  %v4487_v7 = vpop.f32.mrf.mxu0 }
 0x22e   : > { %v1389_v33 = vsel %vm701_vm1, %v5421_v21, -inf  ;;  %v5434_v38 = vadd.f32 %v4487_v7, %v1297_v6 }
 0x22f   : > { %v1361_v11 = vpop.f32.mrf.mxu0 }
 0x230   : > { %v5443_v46 = vadd.f32 %v1361_v11, %v1297_v6  ;;  %v1398_v47 = vsel %vm701_vm1, %v5434_v38, -inf }
 0x231   : > { %1075 = vmax.xlane.f32.xlu0 %v1074_v10  ;;  %1084 = vmax.xlane.f32.xlu1 %v1083_v5  ;;  %v4490_v15 = vpop.f32.mrf.mxu0 }
 0x232   : > { %v5429_v30 = vadd.f32 %v4490_v15, %v1297_v6  ;;  %v1392_v56 = vsel %vm701_vm1, %v5443_v46, -inf }
 0x233   : > { %v1374_v19 = vpop.f32.mrf.mxu0 }
 0x234   : > { %v5438_v42 = vadd.f32 %v1374_v19, %v1297_v6  ;;  %v1407_v44 = vsel %vm701_vm1, %v5429_v30, -inf }
 0x235   : > { %1069 = vmax.xlane.f32.xlu0 %v1068_v18  ;;  %1078 = vmax.xlane.f32.xlu1 %v1077_v13  ;;  %v4491_v24 = vpop.f32.mrf.mxu0 }
 0x236   : > { %v1401_v51 = vsel %vm701_vm1, %v5438_v42, -inf  ;;  %v5451_v54 = vadd.f32 %v4491_v24, %v1297_v6 }
 0x237   : > { %v1377_v29 = vpop.f32.mrf.mxu0 }
 0x238   : > { %v790_v52 = vpop.xlane.xlu0 %789  ;;  %v5460_v5 = vadd.f32 %v1377_v29, %v1297_v6  ;;  %v1410_v7 = vsel %vm701_vm1, %v5451_v54, -inf }
 0x239   : > { %1087 = vmax.xlane.f32.xlu0 %v1086_v26  ;;  %1396 = vmax.xlane.f32.xlu1 %v1395_v22  ;;  %v4508_v37 = vpop.f32.mrf.mxu0  ;;  %v806_v2 = vsub.f32 %v5330_v0, %v790_v52 }
 0x23a   : > { %v5447_v49 = vadd.f32 %v4508_v37, %v1617_v45  ;;  %v1404_v0 = vsel %vm701_vm1, %v5460_v5, -inf }
 0x23b   : > { %v1678_v41 = vpop.f32.mrf.mxu0  ;;  %v817_v18 = vmul.f32 1.442695, %v806_v2 }
 0x23c   : > { %v5455_v60 = vadd.f32 %v1678_v41, %v1617_v45  ;;  %v1715_v62 = vsel %vm701_vm1, %v5447_v49, -inf  ;;  %v784_v10 = vpop.xlane.xlu0 %783 }
 0x23d   : > { %1081 = vmax.xlane.f32.xlu0 %v1080_v39  ;;  %1390 = vmax.xlane.f32.xlu1 %v1389_v33  ;;  %v4509_v48 = vpop.f32.mrf.mxu0  ;;  %v804_v19 = vsub.f32 %v5332_v3, %v784_v10  ;;  %4763 = vpow2.f32 %v817_v18 }
 0x23e   : > { %v1709_v13 = vsel %vm701_vm1, %v5455_v60, -inf  ;;  %v5469_v22 = vadd.f32 %v4509_v48, %v1617_v45  ;;  %v787_v48 = vpop.xlane.xlu1 %786 }
 0x23f   : > { %v1681_v57 = vpop.f32.mrf.mxu0  ;;  %v813_v26 = vmul.f32 1.442695, %v804_v19 }
 0x240   : > { %v5477_v29 = vadd.f32 %v1681_v57, %v1617_v45  ;;  %v1718_v33 = vsel %vm701_vm1, %v5469_v22, -inf  ;;  %v799_v2 = vpop.xlane.xlu0 %798 }
 0x241   : > { %1399 = vmax.xlane.f32.xlu0 %v1398_v47  ;;  %1408 = vmax.xlane.f32.xlu1 %v1407_v44  ;;  %v4512_v63 = vpop.f32.mrf.mxu0  ;;  %4765 = vpow2.f32 %v813_v26 }
 0x242   : > { %v5464_v11 = vadd.f32 %v4512_v63, %v1617_v45  ;;  %v1712_v39 = vsel %vm701_vm1, %v5477_v29, -inf }
 0x243   : > { %v1694_v15 = vpop.f32.mrf.mxu0 }
 0x244   : > { %v5473_v6 = vadd.f32 %v1694_v15, %v1617_v45  ;;  %v1727_v24 = vsel %vm701_vm1, %v5464_v11, -inf  ;;  %v5507_v10 = vpop.permute.xlu0 %1163 }
 0x245   : > { %1393 = vmax.xlane.f32.xlu0 %v1392_v56  ;;  %1402 = vmax.xlane.f32.xlu1 %v1401_v51  ;;  %v4513_v3 = vpop.f32.mrf.mxu0  ;;  %v781_v56 = vpop.xlane.xlu1 %780 }
 0x246   : > { %v5481_v36 = vadd.f32 %v4513_v3, %v1617_v45  ;;  %v1721_v37 = vsel %vm701_vm1, %v5473_v6, -inf }
 0x247   : > { %v1697_v41 = vpop.f32.mrf.mxu0 }
 0x248   : > { %v1730_v44 = vsel %vm701_vm1, %v5481_v36, -inf  ;;  %v5489_v47 = vadd.f32 %v1697_v41, %v1617_v45  ;;  %v5512_v18 = vpop.permute.xlu0 %1483 }
 0x249   : > { %1411 = vmax.xlane.f32.xlu0 %v1410_v7  ;;  %1716 = vmax.xlane.f32.xlu1 %v1715_v62  ;;  %v5501_v45 = vpop.permute.xlu1 %1161 }
 0x24a   : > { %v1724_v51 = vsel %vm701_vm1, %v5489_v47, -inf  ;;  %v5493_v52 = vpop.eup %4763 }
 0x24b   : > { %v836_v57 = vsel %vm701_vm1, %v5493_v52, 0.0 }
 0x24d   : > { %1405 = vmax.xlane.f32.xlu0 %v1404_v0  ;;  %1710 = vmax.xlane.f32.xlu1 %v1709_v13  ;;  %v5505_v7 = vpop.permute.xlu1 %1481  ;;  %v805_v13 = vsub.f32 %v5324_v59, %v787_v48  ;;  %v803_v0 = vsub.f32 %v5326_v61, %v781_v56 }
 0x24e   : > { %v5497_v62 = vpop.eup %4765 }
 0x24f   : > { %v830_v63 = vsel %vm701_vm1, %v5497_v62, 0.0  ;;  %v815_v19 = vmul.f32 1.442695, %v805_v13  ;;  %v811_v3 = vmul.f32 1.442695, %v803_v0 }
 0x251   : > { %1719 = vmax.xlane.f32.xlu0 %v1718_v33  ;;  %1728 = vmax.xlane.f32.xlu1 %v1727_v24  ;;  %v5510_v15 = vpop.permute.xlu1 %1801  ;;  %4767 = vpow2.f32 %v815_v19 }
 0x255   : > { %1713 = vmax.xlane.f32.xlu0 %v1712_v39  ;;  %1722 = vmax.xlane.f32.xlu1 %v1721_v37  ;;  %v809_v37 = vsub.f32 %v5338_v8, %v799_v2  ;;  %v5517_v39 = vpop.permute.xlu0 %1803 }
 0x257   : > { %v823_v59 = vmul.f32 1.442695, %v809_v37  ;;  %v6705_v37 = vmov 0.0  }
 0x258   : > { %4448 = vmatprep.subr.bf16.mxu1 %v6705_v37 }
 0x259   : > { %1731 = vmax.xlane.f32.xlu0 %v1730_v44 }
 0x25d   : > { %1725 = vmax.xlane.f32.xlu0 %v1724_v51 }
 0x261   : > { %837 = vadd.xlane.f32.xlu0 %v836_v57 }
 0x265   : > { %831 = vadd.xlane.f32.xlu0 %v830_v63 }
 0x266   : > { %1807 = vrot.lane.b32.xlu1 %v5383_v43, %s5107_s14 }
 0x275   : > { %v802_v24 = vpop.xlane.xlu1 %801 }
 0x276   : > { %v810_v26 = vsub.f32 %v5363_v23, %v802_v24  ;;  %v5521_v23 = vpop.eup %4767 }
 0x277   : > { %v833_v63 = vsel %vm701_vm1, %v5521_v23, 0.0 }
 0x278   : > { %v825_v33 = vmul.f32 1.442695, %v810_v26 }
 0x27a   : > { %4769 = vpow2.f32 %v825_v33  ;;  %v5545_v33 = vpop.permute.xlu1 %1165 }
 0x27b   : > { %4771 = vpow2.f32 %v811_v3 }
 0x27c   : > { %4773 = vpow2.f32 %v823_v59 }
 0x27d   : > { %v793_v41 = vpop.xlane.xlu0 %792 }
 0x27e   : > { %v807_v44 = vsub.f32 %v5367_v27, %v793_v41  ;;  %v5547_v3 = vpop.permute.xlu1 %1485 }
 0x280   : > { %v819_v48 = vmul.f32 1.442695, %v807_v44 }
 0x281   : > { %v796_v51 = vpop.xlane.xlu0 %795 }
 0x282   : > { %v808_v61 = vsub.f32 %v5369_v31, %v796_v51  ;;  %4775 = vpow2.f32 %v819_v48  ;;  %v5550_v59 = vpop.permute.xlu1 %1805 }
 0x284   : > { %v821_v56 = vmul.f32 1.442695, %v808_v61 }
 0x285   : > { %v5552_v41 = vpop.permute.xlu0 %1167 }
 0x286   : > { %4777 = vpow2.f32 %v821_v56 }
 0x287   : > { %v5523_v57 = vpop.eup %4769 }
 0x288   : > { %v848_v8 = vsel %vm701_vm1, %v5523_v57, 0.0  ;;  %v5529_v27 = vpop.eup %4771 }
 0x289   : > { %849 = vadd.xlane.f32.xlu0 %v848_v8  ;;  %v827_v31 = vsel %vm701_vm1, %v5529_v27, 0.0  ;;  %v5533_v2 = vpop.eup %4773  ;;  %v5555_v61 = vpop.permute.xlu0 %1487 }
 0x28a   : > { %834 = vadd.xlane.f32.xlu1 %v833_v63  ;;  %v845_v13 = vsel %vm701_vm1, %v5533_v2, 0.0 }
 0x28e   : > { %828 = vadd.xlane.f32.xlu1 %v827_v31 }
 0x28f   : > { %v5537_v19 = vpop.eup %4775 }
 0x290   : > { %v839_v26 = vsel %vm701_vm1, %v5537_v19, 0.0 }
 0x292   : > { %846 = vadd.xlane.f32.xlu1 %v845_v13 }
 0x293   : > { %v5539_v0 = vpop.eup %4777 }
 0x294   : > { %v842_v24 = vsel %vm701_vm1, %v5539_v0, 0.0 }
 0x295   : > { %843 = vadd.xlane.f32.xlu0 %v842_v24 }
 0x296   : > { %840 = vadd.xlane.f32.xlu1 %v839_v26 }
 0x2b2   : > { %v1073_v44 = vpop.xlane.xlu1 %1072 }
 0x2b3   : > { %v1091_v48 = vsub.f32 %v5391_v50, %v1073_v44  ;;  %v6716_v44 = vmov 0.0  }
 0x2b4   : > { %596 = vst.msk [vmem:[#allocation3] sm:$0x1] %vm595_vm2, %v6716_v44  ;;  %4456 = vmatprep.mubr.msk.bf16.mxu1 %vm5109_vm4, %v6716_v44 }
 0x2b5   : > { %v1101_v51 = vmul.f32 1.442695, %v1091_v48  ;;  %593 = vst.msk [vmem:[#allocation2] sm:$0xff] %vm592_vm3, %v6716_v44  ;;  %594 = vst.msk [vmem:[#allocation2 + $0x8] sm:$0xff] %vm592_vm3, %v6716_v44 }
 0x2b6   : > { %v1067_v56 = vpop.xlane.xlu1 %1066 }
 0x2b7   : > { %4779 = vpow2.f32 %v1101_v51  ;;  %v1089_v8 = vsub.f32 %v5393_v53, %v1067_v56 }
 0x2b9   : > { %v1097_v63 = vmul.f32 1.442695, %v1089_v8 }
 0x2ba   : > { %v1076_v31 = vpop.xlane.xlu0 %1075  ;;  %v1085_v13 = vpop.xlane.xlu1 %1084 }
 0x2bb   : > { %4781 = vpow2.f32 %v1097_v63  ;;  %v1092_v24 = vsub.f32 %v5402_v1, %v1076_v31  ;;  %v1095_v26 = vsub.f32 %v5397_v58, %v1085_v13 }
 0x2bd   : > { %v1103_v37 = vmul.f32 1.442695, %v1092_v24  ;;  %v1109_v14 = vmul.f32 1.442695, %v1095_v26 }
 0x2be   : > { %v1070_v28 = vpop.xlane.xlu0 %1069  ;;  %v1079_v50 = vpop.xlane.xlu1 %1078 }
 0x2bf   : > { %4783 = vpow2.f32 %v1103_v37  ;;  %v1090_v48 = vsub.f32 %v5409_v9, %v1070_v28  ;;  %v1093_v53 = vsub.f32 %v5404_v4, %v1079_v50 }
 0x2c0   : > { %4785 = vpow2.f32 %v1109_v14 }
 0x2c1   : > { %v1099_v51 = vmul.f32 1.442695, %v1090_v48  ;;  %v1105_v56 = vmul.f32 1.442695, %v1093_v53 }
 0x2c2   : > { %v1088_v8 = vpop.xlane.xlu0 %1087  ;;  %v1397_v63 = vpop.xlane.xlu1 %1396 }
 0x2c3   : > { %4787 = vpow2.f32 %v1099_v51  ;;  %v1096_v58 = vsub.f32 %v5417_v16, %v1088_v8  ;;  %v1415_v1 = vsub.f32 %v5413_v12, %v1397_v63 }
 0x2c4   : > { %v5565_v31 = vpop.eup %4779  ;;  %4789 = vpow2.f32 %v1105_v56 }
 0x2c5   : > { %v1111_v13 = vmul.f32 1.442695, %v1096_v58  ;;  %v1425_v24 = vmul.f32 1.442695, %v1415_v1  ;;  %v1119_v28 = vsel %vm701_vm1, %v5565_v31, 0.0 }
 0x2c6   : > { %v1082_v9 = vpop.xlane.xlu0 %1081  ;;  %1120 = vadd.xlane.f32.xlu1 %v1119_v28  ;;  %v1391_v14 = vpop.xlane.xlu1 %1390 }
 0x2c7   : > { %4791 = vpow2.f32 %v1111_v13  ;;  %v1094_v4 = vsub.f32 %v5425_v25, %v1082_v9  ;;  %v1413_v37 = vsub.f32 %v5421_v21, %v1391_v14 }
 0x2c8   : > { %v5571_v26 = vpop.eup %4781  ;;  %4793 = vpow2.f32 %v1425_v24 }
 0x2c9   : > { %v1107_v12 = vmul.f32 1.442695, %v1094_v4  ;;  %v1421_v16 = vmul.f32 1.442695, %v1413_v37  ;;  %v1113_v50 = vsel %vm701_vm1, %v5571_v26, 0.0 }
 0x2ca   : > { %v1400_v48 = vpop.xlane.xlu0 %1399  ;;  %1114 = vadd.xlane.f32.xlu1 %v1113_v50  ;;  %v1409_v53 = vpop.xlane.xlu1 %1408 }
 0x2cb   : > { %4795 = vpow2.f32 %v1107_v12  ;;  %v1416_v51 = vsub.f32 %v5434_v38, %v1400_v48  ;;  %v1419_v56 = vsub.f32 %v5429_v30, %v1409_v53 }
 0x2cc   : > { %v5577_v8 = vpop.eup %4783  ;;  %4797 = vpow2.f32 %v1421_v16 }
 0x2cd   : > { %v5579_v21 = vpop.eup %4785  ;;  %v1427_v25 = vmul.f32 1.442695, %v1416_v51  ;;  %v1433_v63 = vmul.f32 1.442695, %v1419_v56  ;;  %v1122_v58 = vsel %vm701_vm1, %v5577_v8, 0.0 }
 0x2ce   : > { %v1394_v1 = vpop.xlane.xlu0 %1393  ;;  %1123 = vadd.xlane.f32.xlu0 %v1122_v58  ;;  %v1131_v13 = vsel %vm701_vm1, %v5579_v21, 0.0  ;;  %v1403_v24 = vpop.xlane.xlu1 %1402 }
 0x2cf   : > { %4799 = vpow2.f32 %v1427_v25  ;;  %v1414_v38 = vsub.f32 %v5443_v46, %v1394_v1  ;;  %1132 = vadd.xlane.f32.xlu1 %v1131_v13  ;;  %v1417_v30 = vsub.f32 %v5438_v42, %v1403_v24 }
 0x2d0   : > { %v5587_v28 = vpop.eup %4787  ;;  %4801 = vpow2.f32 %v1433_v63 }
 0x2d1   : > { %v5589_v9 = vpop.eup %4789  ;;  %v1423_v14 = vmul.f32 1.442695, %v1414_v38  ;;  %v1429_v4 = vmul.f32 1.442695, %v1417_v30  ;;  %v1116_v37 = vsel %vm701_vm1, %v5587_v28, 0.0 }
 0x2d2   : > { %v1412_v12 = vpop.xlane.xlu0 %1411  ;;  %1117 = vadd.xlane.f32.xlu0 %v1116_v37  ;;  %v1125_v16 = vsel %vm701_vm1, %v5589_v9, 0.0  ;;  %v1717_v50 = vpop.xlane.xlu1 %1716 }
 0x2d3   : > { %4803 = vpow2.f32 %v1423_v14  ;;  %v1420_v46 = vsub.f32 %v5451_v54, %v1412_v12  ;;  %1126 = vadd.xlane.f32.xlu1 %v1125_v16  ;;  %v1735_v42 = vsub.f32 %v5447_v49, %v1717_v50 }
 0x2d4   : > { %v5597_v48 = vpop.eup %4791  ;;  %4805 = vpow2.f32 %v1429_v4 }
 0x2d5   : > { %v5599_v53 = vpop.eup %4793  ;;  %v1435_v51 = vmul.f32 1.442695, %v1420_v46  ;;  %v1745_v56 = vmul.f32 1.442695, %v1735_v42  ;;  %v1134_v25 = vsel %vm701_vm1, %v5597_v48, 0.0 }
 0x2d6   : > { %v1406_v63 = vpop.xlane.xlu0 %1405  ;;  %1135 = vadd.xlane.f32.xlu0 %v1134_v25  ;;  %v1443_v58 = vsel %vm701_vm1, %v5599_v53, 0.0  ;;  %v1711_v1 = vpop.xlane.xlu1 %1710 }
 0x2d7   : > { %4807 = vpow2.f32 %v1435_v51  ;;  %v1418_v54 = vsub.f32 %v5460_v5, %v1406_v63  ;;  %1444 = vadd.xlane.f32.xlu1 %v1443_v58  ;;  %v1733_v49 = vsub.f32 %v5455_v60, %v1711_v1 }
 0x2d8   : > { %v5607_v13 = vpop.eup %4795  ;;  %4809 = vpow2.f32 %v1745_v56 }
 0x2d9   : > { %v5609_v24 = vpop.eup %4797  ;;  %v1431_v38 = vmul.f32 1.442695, %v1418_v54  ;;  %v1741_v30 = vmul.f32 1.442695, %v1733_v49  ;;  %v1128_v14 = vsel %vm701_vm1, %v5607_v13, 0.0 }
 0x2da   : > { %v1720_v4 = vpop.xlane.xlu0 %1719  ;;  %1129 = vadd.xlane.f32.xlu0 %v1128_v14  ;;  %v1437_v37 = vsel %vm701_vm1, %v5609_v24, 0.0  ;;  %v1729_v12 = vpop.xlane.xlu1 %1728 }
 0x2db   : > { %4811 = vpow2.f32 %v1431_v38  ;;  %v1736_v5 = vsub.f32 %v5469_v22, %v1720_v4  ;;  %1438 = vadd.xlane.f32.xlu1 %v1437_v37  ;;  %v1739_v60 = vsub.f32 %v5464_v11, %v1729_v12 }
 0x2dc   : > { %v5617_v16 = vpop.eup %4799  ;;  %4813 = vpow2.f32 %v1741_v30 }
 0x2dd   : > { %v5619_v50 = vpop.eup %4801  ;;  %v1747_v46 = vmul.f32 1.442695, %v1736_v5  ;;  %v1753_v42 = vmul.f32 1.442695, %v1739_v60  ;;  %v1446_v51 = vsel %vm701_vm1, %v5617_v16, 0.0 }
 0x2de   : > { %v1714_v56 = vpop.xlane.xlu0 %1713  ;;  %1447 = vadd.xlane.f32.xlu0 %v1446_v51  ;;  %v1455_v25 = vsel %vm701_vm1, %v5619_v50, 0.0  ;;  %v1723_v63 = vpop.xlane.xlu1 %1722 }
 0x2df   : > { %v1734_v22 = vsub.f32 %v5477_v29, %v1714_v56  ;;  %1456 = vadd.xlane.f32.xlu1 %v1455_v25  ;;  %4815 = vpow2.f32 %v1753_v42  ;;  %v1737_v54 = vsub.f32 %v5473_v6, %v1723_v63 }
 0x2e0   : > { %v5626_v11 = vpop.eup %4803  ;;  %4817 = vpow2.f32 %v1747_v46 }
 0x2e1   : > { %v5628_v58 = vpop.eup %4805  ;;  %v1743_v1 = vmul.f32 1.442695, %v1734_v22  ;;  %v1440_v49 = vsel %vm701_vm1, %v5626_v11, 0.0  ;;  %v1749_v4 = vmul.f32 1.442695, %v1737_v54 }
 0x2e2   : > { %v1732_v38 = vpop.xlane.xlu0 %1731  ;;  %1441 = vadd.xlane.f32.xlu0 %v1440_v49  ;;  %v1449_v30 = vsel %vm701_vm1, %v5628_v58, 0.0 }
 0x2e3   : > { %1450 = vadd.xlane.f32.xlu1 %v1449_v30  ;;  %4819 = vpow2.f32 %v1743_v1  ;;  %v1740_v37 = vsub.f32 %v5481_v36, %v1732_v38 }
 0x2e4   : > { %v5635_v29 = vpop.eup %4807  ;;  %4821 = vpow2.f32 %v1749_v4 }
 0x2e5   : > { %v5637_v14 = vpop.eup %4809  ;;  %v1458_v6 = vsel %vm701_vm1, %v5635_v29, 0.0  ;;  %v1755_v46 = vmul.f32 1.442695, %v1740_v37 }
 0x2e6   : > { %v1726_v12 = vpop.xlane.xlu0 %1725  ;;  %1459 = vadd.xlane.f32.xlu0 %v1458_v6  ;;  %v1763_v5 = vsel %vm701_vm1, %v5637_v14, 0.0 }
 0x2e7   : > { %1764 = vadd.xlane.f32.xlu1 %v1763_v5  ;;  %v1738_v42 = vsub.f32 %v5489_v47, %v1726_v12  ;;  %4823 = vpow2.f32 %v1755_v46  ;;  %v5677_v46 = vpop.permute.xlu1 %1807 }
 0x2e8   : > { %v5644_v60 = vpop.eup %4811 }
 0x2e9   : > { %v1452_v51 = vsel %vm701_vm1, %v5644_v60, 0.0  ;;  %v5649_v56 = vpop.eup %4813  ;;  %v1751_v25 = vmul.f32 1.442695, %v1738_v42 }
 0x2ea   : > { %1453 = vadd.xlane.f32.xlu0 %v1452_v51  ;;  %v1757_v63 = vsel %vm701_vm1, %v5649_v56, 0.0  ;;  %v838_v5 = vpop.xlane.xlu0 %837 }
 0x2eb   : > { %4825 = vpow2.f32 %v1751_v25 }
 0x2ec   : > { %v5651_v36 = vpop.eup %4815 }
 0x2ed   : > { %v5655_v22 = vpop.eup %4817  ;;  %v1775_v1 = vsel %vm701_vm1, %v5651_v36, 0.0 }
 0x2ee   : > { %1758 = vadd.xlane.f32.xlu0 %v1757_v63  ;;  %1776 = vadd.xlane.f32.xlu1 %v1775_v1  ;;  %v1766_v47 = vsel %vm701_vm1, %v5655_v22, 0.0  ;;  %v832_v42 = vpop.xlane.xlu0 %831 }
 0x2ef   : > { %4827 = vrcp.f32 %v832_v42 }
 0x2f0   : > { %v5661_v54 = vpop.eup %4819 }
 0x2f1   : > { %v1760_v49 = vsel %vm701_vm1, %v5661_v54, 0.0  ;;  %v5665_v38 = vpop.eup %4821 }
 0x2f2   : > { %1767 = vadd.xlane.f32.xlu0 %v1766_v47  ;;  %v1769_v30 = vsel %vm701_vm1, %v5665_v38, 0.0 }
 0x2f4   : > { %v5669_v4 = vpop.eup %4823 }
 0x2f5   : > { %v1778_v37 = vsel %vm701_vm1, %v5669_v4, 0.0 }
 0x2f6   : > { %1761 = vadd.xlane.f32.xlu0 %v1760_v49 }
 0x2f8   : > { %v5673_v6 = vpop.eup %4825 }
 0x2f9   : > { %v1772_v12 = vsel %vm701_vm1, %v5673_v6, 0.0 }
 0x2fa   : > { %1770 = vadd.xlane.f32.xlu0 %v1769_v30 }
 0x2fc   : > { %v4828_v30 = vpop.eup %4827 }
 0x2fe   : > { %1779 = vadd.xlane.f32.xlu0 %v1778_v37 }
 0x302   : > { %1773 = vadd.xlane.f32.xlu0 %v1772_v12  ;;  %v860_v12 = vmul.f32 %v4828_v30, %v5497_v62 }
 0x312   : > { %v850_v25 = vpop.xlane.xlu0 %849 }
 0x313   : > { %v835_v51 = vpop.xlane.xlu1 %834 }
 0x314   : > { %4829 = vrcp.f32 %v835_v51 }
 0x317   : > { %v829_v63 = vpop.xlane.xlu1 %828 }
 0x318   : > { %4831 = vrcp.f32 %v829_v63 }
 0x319   : > { %4833 = vrcp.f32 %v838_v5 }
 0x31a   : > { %4835 = vrcp.f32 %v850_v25 }
 0x31b   : > { %v847_v1 = vpop.xlane.xlu1 %846  ;;  %1173 = vxpose.xlu1.c.b16.start [1/4] (short) (narrow) %v5501_v45, 16 }
 0x31c   : > { %4837 = vrcp.f32 %v847_v1 }
 0x31e   : > { %v844_v47 = vpop.xlane.xlu0 %843 }
 0x31f   : > { %4839 = vrcp.f32 %v844_v47  ;;  %v841_v49 = vpop.xlane.xlu1 %840  ;;  %1174 = vxpose.xlu1.c.b16.cont [2/4] (short) (narrow) %v5507_v10, 16  ;;  %v940_v10 = vsel %vm701_vm1, %v860_v12, 0.0 }
 0x320   : > { %4841 = vrcp.f32 %v841_v49 }
 0x321   : > { %v4830_v37 = vpop.eup %4829 }
 0x322   : > { %v861_v5 = vmul.f32 %v4830_v37, %v5521_v23 }
 0x323   : > { %1175 = vxpose.xlu1.c.b16.cont [3/4] (short) (narrow) %v5545_v33, 16 }
 0x324   : > { %v942_v30 = vsel %vm701_vm1, %v861_v5, 0.0 }
 0x325   : > { %v4832_v42 = vpop.eup %4831 }
 0x326   : > { %v4834_v51 = vpop.eup %4833  ;;  %v859_v25 = vmul.f32 %v4832_v42, %v5529_v27 }
 0x327   : > { %v4836_v45 = vpop.eup %4835  ;;  %1176 = vxpose.xlu1.c.b16.end [4/4] (short) (narrow) %v5552_v41, 16  ;;  %v862_v62 = vmul.f32 %v4834_v51, %v5493_v52 }
 0x328   : > { %v939_v63 = vsel %vm701_vm1, %v859_v25, 0.0  ;;  %v866_v33 = vmul.f32 %v4836_v45, %v5523_v57 }
 0x329   : > { %v4838_v1 = vpop.eup %4837  ;;  %v941_v47 = vadd.f32 %v940_v10, %v939_v63  ;;  %v944_v63 = vsel %vm701_vm1, %v862_v62, 0.0 }
 0x32a   : > { %v865_v49 = vmul.f32 %v4838_v1, %v5533_v2 }
 0x32b   : > { %v943_v23 = vadd.f32 %v942_v30, %v941_v47  ;;  %1493 = vxpose.xlu1.c.b16.start [1/4] (short) (narrow) %v5505_v7, 16 }
 0x32c   : > { %v4840_v37 = vpop.eup %4839  ;;  %v870_v27 = vpack.c.bf16 %v866_v33, %v865_v49 }
 0x32d   : > { %v4842_v41 = vpop.eup %4841  ;;  %v864_v42 = vmul.f32 %v4840_v37, %v5539_v0  ;;  %v945_v52 = vadd.f32 %v944_v63, %v943_v23  ;;  %v950_v0 = vsel %vm701_vm1, %v865_v49, 0.0  ;;  %v938_v49 = vld [vmem:[#allocation3] sm:$0x1] }
 0x32e   : > { %4449 = vmatpush3.bf16.msra.mxu1 %v870_v27  ;;  %v863_v32 = vmul.f32 %v4842_v41, %v5537_v19 }
 0x32f   : > { %871 = vxpose.xlu0.c.b16.start [1/4] (short) (narrow) %v5347_v17, 16  ;;  %4450 = vmatprep.subr.bf16.mxu1 %v6716_v44  ;;  %v948_v51 = vsel %vm701_vm1, %v864_v42, 0.0  ;;  %v868_v17 = vpack.c.bf16 %v862_v62, %v861_v5 }
 0x330   : > { %1494 = vxpose.xlu1.c.b16.cont [2/4] (short) (narrow) %v5512_v18, 16  ;;  %v869_v57 = vpack.c.bf16 %v864_v42, %v863_v32  ;;  %v946_v2 = vsel %vm701_vm1, %v863_v32, 0.0  ;;  %v952_v18 = vsel %vm701_vm1, %v866_v33, 0.0 }
 0x331   : > { %v947_v7 = vadd.f32 %v946_v2, %v945_v52 }
 0x332   : > { %4451 = vmatpush3.bf16.msra.mxu1 %v869_v57 }
 0x333   : > { %872 = vxpose.xlu0.c.b16.cont [2/4] (short) (narrow) %v5355_v20, 16  ;;  %4452 = vmatprep.subr.bf16.mxu1 %v6716_v44  ;;  %v949_v19 = vadd.f32 %v948_v51, %v947_v7  ;;  %v867_v20 = vpack.c.bf16 %v860_v12, %v859_v25 }
 0x334   : > { %1495 = vxpose.xlu1.c.b16.cont [3/4] (short) (narrow) %v5547_v3, 16 }
 0x335   : > { %v951_v45 = vadd.f32 %v950_v0, %v949_v19 }
 0x336   : > { %4453 = vmatpush3.bf16.msra.mxu1 %v868_v17 }
 0x337   : > { %873 = vxpose.xlu0.c.b16.cont [3/4] (short) (narrow) %v5375_v40, 16  ;;  %4454 = vmatprep.subr.bf16.mxu1 %v6716_v44  ;;  %v953_v32 = vadd.f32 %v952_v18, %v951_v45 }
 0x338   : > { %1496 = vxpose.xlu1.c.b16.end [4/4] (short) (narrow) %v5555_v61, 16 }
 0x339   : > { %v954_v10 = vrot.slane %v953_v32, 4 }
 0x33a   : > { %4455 = vmatpush3.bf16.msra.mxu1 %v867_v20 }
 0x33b   : > { %v955_v1 = vadd.f32 %v954_v10, %v953_v32  ;;  %874 = vxpose.xlu0.c.b16.end [4/4] (short) (narrow) %v5383_v43, 16  ;;  %4470 = vmatprep.subr.bf16.mxu1 %v6716_v44 }
 0x33d   : > { %v956_v3 = vrot.slane %v955_v1, 2 }
 0x33f   : > { %v957_v5 = vadd.f32 %v956_v3, %v955_v1  ;;  %1813 = vxpose.xlu0.c.b16.start [1/4] (short) (narrow) %v5510_v15, 16 }
 0x341   : > { %v958_v47 = vrot.slane %v957_v5, 1 }
 0x343   : > { %1814 = vxpose.xlu0.c.b16.cont [2/4] (short) (narrow) %v5517_v39, 16  ;;  %v959_v40 = vadd.f32 %v958_v47, %v957_v5 }
 0x345   : > { %v960_v33 = vadd.f32 %v959_v40, %v938_v49 }
 0x347   : > { %1815 = vxpose.xlu0.c.b16.cont [3/4] (short) (narrow) %v5550_v59, 16  ;;  %962 = vst.msk [vmem:[#allocation3] sm:$0x1] %vm961_vm5, %v960_v33 }
 0x34b   : > { %1816 = vxpose.xlu0.c.b16.end [4/4] (short) (narrow) %v5677_v46, 16 }
 0x34f   : > { %v1121_v61 = vpop.xlane.xlu1 %1120 }
 0x353   : > { %v1115_v43 = vpop.xlane.xlu1 %1114 }
 0x354   : > { %4843 = vrcp.f32 %v1115_v43 }
 0x355   : > { %4845 = vrcp.f32 %v1121_v61 }
 0x357   : > { %v1124_v12 = vpop.xlane.xlu0 %1123 }
 0x358   : > { %v1133_v25 = vpop.xlane.xlu1 %1132  ;;  %4847 = vrcp.f32 %v1124_v12 }
 0x35b   : > { %v1118_v15 = vpop.xlane.xlu0 %1117 }
 0x35c   : > { %4849 = vrcp.f32 %v1118_v15  ;;  %v1127_v62 = vpop.xlane.xlu1 %1126 }
 0x35d   : > { %4851 = vrcp.f32 %v1127_v62 }
 0x35e   : > { %4853 = vrcp.f32 %v1133_v25 }
 0x35f   : > { %v1136_v39 = vpop.xlane.xlu0 %1135 }
 0x360   : > { %v1445_v30 = vpop.xlane.xlu1 %1444  ;;  %4855 = vrcp.f32 %v1136_v39 }
 0x361   : > { %v4844_v37 = vpop.eup %4843 }
 0x362   : > { %v4846_v46 = vpop.eup %4845  ;;  %v5722_v42 = vmul.f32 %v4844_v37, %v5571_v26 }
 0x363   : > { %v1130_v23 = vpop.xlane.xlu0 %1129  ;;  %v5725_v57 = vmul.f32 %v4846_v46, %v5565_v31 }
 0x364   : > { %4857 = vrcp.f32 %v1130_v23  ;;  %v1439_v59 = vpop.xlane.xlu1 %1438  ;;  %v1249_v19 = vsel %vm701_vm1, %v5722_v42, 0.0 }
 0x365   : > { %v4848_v41 = vpop.eup %4847  ;;  %4859 = vrcp.f32 %v1439_v59 }
 0x366   : > { %4861 = vrcp.f32 %v1445_v30  ;;  %v5733_v0 = vmul.f32 %v4848_v41, %v5577_v8 }
 0x367   : > { %v1448_v27 = vpop.xlane.xlu0 %1447 }
 0x368   : > { %v1457_v63 = vpop.xlane.xlu1 %1456  ;;  %4863 = vrcp.f32 %v1448_v27  ;;  %v1254_v8 = vsel %vm701_vm1, %v5733_v0, 0.0 }
 0x369   : > { %v4850_v52 = vpop.eup %4849 }
 0x36a   : > { %v5728_v2 = vmul.f32 %v4850_v52, %v5587_v28  ;;  %v4852_v7 = vpop.eup %4851  ;;  %v1252_v28 = vsel %vm701_vm1, %v5725_v57, 0.0  ;;  %v5110_v52 = vmov 1966171168  }
 0x36b   : > { %v1442_v51 = vpop.xlane.xlu0 %1441  ;;  %v5740_v45 = vmul.f32 %v4852_v7, %v5589_v9  ;;  %v4854_v18 = vpop.eup %4853  ;;  %v1272_v7 = vunpack.c.l.s4 %v5110_v52 }
 0x36c   : > { %v1250_v26 = vsel %vm701_vm1, %v5728_v2, 0.0  ;;  %4865 = vrcp.f32 %v1442_v51  ;;  %v1451_v17 = vpop.xlane.xlu1 %1450  ;;  %v5745_v5 = vmul.f32 %v4854_v18, %v5579_v21 }
 0x36d   : > { %v1251_v31 = vadd.f32 %v1250_v26, %v1249_v19  ;;  %4867 = vrcp.f32 %v1451_v17  ;;  %v4856_v10 = vpop.eup %4855  ;;  %v1256_v47 = vsel %vm701_vm1, %v5740_v45, 0.0  ;;  %v1273_v18 = vunpack.c.0.s8 %v1272_v7 }
 0x36e   : > { %4869 = vrcp.f32 %v1457_v63  ;;  %v5753_v33 = vmul.f32 %v4856_v10, %v5597_v48  ;;  %v1260_v12 = vsel %vm701_vm1, %v5745_v5, 0.0 }
 0x36f   : > { %v1253_v32 = vadd.f32 %v1252_v28, %v1251_v31  ;;  %v1460_v20 = vpop.xlane.xlu0 %1459 }
 0x370   : > { %4871 = vrcp.f32 %v1460_v20  ;;  %v1262_v39 = vsel %vm701_vm1, %v5753_v33, 0.0  ;;  %v1765_v27 = vpop.xlane.xlu1 %1764 }
 0x371   : > { %v4858_v1 = vpop.eup %4857  ;;  %v1255_v3 = vadd.f32 %v1254_v8, %v1253_v32 }
 0x372   : > { %v5750_v49 = vmul.f32 %v4858_v1, %v5607_v13  ;;  %v4860_v43 = vpop.eup %4859 }
 0x373   : > { %v1257_v9 = vadd.f32 %v1256_v47, %v1255_v3  ;;  %v1454_v40 = vpop.xlane.xlu0 %1453  ;;  %v4862_v25 = vpop.eup %4861  ;;  %v5762_v30 = vmul.f32 %v4860_v43, %v5609_v24  ;;  %v5793_v43 = vsub.s32 %v1273_v18, %v5320_v55 }
 0x374   : > { %v1258_v61 = vsel %vm701_vm1, %v5750_v49, 0.0  ;;  %4873 = vrcp.f32 %v1454_v40  ;;  %v5765_v59 = vmul.f32 %v4862_v25, %v5599_v53 }
 0x375   : > { %v1259_v21 = vadd.f32 %v1258_v61, %v1257_v9  ;;  %v4864_v62 = vpop.eup %4863  ;;  %v1569_v24 = vsel %vm701_vm1, %v5762_v30, 0.0 }
 0x376   : > { %v5771_v51 = vmul.f32 %v4864_v62, %v5617_v16  ;;  %v1572_v17 = vsel %vm701_vm1, %v5765_v59, 0.0 }
 0x377   : > { %v1759_v15 = vpop.xlane.xlu0 %1758  ;;  %v1261_v13 = vadd.f32 %v1260_v12, %v1259_v21 }
 0x378   : > { %4875 = vrcp.f32 %v1759_v15  ;;  %v1574_v10 = vsel %vm701_vm1, %v5771_v51, 0.0 }
 0x379   : > { %v4866_v48 = vpop.eup %4865  ;;  %v1263_v23 = vadd.f32 %v1262_v39, %v1261_v13  ;;  %4877 = vrcp.f32 %v1765_v27  ;;  %v1777_v13 = vpop.xlane.xlu1 %1776 }
 0x37a   : > { %v5768_v37 = vmul.f32 %v4866_v48, %v5626_v11  ;;  %v4868_v46 = vpop.eup %4867 }
 0x37b   : > { %v1768_v41 = vpop.xlane.xlu0 %1767  ;;  %v1264_v63 = vrot.slane %v1263_v23, 4  ;;  %v5778_v11 = vmul.f32 %v4868_v46, %v5628_v58  ;;  %v4870_v31 = vpop.eup %4869 }
 0x37c   : > { %v1570_v53 = vsel %vm701_vm1, %v5768_v37, 0.0  ;;  %4879 = vrcp.f32 %v1768_v41  ;;  %v5785_v58 = vmul.f32 %v4870_v31, %v5619_v50 }
 0x37d   : > { %v1265_v19 = vadd.f32 %v1264_v63, %v1263_v23  ;;  %v1571_v26 = vadd.f32 %v1570_v53, %v1569_v24  ;;  %v4872_v20 = vpop.eup %4871  ;;  %v1576_v9 = vsel %vm701_vm1, %v5778_v11, 0.0 }
 0x37e   : > { %v5796_v12 = vmul.f32 %v4872_v20, %v5635_v29 }
 0x37f   : > { %v1762_v28 = vpop.xlane.xlu0 %1761  ;;  %v1266_v16 = vrot.slane %v1265_v19, 2  ;;  %v1573_v32 = vadd.f32 %v1572_v17, %v1571_v26 }
 0x380   : > { %4881 = vrcp.f32 %v1762_v28  ;;  %v1582_v55 = vsel %vm701_vm1, %v5796_v12, 0.0 }
 0x381   : > { %v4874_v8 = vpop.eup %4873  ;;  %v1267_v1 = vadd.f32 %v1266_v16, %v1265_v19  ;;  %v1575_v3 = vadd.f32 %v1574_v10, %v1573_v32  ;;  %v1156_v32 = vpack.c.bf16 %v5753_v33, %v5745_v5  ;;  %v1155_v33 = vpack.c.bf16 %v5750_v49, %v5740_v45 }
 0x382   : > { %v5788_v47 = vmul.f32 %v4874_v8, %v5644_v60  ;;  %v1580_v60 = vsel %vm701_vm1, %v5785_v58, 0.0 }
 0x383   : > { %v1771_v40 = vpop.xlane.xlu0 %1770  ;;  %v1268_v61 = vrot.slane %v1267_v1, 1  ;;  %v1577_v21 = vadd.f32 %v1576_v9, %v1575_v3 }
 0x384   : > { %4883 = vrcp.f32 %v1771_v40  ;;  %v1578_v50 = vsel %vm701_vm1, %v5788_v47, 0.0 }
 0x385   : > { %v1269_v25 = vadd.f32 %v1268_v61, %v1267_v1  ;;  %v1579_v15 = vadd.f32 %v1578_v50, %v1577_v21  ;;  %v4876_v23 = vpop.eup %4875  ;;  %4885 = vrcp.f32 %v1777_v13 }
 0x386   : > { %v4878_v27 = vpop.eup %4877  ;;  %v5808_v7 = vmul.f32 %v4876_v23, %v5649_v56 }
 0x387   : > { %v1780_v62 = vpop.xlane.xlu0 %1779  ;;  %v1277_v39 = vrot.slane %v1269_v25, %v5793_v43  ;;  %v1581_v48 = vadd.f32 %v1580_v60, %v1579_v15  ;;  %v5811_v19 = vmul.f32 %v4878_v27, %v5637_v14  ;;  %v1154_v25 = vpack.c.bf16 %v5733_v0, %v5725_v57  ;;  %v1181_v0 = vpop.trf.xlu1 }
 0x388   : > { %4887 = vrcp.f32 %v1780_v62  ;;  %v1889_v28 = vsel %vm701_vm1, %v5808_v7, 0.0  ;;  %v1153_v62 = vpack.c.bf16 %v5728_v2, %v5722_v42  ;;  %v1479_v42 = vpack.c.bf16 %v5788_v47, %v5778_v11 }
 0x389   : > { %v1284_v29 = vrot.slane %v1277_v39, %v5793_v43  ;;  %v1583_v46 = vadd.f32 %v1582_v55, %v1581_v48  ;;  %v4880_v52 = vpop.eup %4879 }
 0x38a   : > { %v5817_v31 = vmul.f32 %v4880_v52, %v5655_v22  ;;  %v1892_v22 = vsel %vm701_vm1, %v5811_v19, 0.0  ;;  %v1248_v52 = vld [vmem:[#allocation3] sm:$0x1] }
 0x38b   : > { %v1774_v41 = vpop.xlane.xlu0 %1773  ;;  %1285 = vrot.lane.b32.xlu0 %v1284_v29, %s5111_s17  ;;  %v1584_v63 = vrot.slane %v1583_v46, 4 }
 0x38c   : > { %4889 = vrcp.f32 %v1774_v41  ;;  %v1894_v5 = vsel %vm701_vm1, %v5817_v31, 0.0 }
 0x38d   : > { %v4882_v24 = vpop.eup %4881  ;;  %v1585_v53 = vadd.f32 %v1584_v63, %v1583_v46  ;;  %v1477_v46 = vpack.c.bf16 %v5768_v37, %v5762_v30 }
 0x38e   : > { %v5814_v26 = vmul.f32 %v4882_v24, %v5661_v54  ;;  %v1501_v41 = vpop.trf.xlu1 }
 0x38f   : > { %v1586_v17 = vrot.slane %v1585_v53, 2 }
 0x390   : > { %v1890_v16 = vsel %vm701_vm1, %v5814_v26, 0.0  ;;  %v1797_v37 = vpack.c.bf16 %v5814_v26, %v5808_v7 }
 0x391   : > { %v4884_v56 = vpop.eup %4883  ;;  %v879_v18 = vpop.trf.xlu0  ;;  %v1891_v14 = vadd.f32 %v1890_v16, %v1889_v28  ;;  %v1587_v20 = vadd.f32 %v1586_v17, %v1585_v53  ;;  %v932_v53 = vld [vmem:[#allocation2] sm:$0xff] }
 0x392   : > { %4457 = vmatmul.mubr.msk.bf16.vlgmr.msra.gmra.mxu1 %vm592_vm3, %v879_v18  ;;  %v5827_v54 = vmul.f32 %v4884_v56, %v5665_v38  ;;  %v4886_v9 = vpop.eup %4885 }
 0x393   : > { %4471 = vmatpush3.bf16.msra.mxu1 %v1156_v32  ;;  %4478 = vmatprep.mubr.msk.bf16.mxu1 %vm5109_vm4, %v6716_v44  ;;  %v1893_v10 = vadd.f32 %v1892_v22, %v1891_v14  ;;  %v1588_v8 = vrot.slane %v1587_v20, 1  ;;  %v1795_v45 = vmul.f32 %v4886_v9, %v5651_v36 }
 0x394   : > { %4472 = vmatprep.subr.bf16.mxu1 %v6716_v44  ;;  %v1896_v3 = vsel %vm701_vm1, %v5827_v54, 0.0 }
 0x395   : > { %v1895_v1 = vadd.f32 %v1894_v5, %v1893_v10  ;;  %v1589_v38 = vadd.f32 %v1588_v8, %v1587_v20  ;;  %v4888_v21 = vpop.eup %4887  ;;  %v1900_v57 = vsel %vm701_vm1, %v1795_v45, 0.0 }
 0x396   : > { %v1796_v60 = vmul.f32 %v4888_v21, %v5669_v4 }
 0x397   : > { %4473 = vmatpush3.bf16.msra.mxu1 %v1155_v33  ;;  %v1897_v40 = vadd.f32 %v1896_v3, %v1895_v1  ;;  %v1597_v61 = vrot.slane %v1589_v38, %v5793_v43 }
 0x398   : > { %4474 = vmatprep.subr.bf16.mxu1 %v6716_v44  ;;  %v1902_v36 = vsel %vm701_vm1, %v1796_v60, 0.0  ;;  %v1800_v47 = vpack.c.bf16 %v1796_v60, %v1795_v45 }
 0x399   : > { %v4890_v50 = vpop.eup %4889  ;;  %v5845_v15 = vrot.slane %v1597_v61, %v5793_v43 }
 0x39a   : > { %v1794_v49 = vmul.f32 %v4890_v50, %v5673_v6  ;;  %v1480_v6 = vpack.c.bf16 %v5796_v12, %v5785_v58  ;;  %v1478_v58 = vpack.c.bf16 %v5771_v51, %v5765_v59  ;;  %v1798_v59 = vpack.c.bf16 %v5817_v31, %v5811_v19  ;;  %v933_v19 = vld [vmem:[#allocation2 + $0x8] sm:$0xff] }
 0x39b   : > { %4475 = vmatpush3.bf16.msra.mxu1 %v1154_v25 }
 0x39c   : > { %4476 = vmatprep.subr.bf16.mxu1 %v6716_v44  ;;  %v1898_v13 = vsel %vm701_vm1, %v1794_v49, 0.0  ;;  %v1799_v30 = vpack.c.bf16 %v1794_v49, %v5827_v54 }
 0x39d   : > { %v1899_v39 = vadd.f32 %v1898_v13, %v1897_v40 }
 0x39f   : > { %4477 = vmatpush3.bf16.msra.mxu1 %v1153_v62  ;;  %v1901_v48 = vadd.f32 %v1900_v57, %v1899_v39 }
 0x3a0   : > { %4492 = vmatprep.subr.bf16.mxu1 %v6716_v44 }
 0x3a1   : > { %v1903_v55 = vadd.f32 %v1902_v36, %v1901_v48  ;;  %v1821_v51 = vpop.trf.xlu0 }
 0x3a2   : > { %4479 = vmatmul.mubr.msk.bf16.vlgmr.msra.gmra.mxu1 %vm592_vm3, %v1181_v0 }
 0x3a3   : > { %4493 = vmatpush3.bf16.msra.mxu1 %v1480_v6  ;;  %4500 = vmatprep.mubr.msk.bf16.mxu1 %vm5109_vm4, %v6716_v44  ;;  %v1904_v4 = vrot.slane %v1903_v55, 4 }
 0x3a4   : > { %4494 = vmatprep.subr.bf16.mxu1 %v6716_v44 }
 0x3a5   : > { %v1905_v2 = vadd.f32 %v1904_v4, %v1903_v55 }
 0x3a7   : > { %4495 = vmatpush3.bf16.msra.mxu1 %v1479_v42  ;;  %v1906_v23 = vrot.slane %v1905_v2, 2 }
 0x3a8   : > { %4496 = vmatprep.subr.bf16.mxu1 %v6716_v44 }
 0x3a9   : > { %v1907_v12 = vadd.f32 %v1906_v23, %v1905_v2 }
 0x3ab   : > { %4497 = vmatpush3.bf16.msra.mxu1 %v1478_v58  ;;  %v1908_v29 = vrot.slane %v1907_v12, 1 }
 0x3ac   : > { %4498 = vmatprep.subr.bf16.mxu1 %v6716_v44 }
 0x3ad   : > { %v1909_v27 = vadd.f32 %v1908_v29, %v1907_v12 }
 0x3af   : > { %4499 = vmatpush3.bf16.msra.mxu1 %v1477_v46  ;;  %v1917_v11 = vrot.slane %v1909_v27, %v5793_v43 }
 0x3b0   : > { %4514 = vmatprep.subr.bf16.mxu1 %v6716_v44 }
 0x3b1   : > { %v1924_v63 = vrot.slane %v1917_v11, %v5793_v43 }
 0x3b2   : > { %4501 = vmatmul.mubr.msk.bf16.vlgmr.msra.gmra.mxu1 %vm592_vm3, %v1501_v41 }
 0x3b3   : > { %4515 = vmatpush3.bf16.msra.mxu1 %v1800_v47  ;;  %4522 = vmatprep.mubr.msk.bf16.mxu1 %vm5109_vm4, %v6716_v44 }
 0x3b4   : > { %4516 = vmatprep.subr.bf16.mxu1 %v6716_v44 }
 0x3b7   : > { %4517 = vmatpush3.bf16.msra.mxu1 %v1799_v30 }
 0x3b8   : > { %4518 = vmatprep.subr.bf16.mxu1 %v6716_v44 }
 0x3bb   : > { %4519 = vmatpush3.bf16.msra.mxu1 %v1798_v59 }
 0x3bc   : > { %4520 = vmatprep.subr.bf16.mxu1 %v6716_v44 }
 0x3bf   : > { %4521 = vmatpush3.bf16.msra.mxu1 %v1797_v37 }
 0x3c2   : > { %4523 = vmatmul.mubr.msk.bf16.vlgmr.msra.gmra.mxu1 %vm592_vm3, %v1821_v51 }
 0x3fd   : > { %v1286_v43 = vpop.permute.xlu0 %1285 }
 0x3fe   : > { %v1288_v24 = vadd.f32 %v1286_v43, %v1248_v52 }
 0x400   : > { %1290 = vst.msk [vmem:[#allocation3] sm:$0x1] %vm1289_vm6, %v1288_v24 }
 0x407   : > { %v1568_v60 = vld [vmem:[#allocation3] sm:$0x1] }
 0x452   : > { %v925_v17 = vpop.f32.mrf.mxu1 }
 0x453   : > { %v934_v28 = vadd.f32 %v932_v53, %v925_v17 }
 0x454   : > { %v4458_v16 = vpop.f32.mrf.mxu1 }
 0x455   : > { %936 = vst.msk [vmem:[#allocation2] sm:$0xff] %vm701_vm1, %v934_v28 }
 0x456   : > { %v928_v44 = vpop.f32.mrf.mxu1 }
 0x457   : > { %v935_v31 = vadd.f32 %v933_v19, %v928_v44 }
 0x458   : > { %v4459_v56 = vpop.f32.mrf.mxu1 }
 0x459   : > { %937 = vst.msk [vmem:[#allocation2 + $0x8] sm:$0xff] %vm701_vm1, %v935_v31 }
 0x45c   : > { %v1233_v38 = vld [vmem:[#allocation2] sm:$0xff] }
 0x460   : > { %v1234_v40 = vld [vmem:[#allocation2 + $0x8] sm:$0xff] }
 0x462   : > { %v1226_v7 = vpop.f32.mrf.mxu1 }
 0x463   : > { %1237 = vrot.lane.b32.xlu1 %v1226_v7, %s5111_s17 }
 0x464   : > { %v4480_v26 = vpop.f32.mrf.mxu1 }
 0x466   : > { %v1229_v18 = vpop.f32.mrf.mxu1 }
 0x467   : > { %1239 = vrot.lane.b32.xlu1 %v1229_v18, %s5111_s17 }
 0x468   : > { %v4481_v32 = vpop.f32.mrf.mxu1 }
 0x472   : > { %v1546_v14 = vpop.f32.mrf.mxu1 }
 0x473   : > { %1557 = vrot.lane.b32.xlu1 %v1546_v14, %s5112_s22 }
 0x474   : > { %v4502_v20 = vpop.f32.mrf.mxu1 }
 0x476   : > { %v1549_v54 = vpop.f32.mrf.mxu1 }
 0x477   : > { %1559 = vrot.lane.b32.xlu1 %v1549_v54, %s5112_s22 }
 0x478   : > { %v4503_v22 = vpop.f32.mrf.mxu1 }
 0x47b   : > { %1605 = vrot.lane.b32.xlu1 %v5845_v15, %s5112_s22 }
 0x482   : > { %v1866_v10 = vpop.f32.mrf.mxu1 }
 0x483   : > { %1877 = vrot.lane.b32.xlu0 %v1866_v10, %s5113_s28 }
 0x484   : > { %v4524_v8 = vpop.f32.mrf.mxu1 }
 0x486   : > { %v1869_v5 = vpop.f32.mrf.mxu1 }
 0x487   : > { %1925 = vrot.lane.b32.xlu0 %v1924_v63, %s5113_s28  ;;  %1879 = vrot.lane.b32.xlu1 %v1869_v5, %s5113_s28 }
 0x488   : > { %v4525_v33 = vpop.f32.mrf.mxu1 }
 0x4d5   : > { %v1238_v1 = vpop.permute.xlu1 %1237 }
 0x4d6   : > { %v1243_v3 = vadd.f32 %v1238_v1, %v1233_v38 }
 0x4d8   : > { %1246 = vst.msk [vmem:[#allocation2] sm:$0xff] %vm1245_vm7, %v1243_v3 }
 0x4d9   : > { %v1240_v9 = vpop.permute.xlu1 %1239 }
 0x4da   : > { %v1244_v61 = vadd.f32 %v1240_v9, %v1234_v40 }
 0x4dc   : > { %1247 = vst.msk [vmem:[#allocation2 + $0x8] sm:$0xff] %vm1245_vm7, %v1244_v61 }
 0x4df   : > { %v1553_v50 = vld [vmem:[#allocation2] sm:$0xff] }
 0x4e3   : > { %v1554_v45 = vld [vmem:[#allocation2 + $0x8] sm:$0xff] }
 0x4e5   : > { %v1558_v21 = vpop.permute.xlu1 %1557 }
 0x4e6   : > { %v1563_v25 = vadd.f32 %v1558_v21, %v1553_v50 }
 0x4e8   : > { %1566 = vst.msk [vmem:[#allocation2] sm:$0xff] %vm1565_vm8, %v1563_v25 }
 0x4e9   : > { %v1560_v15 = vpop.permute.xlu1 %1559 }
 0x4ea   : > { %v1564_v49 = vadd.f32 %v1560_v15, %v1554_v45 }
 0x4ec   : > { %1567 = vst.msk [vmem:[#allocation2 + $0x8] sm:$0xff] %vm1565_vm8, %v1564_v49 }
 0x4ed   : > { %v1606_v13 = vpop.permute.xlu1 %1605 }
 0x4ee   : > { %v1608_v62 = vadd.f32 %v1606_v13, %v1568_v60 }
 0x4ef   : > { %v1873_v57 = vld [vmem:[#allocation2] sm:$0xff] }
 0x4f0   : > { %1610 = vst.msk [vmem:[#allocation3] sm:$0x1] %vm1609_vm9, %v1608_v62 }
 0x4f3   : > { %v1874_v55 = vld [vmem:[#allocation2 + $0x8] sm:$0xff] }
 0x4f5   : > { %v1878_v39 = vpop.permute.xlu0 %1877 }
 0x4f6   : > { %v1883_v0 = vadd.f32 %v1878_v39, %v1873_v57 }
 0x4f7   : > { %v1888_v48 = vld [vmem:[#allocation3] sm:$0x1] }
 0x4f8   : > { %1886 = vst.msk [vmem:[#allocation2] sm:$0xff] %vm1885_vm10, %v1883_v0 }
 0x4f9   : > { %v1926_v36 = vpop.permute.xlu0 %1925  ;;  %v1880_v6 = vpop.permute.xlu1 %1879 }
 0x4fa   : > { %v1928_v4 = vadd.f32 %v1926_v36, %v1888_v48  ;;  %v1884_v42 = vadd.f32 %v1880_v6, %v1874_v55 }
 0x4fc   : > { %1930 = vst.msk [vmem:[#allocation3] sm:$0x1] %vm1929_vm11, %v1928_v4 }
 0x4fd   : > { %1887 = vst.msk [vmem:[#allocation2 + $0x8] sm:$0xff] %vm1885_vm10, %v1884_v42 }
 0x4fe PF: > { %p4205_p7 = scmp.ne.s32.totalorder %s5087_s21, 1 }
 0x4ff   : > { %s5116_s21 = smov (!%p4205_p7), 80   ;;  %s5117_s15 = smov (!%p4205_p7), 112  }
 0x500   : > { %1934 = sbr.rel (%p4205_p7) target bundleno = 3485 (0xd9d), region = 80  ;;  %s5118_s16 = smov (!%p4205_p7), 96  }
 0x501   : > { %s5119_s19 = smov (!%p4205_p7), 16   ;;  %s5120_s17 = smov (!%p4205_p7), 32  }
 0x502   : > { %s5121_s22 = smov (!%p4205_p7), 48  }
 0x505   : > { %v4891_v2 = vld [vmem:[%s6699_s7] sm:$0xff]   ;;  %v1944_v23 = vlaneseq  ;;  %v5114_v12 = vmov 0.0   ;;  %v1941_v29 = vld [vmem:[#allocation3] sm:$0x1]  ;;  %vm5115_vm12 = vmmov 0   ;;  %v1940_v63 = vld [vmem:[#allocation2 + $0x8] sm:$0xff] }
 0x506   : > { %1961 = vxpose.xlu0.c.b16.start.end [1/1] (short) (narrow) %v4891_v2, 16  ;;  %v4892_v58 = vld [vmem:[%s6700_s8] sm:$0xff]   ;;  %4526 = vmatprep.subr.bf16.mxu0 %v5114_v12  ;;  %v1942_v27 = vadd.f32 1e-05, %v1941_v29  ;;  %vm1977_vm13 = vcmask 130048   ;;  %v6717_v22 = vld [vmem:[#allocation7_spill] sm:$0xff] }
 0x507   : > { %v5899_v46 = vshrl.u32 %v1944_v23, 7  ;;  %4532 = vmatprep.subr.bf16.mxu1 %v5114_v12  ;;  %4528 = vmatprep.mubr.msk.bf16.mxu0 %vm5115_vm12, %v5114_v12  ;;  %v1939_v47 = vld [vmem:[#allocation2] sm:$0xff]  ;;  %v4895_v50 = vld [vmem:[%s6697_s5 + $0x8] sm:$0xff]   ;;  %v4896_v57 = vld [vmem:[%s6697_s5 + $0x10] sm:$0xff]   ;;  %vm2299_vm14 = vcmask 125952   ;;  %vm2455_vm15 = vcmask 257152  }
 0x508   : > { %4534 = vmatprep.mubr.msk.bf16.mxu1 %vm5115_vm12, %v5114_v12  ;;  %v4893_v14 = vld [vmem:[%s6701_s9] sm:$0xff]   ;;  %vm2608_vm1 = vcmask 388352   ;;  %vm2761_vm2 = vcmask 519552   ;;  %vm3925_vm3 = vcmask 392192   ;;  %vm3973_vm4 = vcmask 523264  }
 0x509   : > { %v1946_v41 = vsub.s32 0, %v5899_v46  ;;  %v6718_v10 = vld [vmem:[#allocation6_spill] sm:$0xff] }
 0x50a   : > { %2031 = vxpose.xlu0.c.b16.start.end [1/1] (short) (narrow) %v4892_v58, 16  ;;  %v4894_v9 = vld [vmem:[%s6697_s5] sm:$0xff]  }
 0x50b   : > { %v1947_v11 = vrot.slane %v1942_v27, %v1946_v41 }
 0x50d   : > { %4903 = vrcp.f32 %v1947_v11 }
 0x51a   : > { %v4904_v30 = vpop.eup %4903 }
 0x51b   : > { %v1950_v59 = vmul.f32 %v4904_v30, %v1939_v47  ;;  %v1951_v37 = vmul.f32 %v4904_v30, %v1940_v63 }
 0x51d   : > { %v1952_v51 = vpack.c.bf16 %v1951_v37, %v1950_v59 }
 0x51f   : > { %4527 = vmatpush3.bf16.msra.mxu0 %v1952_v51  ;;  %4533 = vmatpush3.bf16.msra.mxu1 %v1952_v51 }
 0x520   : > { %4544 = vmatprep.subr.bf16.mxu1 %v5114_v12  ;;  %4538 = vmatprep.subr.bf16.mxu0 %v5114_v12 }
 0x568   : > { %v1969_v43 = vpop.trf.xlu0 }
 0x569   : > { %4529 = vmatmul.mubr.msk.bf16.vlgmr.msra.gmra.mxu0 %vm1977_vm13, %v1969_v43 }
 0x56a   : > { %4539 = vmatpush3.bf16.msra.mxu0 %v1952_v51  ;;  %4540 = vmatprep.mubr.msk.bf16.mxu0 %vm5115_vm12, %v5114_v12 }
 0x56b   : > { %4550 = vmatprep.subr.bf16.mxu0 %v5114_v12 }
 0x56c   : > { %v2039_v52 = vpop.trf.xlu0 }
 0x56d   : > { %4535 = vmatmul.mubr.msk.bf16.vlgmr.msra.gmra.mxu1 %vm1977_vm13, %v2039_v52 }
 0x56e   : > { %4546 = vmatprep.mubr.msk.bf16.mxu1 %vm5115_vm12, %v5114_v12 }
 0x629   : > { %v2015_v24 = vpop.f32.mrf.mxu0 }
 0x62b   : > { %v4530_v53 = vpop.f32.mrf.mxu0 }
 0x62d   : > { %v2018_v17 = vpop.f32.mrf.mxu0  ;;  %v2084_v28 = vpop.f32.mrf.mxu1 }
 0x62e   : > { %v2022_v16 = vpack.c.bf16 %v2018_v17, %v2015_v24 }
 0x62f   : > { %v4531_v19 = vpop.f32.mrf.mxu0  ;;  %v4536_v44 = vpop.f32.mrf.mxu1 }
 0x630   : > { %2611 = vrot.lane.b32.xlu0 %v2022_v16, %s5116_s21  ;;  %2303 = vrot.lane.b32.xlu1 %v2022_v16, %s5117_s15 }
 0x631   : > { %v2087_v31 = vpop.f32.mrf.mxu1 }
 0x632   : > { %v2091_v56 = vpack.c.bf16 %v2087_v31, %v2084_v28 }
 0x633   : > { %v4537_v7 = vpop.f32.mrf.mxu1 }
 0x634   : > { %2458 = vrot.lane.b32.xlu1 %v2022_v16, %s5118_s16  ;;  %4545 = vmatpush3.bf16.msra.mxu1 %v2091_v56 }
 0x635   : > { %4556 = vmatprep.subr.bf16.mxu1 %v5114_v12 }
 0x638   : > { %2323 = vrot.lane.b32.xlu1 %v2091_v56, %s5117_s15 }
 0x63c   : > { %2477 = vrot.lane.b32.xlu1 %v2091_v56, %s5118_s16 }
 0x640   : > { %2630 = vrot.lane.b32.xlu1 %v2091_v56, %s5116_s21 }
 0x64e   : > { %2161 = vxpose.xlu0.c.b16.start.end [1/1] (short) (narrow) %v2022_v16, 16 }
 0x6a2   : > { %v2304_v26 = vpop.permute.xlu1 %2303  ;;  %v2612_v32 = vpop.permute.xlu0 %2611 }
 0x6a3   : > { %2306 = vxpose.xlu1.c.b16.start.end [1/1] (short) (narrow) %v2304_v26, 16 }
 0x6a6   : > { %v2459_v18 = vpop.permute.xlu1 %2458 }
 0x6a7   : > { %2461 = vxpose.xlu0.c.b16.start.end [1/1] (short) (narrow) %v2459_v18, 16  ;;  %3048 = vrot.lane.b32.xlu1 %v5249_v34, %s5117_s15 }
 0x6aa   : > { %v2324_v54 = vpop.permute.xlu1 %2323 }
 0x6ab   : > { %2614 = vxpose.xlu0.c.b16.start.end [1/1] (short) (narrow) %v2612_v32, 16  ;;  %3052 = vrot.lane.b32.xlu1 %v5251_v35, %s5117_s15 }
 0x6ae   : > { %v2478_v8 = vpop.permute.xlu1 %2477 }
 0x6af   : > { %2100 = vxpose.xlu0.c.b16.start.end [1/1] (short) (narrow) %v4893_v14, 16  ;;  %3324 = vrot.lane.b32.xlu1 %v5249_v34, %s5118_s16 }
 0x6b0   : > { %v2169_v20 = vpop.trf.xlu0 }
 0x6b1   : > { %4547 = vmatmul.mubr.msk.bf16.vlgmr.msra.gmra.mxu1 %vm1977_vm13, %v2169_v20 }
 0x6b2   : > { %4557 = vmatpush3.bf16.msra.mxu1 %v2324_v54  ;;  %4558 = vmatprep.mubr.msk.bf16.mxu1 %vm5115_vm12, %v5114_v12  ;;  %v2631_v5 = vpop.permute.xlu1 %2630 }
 0x6b3   : > { %4568 = vmatprep.subr.bf16.mxu1 %v5114_v12  ;;  %3328 = vrot.lane.b32.xlu1 %v5251_v35, %s5118_s16 }
 0x6b7   : > { %3330 = vrot.lane.b32.xlu1 %v6717_v22, %s5118_s16 }
 0x6b8   : > { %3050 = vrot.lane.b32.xlu0 %v6718_v10, %s5117_s15 }
 0x6bc   : > { %3054 = vrot.lane.b32.xlu0 %v6717_v22, %s5117_s15 }
 0x6c0   : > { %3326 = vrot.lane.b32.xlu0 %v6718_v10, %s5118_s16 }
 0x705   : > { %v2314_v33 = vpop.trf.xlu1 }
 0x706   : > { %4559 = vmatmul.mubr.msk.bf16.vlgmr.msra.gmra.mxu1 %vm1977_vm13, %v2314_v33 }
 0x707   : > { %4569 = vmatpush3.bf16.msra.mxu1 %v2478_v8  ;;  %4570 = vmatprep.mubr.msk.bf16.mxu1 %vm5115_vm12, %v5114_v12 }
 0x708   : > { %4580 = vmatprep.subr.bf16.mxu1 %v5114_v12 }
 0x709   : > { %v2469_v1 = vpop.trf.xlu0 }
 0x70d   : > { %v2622_v38 = vpop.trf.xlu0 }
 0x70e   : > { %4571 = vmatmul.mubr.msk.bf16.vlgmr.msra.gmra.mxu1 %vm1977_vm13, %v2469_v1 }
 0x70f   : > { %4581 = vmatpush3.bf16.msra.mxu1 %v2631_v5  ;;  %4582 = vmatprep.mubr.msk.bf16.mxu1 %vm5115_vm12, %v5114_v12 }
 0x710   : > { %4592 = vmatprep.subr.bf16.mxu1 %v4894_v9 }
 0x711   : > { %v2108_v3 = vpop.trf.xlu0 }
 0x712   : > { %4541 = vmatmul.mubr.msk.bf16.vlgmr.msra.gmra.mxu0 %vm1977_vm13, %v2108_v3 }
 0x713   : > { %4552 = vmatprep.mubr.msk.bf16.mxu0 %vm5115_vm12, %v5114_v12 }
 0x716   : > { %4583 = vmatmul.mubr.msk.bf16.vlgmr.msra.gmra.mxu1 %vm1977_vm13, %v2622_v38 }
 0x717   : > { %4594 = vmatprep.mubr.msk.bf16.mxu1 %vm1977_vm13, %v5249_v34  ;;  %4593 = vmatpush3.bf16.msra.mxu1 %v4894_v9 }
 0x718   : > { %4612 = vmatprep.subr.bf16.mxu1 %v4895_v50 }
 0x719   : > { %v3049_v40 = vpop.permute.xlu1 %3048 }
 0x71d   : > { %v3053_v13 = vpop.permute.xlu1 %3052 }
 0x71e   : > { %4595 = vmatmul.mubr.msk.bf16.vlgmr.msra.gmra.mxu1 %vm1977_vm13, %v6718_v10 }
 0x71f   : > { %4598 = vmatprep.mubr.msk.bf16.mxu1 %vm1977_vm13, %v5251_v35  ;;  %4613 = vmatpush3.bf16.msra.mxu1 %v4895_v50 }
 0x720   : > { %4632 = vmatprep.subr.bf16.mxu1 %v4896_v57 }
 0x721   : > { %v3325_v39 = vpop.permute.xlu1 %3324 }
 0x725   : > { %v3329_v48 = vpop.permute.xlu1 %3328 }
 0x726   : > { %4599 = vmatmul.mubr.msk.bf16.gmra.mxu1 %vm1977_vm13, %v6717_v22 }
 0x727   : > { %4614 = vmatprep.mubr.msk.bf16.mxu1 %vm1977_vm13, %v3049_v40 }
 0x729   : > { %v3331_v36 = vpop.permute.xlu1 %3330 }
 0x72a   : > { %v3051_v60 = vpop.permute.xlu0 %3050 }
 0x72e   : > { %4615 = vmatmul.mubr.msk.bf16.vlgmr.msra.gmra.mxu1 %vm1977_vm13, %v3051_v60  ;;  %v3055_v62 = vpop.permute.xlu0 %3054 }
 0x72f   : > { %4618 = vmatprep.mubr.msk.bf16.mxu1 %vm1977_vm13, %v3053_v13  ;;  %4633 = vmatpush3.bf16.msra.mxu1 %v4896_v57 }
 0x732   : > { %v3327_v0 = vpop.permute.xlu0 %3326 }
 0x736   : > { %4619 = vmatmul.mubr.msk.bf16.gmra.mxu1 %vm1977_vm13, %v3055_v62 }
 0x737   : > { %4634 = vmatprep.mubr.msk.bf16.mxu1 %vm1977_vm13, %v3325_v39 }
 0x73e   : > { %4635 = vmatmul.mubr.msk.bf16.vlgmr.msra.gmra.mxu1 %vm1977_vm13, %v3327_v0 }
 0x73f   : > { %4638 = vmatprep.mubr.msk.bf16.mxu1 %vm1977_vm13, %v3329_v48 }
 0x746   : > { %4639 = vmatmul.mubr.msk.bf16.gmra.mxu1 %vm1977_vm13, %v3331_v36 }
 0x771   : > { %v2214_v61 = vpop.f32.mrf.mxu1 }
 0x772   : > { %v2221_v21 = vsel %vm1977_vm13, %v2214_v61, -inf }
 0x773   : > { %v4548_v25 = vpop.f32.mrf.mxu1  ;;  %2222 = vmax.xlane.f32.xlu1 %v2221_v21 }
 0x775   : > { %v2217_v15 = vpop.f32.mrf.mxu1 }
 0x776   : > { %v2224_v45 = vsel %vm1977_vm13, %v2217_v15, -inf }
 0x777   : > { %2225 = vmax.xlane.f32.xlu0 %v2224_v45  ;;  %v4549_v49 = vpop.f32.mrf.mxu1  ;;  %v4897_v45 = vld [vmem:[%s6697_s5 + $0x18] sm:$0xff]  }
 0x778   : > { %4652 = vmatprep.subr.bf16.mxu1 %v4897_v45 }
 0x779   : > { %4653 = vmatpush3.bf16.msra.mxu1 %v4897_v45 }
 0x7c6   : > { %v2363_v6 = vpop.f32.mrf.mxu1 }
 0x7c7   : > { %v2370_v55 = vsel %vm1977_vm13, %v2363_v6, -inf }
 0x7c8   : > { %2371 = vmax.xlane.f32.xlu1 %v2370_v55  ;;  %v4560_v4 = vpop.f32.mrf.mxu1 }
 0x7ca   : > { %v2366_v42 = vpop.f32.mrf.mxu1 }
 0x7cb   : > { %v2373_v2 = vsel %vm1977_vm13, %v2366_v42, -inf }
 0x7cc   : > { %2374 = vmax.xlane.f32.xlu0 %v2373_v2  ;;  %v4561_v23 = vpop.f32.mrf.mxu1 }
 0x7ce   : > { %v5988_v58 = vpop.f32.mrf.mxu1 }
 0x7cf   : > { %v2524_v29 = vsel %vm1977_vm13, %v5988_v58, -inf }
 0x7d0   : > { %2525 = vmax.xlane.f32.xlu1 %v2524_v29  ;;  %v4572_v27 = vpop.f32.mrf.mxu1 }
 0x7d2   : > { %v2520_v11 = vpop.f32.mrf.mxu1  ;;  %v2153_v47 = vpop.f32.mrf.mxu0 }
 0x7d3   : > { %v2527_v63 = vsel %vm1977_vm13, %v2520_v11, -inf }
 0x7d4   : > { %2528 = vmax.xlane.f32.xlu0 %v2527_v63  ;;  %v4573_v30 = vpop.f32.mrf.mxu1  ;;  %v4542_v59 = vpop.f32.mrf.mxu0 }
 0x7d6   : > { %v2670_v37 = vpop.f32.mrf.mxu1  ;;  %v2156_v51 = vpop.f32.mrf.mxu0 }
 0x7d7   : > { %v2677_v43 = vsel %vm1977_vm13, %v2670_v37, -inf  ;;  %v5995_v16 = vpack.c.bf16 %v2156_v51, %v2153_v47 }
 0x7d8   : > { %2678 = vmax.xlane.f32.xlu1 %v2677_v43  ;;  %v4584_v52 = vpop.f32.mrf.mxu1  ;;  %v4543_v24 = vpop.f32.mrf.mxu0 }
 0x7da   : > { %v2673_v53 = vpop.f32.mrf.mxu1 }
 0x7db   : > { %v2680_v17 = vsel %vm1977_vm13, %v2673_v53, -inf }
 0x7dc   : > { %2681 = vmax.xlane.f32.xlu0 %v2680_v17  ;;  %v4585_v28 = vpop.f32.mrf.mxu1 }
 0x7e9   : > { %2394 = vrot.lane.b32.xlu1 %v5995_v16, %s5117_s15 }
 0x7f2   : > { %3600 = vrot.lane.b32.xlu0 %v5249_v34, %s5116_s21 }
 0x7fc   : > { %v2223_v19 = vpop.xlane.xlu1 %2222 }
 0x7fd   : > { %v2227_v44 = vsub.f32 %v2214_v61, %v2223_v19 }
 0x7ff   : > { %v2229_v31 = vmul.f32 1.442695, %v2227_v44 }
 0x800   : > { %v2226_v56 = vpop.xlane.xlu0 %2225 }
 0x801   : > { %4905 = vpow2.f32 %v2229_v31  ;;  %v2228_v7 = vsub.f32 %v2217_v15, %v2226_v56 }
 0x803   : > { %v2231_v26 = vmul.f32 1.442695, %v2228_v7 }
 0x805   : > { %4907 = vpow2.f32 %v2231_v26 }
 0x80e   : > { %v6001_v18 = vpop.eup %4905 }
 0x80f   : > { %v2233_v32 = vsel %vm1977_vm13, %v6001_v18, 0.0 }
 0x810   : > { %2234 = vadd.xlane.f32.xlu1 %v2233_v32 }
 0x812   : > { %v6005_v14 = vpop.eup %4907 }
 0x813   : > { %v2236_v20 = vsel %vm1977_vm13, %v6005_v14, 0.0 }
 0x814   : > { %2237 = vadd.xlane.f32.xlu0 %v2236_v20 }
 0x851   : > { %v2372_v34 = vpop.xlane.xlu1 %2371 }
 0x852   : > { %v2376_v54 = vsub.f32 %v2363_v6, %v2372_v34 }
 0x854   : > { %v2378_v8 = vmul.f32 1.442695, %v2376_v54 }
 0x855   : > { %v2375_v5 = vpop.xlane.xlu0 %2374 }
 0x856   : > { %4909 = vpow2.f32 %v2378_v8  ;;  %v2377_v33 = vsub.f32 %v2366_v42, %v2375_v5  ;;  %v3042_v8 = vsub.s32 1, %v5899_v46 }
 0x858   : > { %v2380_v1 = vmul.f32 1.442695, %v2377_v33 }
 0x859   : > { %v2526_v13 = vpop.xlane.xlu1 %2525 }
 0x85a   : > { %4911 = vpow2.f32 %v2380_v1  ;;  %v2530_v62 = vsub.f32 %v5988_v58, %v2526_v13 }
 0x85c   : > { %v2532_v57 = vmul.f32 1.442695, %v2530_v62 }
 0x85d   : > { %v2529_v38 = vpop.xlane.xlu0 %2528 }
 0x85e   : > { %v2531_v3 = vsub.f32 %v2520_v11, %v2529_v38 }
 0x860   : > { %v2534_v9 = vmul.f32 1.442695, %v2531_v3 }
 0x861   : > { %v2679_v39 = vpop.xlane.xlu1 %2678 }
 0x862   : > { %4913 = vpow2.f32 %v2534_v9  ;;  %v2683_v0 = vsub.f32 %v2670_v37, %v2679_v39 }
 0x863   : > { %v6009_v40 = vpop.eup %4909  ;;  %4915 = vpow2.f32 %v2532_v57 }
 0x864   : > { %v2382_v61 = vsel %vm1977_vm13, %v6009_v40, 0.0  ;;  %v2685_v48 = vmul.f32 1.442695, %v2683_v0 }
 0x865   : > { %v2682_v21 = vpop.xlane.xlu0 %2681  ;;  %2383 = vadd.xlane.f32.xlu1 %v2382_v61  ;;  %v6030_v55 = vpop.permute.xlu1 %2394 }
 0x866   : > { %4917 = vpow2.f32 %v2685_v48  ;;  %v2684_v36 = vsub.f32 %v2673_v53, %v2682_v21 }
 0x867   : > { %v6013_v50 = vpop.eup %4911 }
 0x868   : > { %v2385_v25 = vsel %vm1977_vm13, %v6013_v50, 0.0  ;;  %v2687_v6 = vmul.f32 1.442695, %v2684_v36 }
 0x869   : > { %2386 = vadd.xlane.f32.xlu0 %v2385_v25  ;;  %v3601_v15 = vpop.permute.xlu0 %3600 }
 0x86a   : > { %4654 = vmatprep.mubr.msk.bf16.mxu1 %vm1977_vm13, %v3601_v15  ;;  %4919 = vpow2.f32 %v2687_v6 }
 0x86f   : > { %v6021_v49 = vpop.eup %4913 }
 0x870   : > { %v2539_v60 = vsel %vm1977_vm13, %v6021_v49, 0.0  ;;  %v6032_v4 = vpop.eup %4915 }
 0x871   : > { %2540 = vadd.xlane.f32.xlu0 %v2539_v60  ;;  %v2536_v2 = vsel %vm1977_vm13, %v6032_v4, 0.0 }
 0x873   : > { %v6036_v23 = vpop.eup %4917 }
 0x874   : > { %v2689_v27 = vsel %vm1977_vm13, %v6036_v23, 0.0 }
 0x876   : > { %3602 = vrot.lane.b32.xlu1 %v6718_v10, %s5116_s21  ;;  %v4596_v10 = vpop.f32.mrf.mxu1 }
 0x877   : > { %v6040_v47 = vpop.eup %4919 }
 0x878   : > { %v2825_v58 = vpop.f32.mrf.mxu1  ;;  %v2692_v30 = vsel %vm1977_vm13, %v6040_v47, 0.0 }
 0x87a   : > { %v4597_v11 = vpop.f32.mrf.mxu1 }
 0x87c   : > { %v2828_v63 = vpop.f32.mrf.mxu1 }
 0x87e   : > { %v4600_v59 = vpop.f32.mrf.mxu1 }
 0x880   : > { %v2841_v43 = vpop.f32.mrf.mxu1 }
 0x882   : > { %v4601_v17 = vpop.f32.mrf.mxu1 }
 0x884   : > { %v2844_v19 = vpop.f32.mrf.mxu1 }
 0x886   : > { %v4616_v44 = vpop.f32.mrf.mxu1 }
 0x887   : > { %2547 = vrot.lane.b32.xlu0 %v5995_v16, %s5118_s16 }
 0x888   : > { %v3108_v31 = vpop.f32.mrf.mxu1 }
 0x899   : > { %v2235_v42 = vpop.xlane.xlu1 %2234 }
 0x89a   : > { %2537 = vadd.xlane.f32.xlu1 %v2536_v2  ;;  %4921 = vrcp.f32 %v2235_v42  ;;  %v3322_v42 = vsub.s32 2, %v5899_v46 }
 0x89d   : > { %v2238_v29 = vpop.xlane.xlu0 %2237 }
 0x89e   : > { %4923 = vrcp.f32 %v2238_v29  ;;  %2690 = vadd.xlane.f32.xlu1 %v2689_v27 }
 0x8a6   : > { %2693 = vadd.xlane.f32.xlu0 %v2692_v30 }
 0x8a7   : > { %v4922_v37 = vpop.eup %4921 }
 0x8a8   : > { %v2241_v52 = vmul.f32 %v4922_v37, %v6001_v18  ;;  %v6719_v18 = vld [vmem:[#allocation5_spill] sm:$0xff] }
 0x8a9   : > { %v2771_v32 = vrot.slane %v6719_v18, %v1946_v41  ;;  %v3043_v3 = vrot.slane %v6719_v18, %v3042_v8 }
 0x8ab   : > { %v4924_v51 = vpop.eup %4923  ;;  %v6063_v20 = vadd.f32 %v2828_v63, %v2771_v32  ;;  %v6065_v34 = vadd.f32 %v2825_v58, %v2771_v32  ;;  %v6067_v54 = vadd.f32 %v2844_v19, %v2771_v32  ;;  %v6074_v33 = vadd.f32 %v4596_v10, %v2771_v32 }
 0x8ac   : > { %v2242_v24 = vmul.f32 %v4924_v51, %v6005_v14  ;;  %v6076_v1 = vadd.f32 %v4601_v17, %v2771_v32  ;;  %v6083_v61 = vadd.f32 %v4597_v11, %v2771_v32  ;;  %v6091_v60 = vadd.f32 %v2841_v43, %v2771_v32 }
 0x8ad   : > { %v2856_v41 = vsel %vm1977_vm13, %v6065_v34, -inf  ;;  %v2871_v38 = vsel %vm1977_vm13, %v6067_v54, -inf  ;;  %v2862_v21 = vsel %vm1977_vm13, %v6074_v33, -inf  ;;  %v6099_v0 = vadd.f32 %v4600_v59, %v2771_v32 }
 0x8ae   : > { %v2243_v53 = vpack.c.bf16 %v2242_v24, %v2241_v52  ;;  %v2877_v25 = vsel %vm1977_vm13, %v6076_v1, -inf  ;;  %v2865_v13 = vsel %vm1977_vm13, %v6083_v61, -inf  ;;  %v2868_v48 = vsel %vm1977_vm13, %v6091_v60, -inf }
 0x8af   : > { %3604 = vrot.lane.b32.xlu1 %v5251_v35, %s5116_s21  ;;  %v4617_v35 = vpop.f32.mrf.mxu1  ;;  %v2874_v2 = vsel %vm1977_vm13, %v6099_v0, -inf  ;;  %v6110_v58 = vadd.f32 %v3108_v31, %v3043_v3  ;;  %v3323_v63 = vrot.slane %v6719_v18, %v3322_v42  ;;  %v6117_v30 = vadd.f32 %v4616_v44, %v3043_v3 }
 0x8b0   : > { %v2248_v28 = vsel %vm1977_vm13, %v2243_v53, 0  ;;  %v6095_v62 = vadd.f32 %v4617_v35, %v3043_v3 }
 0x8b1   : > { %4551 = vmatpush3.bf16.xpose.msra.mxu0 %v2248_v28  ;;  %v3111_v56 = vpop.f32.mrf.mxu1  ;;  %v3139_v51 = vsel %vm1977_vm13, %v6110_v58, -inf  ;;  %v3145_v19 = vsel %vm1977_vm13, %v6117_v30, -inf }
 0x8b2   : > { %4562 = vmatprep.subr.bf16.mxu0 %v5114_v12  ;;  %v6089_v15 = vadd.f32 %v3111_v56, %v3043_v3  ;;  %v3148_v6 = vsel %vm1977_vm13, %v6095_v62, -inf }
 0x8b3   : > { %2700 = vrot.lane.b32.xlu1 %v5995_v16, %s5116_s21  ;;  %v6058_v7 = vpop.f32.mrf.mxu1 }
 0x8b4   : > { %v3142_v39 = vsel %vm1977_vm13, %v6089_v15, -inf  ;;  %v6135_v35 = vadd.f32 %v6058_v7, %v3043_v3 }
 0x8b5   : > { %v3124_v26 = vpop.f32.mrf.mxu1 }
 0x8b6   : > { %v6125_v24 = vadd.f32 %v3124_v26, %v3043_v3 }
 0x8b7   : > { %v4621_v14 = vpop.f32.mrf.mxu1 }
 0x8b8   : > { %4553 = vmatmul.mubr.msk.bf16.vlgmr.msra.gmra.mxu0 %vm1977_vm13, %v5995_v16  ;;  %v6112_v29 = vadd.f32 %v4621_v14, %v3043_v3  ;;  %v3151_v26 = vsel %vm1977_vm13, %v6125_v24, -inf }
 0x8b9   : > { %4564 = vmatprep.mubr.msk.bf16.mxu0 %vm5115_vm12, %v5114_v12  ;;  %v3127_v16 = vpop.f32.mrf.mxu1 }
 0x8ba   : > { %v6103_v36 = vadd.f32 %v3127_v16, %v3043_v3  ;;  %v3160_v43 = vsel %vm1977_vm13, %v6112_v29, -inf }
 0x8bb   : > { %v6072_v5 = vpop.f32.mrf.mxu1 }
 0x8bc   : > { %3606 = vrot.lane.b32.xlu0 %v6717_v22, %s5116_s21  ;;  %v2859_v22 = vsel %vm1977_vm13, %v6063_v20, -inf  ;;  %v3154_v27 = vsel %vm1977_vm13, %v6103_v36, -inf }
 0x8bd   : > { %v3384_v9 = vpop.f32.mrf.mxu1 }
 0x8be   : > { %v6143_v14 = vadd.f32 %v3384_v9, %v3323_v63 }
 0x8bf   : > { %v4637_v45 = vpop.f32.mrf.mxu1 }
 0x8c0   : > { %v6127_v53 = vadd.f32 %v4637_v45, %v3323_v63 }
 0x8c1   : > { %v3387_v57 = vpop.f32.mrf.mxu1 }
 0x8c2   : > { %v6119_v59 = vadd.f32 %v3387_v57, %v3323_v63  ;;  %v3424_v32 = vsel %vm1977_vm13, %v6127_v53, -inf }
 0x8c3   : > { %v4640_v10 = vpop.f32.mrf.mxu1 }
 0x8c4   : > { %v3418_v44 = vsel %vm1977_vm13, %v6119_v59, -inf  ;;  %v6165_v57 = vadd.f32 %v4640_v10, %v3323_v63 }
 0x8c5   : > { %v3400_v11 = vpop.f32.mrf.mxu1 }
 0x8c6   : > { %v6160_v45 = vadd.f32 %v3400_v11, %v3323_v63 }
 0x8c7   : > { %v4641_v52 = vpop.f32.mrf.mxu1 }
 0x8c8   : > { %v6145_v16 = vadd.f32 %v4641_v52, %v3323_v63 }
 0x8c9   : > { %v3403_v31 = vpop.f32.mrf.mxu1 }
 0x8ca   : > { %v6137_v56 = vadd.f32 %v3403_v31, %v3323_v63  ;;  %v3436_v3 = vsel %vm1977_vm13, %v6145_v16, -inf }
 0x8cc   : > { %v3430_v7 = vsel %vm1977_vm13, %v6137_v56, -inf }
 0x8d7   : > { %2860 = vmax.xlane.f32.xlu1 %v2859_v22  ;;  %v3157_v22 = vsel %vm1977_vm13, %v6135_v35, -inf }
 0x8db   : > { %2857 = vmax.xlane.f32.xlu0 %v2856_v41  ;;  %2872 = vmax.xlane.f32.xlu1 %v2871_v38  ;;  %v6152_v41 = vadd.f32 %v6072_v5, %v3323_v63  ;;  %v3415_v38 = vsel %vm1977_vm13, %v6143_v14, -inf }
 0x8df   : > { %2863 = vmax.xlane.f32.xlu0 %v2862_v21  ;;  %2878 = vmax.xlane.f32.xlu1 %v2877_v25 }
 0x8e3   : > { %2866 = vmax.xlane.f32.xlu0 %v2865_v13  ;;  %3143 = vmax.xlane.f32.xlu1 %v3142_v39  ;;  %v3421_v13 = vsel %vm1977_vm13, %v6152_v41, -inf }
 0x8e7   : > { %2869 = vmax.xlane.f32.xlu0 %v2868_v48  ;;  %3149 = vmax.xlane.f32.xlu1 %v3148_v6  ;;  %v3427_v48 = vsel %vm1977_vm13, %v6160_v45, -inf }
 0x8eb   : > { %2875 = vmax.xlane.f32.xlu0 %v2874_v2  ;;  %3155 = vmax.xlane.f32.xlu1 %v3154_v27 }
 0x8ee   : > { %v2384_v37 = vpop.xlane.xlu1 %2383 }
 0x8ef   : > { %3140 = vmax.xlane.f32.xlu0 %v3139_v51  ;;  %3161 = vmax.xlane.f32.xlu1 %v3160_v43  ;;  %4925 = vrcp.f32 %v2384_v37 }
 0x8f2   : > { %v2387_v17 = vpop.xlane.xlu0 %2386  ;;  %v3603_v28 = vpop.permute.xlu1 %3602 }
 0x8f3   : > { %4927 = vrcp.f32 %v2387_v17  ;;  %3146 = vmax.xlane.f32.xlu0 %v3145_v19  ;;  %3419 = vmax.xlane.f32.xlu1 %v3418_v44 }
 0x8f4   : > { %4655 = vmatmul.mubr.msk.bf16.vlgmr.msra.gmra.mxu1 %vm1977_vm13, %v3603_v28 }
 0x8f7   : > { %3152 = vmax.xlane.f32.xlu0 %v3151_v26  ;;  %3425 = vmax.xlane.f32.xlu1 %v3424_v32 }
 0x8fb   : > { %3158 = vmax.xlane.f32.xlu0 %v3157_v22  ;;  %3431 = vmax.xlane.f32.xlu1 %v3430_v7 }
 0x8fc   : > { %v4926_v8 = vpop.eup %4925 }
 0x8fd   : > { %v2390_v21 = vmul.f32 %v4926_v8, %v6009_v40  ;;  %v3433_v40 = vsel %vm1977_vm13, %v6165_v57, -inf }
 0x8ff   : > { %3416 = vmax.xlane.f32.xlu0 %v3415_v38  ;;  %3437 = vmax.xlane.f32.xlu1 %v3436_v3 }
 0x900   : > { %v4928_v9 = vpop.eup %4927 }
 0x901   : > { %v2391_v25 = vmul.f32 %v4928_v9, %v6013_v50  ;;  %v2541_v50 = vpop.xlane.xlu0 %2540 }
 0x902   : > { %4929 = vrcp.f32 %v2541_v50 }
 0x903   : > { %3422 = vmax.xlane.f32.xlu0 %v3421_v13  ;;  %v2392_v5 = vpack.c.bf16 %v2391_v25, %v2390_v21 }
 0x905   : > { %v2400_v39 = vsel %vm1977_vm13, %v2392_v5, 0  ;;  %v2548_v42 = vpop.permute.xlu0 %2547 }
 0x906   : > { %4563 = vmatpush3.bf16.xpose.msra.mxu0 %v2400_v39 }
 0x907   : > { %3428 = vmax.xlane.f32.xlu0 %v3427_v48  ;;  %4574 = vmatprep.subr.bf16.mxu0 %v5114_v12 }
 0x90b   : > { %3434 = vmax.xlane.f32.xlu0 %v3433_v40 }
 0x90d   : > { %4565 = vmatmul.mubr.msk.bf16.vlgmr.msra.gmra.mxu0 %vm1977_vm13, %v6030_v55 }
 0x90e   : > { %4576 = vmatprep.mubr.msk.bf16.mxu0 %vm5115_vm12, %v5114_v12 }
 0x90f   : > { %v4930_v27 = vpop.eup %4929 }
 0x910   : > { %v2545_v55 = vmul.f32 %v4930_v27, %v6021_v49 }
 0x923   : > { %v2538_v6 = vpop.xlane.xlu1 %2537 }
 0x924   : > { %4931 = vrcp.f32 %v2538_v6 }
 0x927   : > { %v2691_v10 = vpop.xlane.xlu1 %2690 }
 0x928   : > { %4933 = vrcp.f32 %v2691_v10 }
 0x92b   : > { %v3605_v2 = vpop.permute.xlu1 %3604 }
 0x92c   : > { %4658 = vmatprep.mubr.msk.bf16.mxu1 %vm1977_vm13, %v3605_v2 }
 0x92f   : > { %v2694_v11 = vpop.xlane.xlu0 %2693  ;;  %v2701_v31 = vpop.permute.xlu1 %2700 }
 0x930   : > { %4935 = vrcp.f32 %v2694_v11 }
 0x931   : > { %v4932_v63 = vpop.eup %4931 }
 0x932   : > { %v2544_v37 = vmul.f32 %v4932_v63, %v6032_v4 }
 0x933   : > { %v3607_v51 = vpop.permute.xlu0 %3606 }
 0x934   : > { %4659 = vmatmul.mubr.msk.bf16.gmra.mxu1 %vm1977_vm13, %v3607_v51  ;;  %v2546_v43 = vpack.c.bf16 %v2545_v55, %v2544_v37 }
 0x935   : > { %v4934_v17 = vpop.eup %4933 }
 0x936   : > { %v2553_v52 = vsel %vm1977_vm13, %v2546_v43, 0  ;;  %v2697_v19 = vmul.f32 %v4934_v17, %v6036_v23 }
 0x937   : > { %4575 = vmatpush3.bf16.xpose.msra.mxu0 %v2553_v52 }
 0x938   : > { %4586 = vmatprep.subr.bf16.mxu0 %v5114_v12 }
 0x93d   : > { %v4936_v28 = vpop.eup %4935 }
 0x93e   : > { %4577 = vmatmul.mubr.msk.bf16.vlgmr.msra.gmra.mxu0 %vm1977_vm13, %v2548_v42  ;;  %v2698_v44 = vmul.f32 %v4936_v28, %v6040_v47  ;;  %v3598_v47 = vsub.s32 3, %v5899_v46 }
 0x93f   : > { %4588 = vmatprep.mubr.msk.bf16.mxu0 %vm5115_vm12, %v5114_v12 }
 0x940   : > { %v2699_v49 = vpack.c.bf16 %v2698_v44, %v2697_v19  ;;  %v6191_v12 = vrot.slane %v6719_v18, %v3598_v47 }
 0x942   : > { %v2706_v4 = vsel %vm1977_vm13, %v2699_v49, 0 }
 0x943   : > { %4587 = vmatpush3.bf16.xpose.msra.mxu0 %v2706_v4 }
 0x94a   : > { %4589 = vmatmul.mubr.msk.bf16.vlgmr.msra.gmra.mxu0 %vm1977_vm13, %v2701_v31 }
 0x960   : > { %v2861_v11 = vpop.xlane.xlu1 %2860 }
 0x961   : > { %v2881_v19 = vsub.f32 %v6063_v20, %v2861_v11 }
 0x963   : > { %v2890_v31 = vmul.f32 1.442695, %v2881_v19 }
 0x964   : > { %v2858_v50 = vpop.xlane.xlu0 %2857  ;;  %v2873_v37 = vpop.xlane.xlu1 %2872 }
 0x965   : > { %v2880_v44 = vsub.f32 %v6065_v34, %v2858_v50 }
 0x968   : > { %v2864_v2 = vpop.xlane.xlu0 %2863  ;;  %v2879_v51 = vpop.xlane.xlu1 %2878 }
 0x969   : > { %v2882_v17 = vsub.f32 %v6074_v33, %v2864_v2 }
 0x96b   : > { %v2892_v49 = vmul.f32 1.442695, %v2882_v17 }
 0x96c   : > { %v2867_v63 = vpop.xlane.xlu0 %2866  ;;  %v3144_v52 = vpop.xlane.xlu1 %3143 }
 0x96d   : > { %4937 = vpow2.f32 %v2892_v49 }
 0x96e   : > { %4939 = vpow2.f32 %v2890_v31 }
 0x970   : > { %v2870_v55 = vpop.xlane.xlu0 %2869  ;;  %v3150_v4 = vpop.xlane.xlu1 %3149 }
 0x974   : > { %v2876_v43 = vpop.xlane.xlu0 %2875  ;;  %v6226_v47 = vpop.xlane.xlu1 %3155 }
 0x978   : > { %v2284_v26 = vpop.f32.mrf.mxu0  ;;  %v6218_v28 = vpop.xlane.xlu0 %3140 }
 0x979   : > { %v4284_v32 = vpack.c.bf16 %v2284_v26, %v2284_v26  ;;  %v2887_v26 = vsub.f32 %v6076_v1, %v2879_v51 }
 0x97a   : > { %v4554_v22 = vpop.f32.mrf.mxu0 }
 0x97b   : > { %2300 = vst.msk [vmem:[#allocation4] sm:$0xf] %vm2299_vm14, %v4284_v32  ;;  %v2888_v22 = vmul.f32 1.442695, %v2880_v44  ;;  %v2902_v33 = vmul.f32 1.442695, %v2887_v26 }
 0x97c   : > { %v2287_v7 = vpop.f32.mrf.mxu0  ;;  %v3147_v32 = vpop.xlane.xlu0 %3146 }
 0x97d   : > { %v4285_v8 = vpack.c.bf16 %v2287_v7, %v2287_v7  ;;  %v2883_v7 = vsub.f32 %v6083_v61, %v2867_v63  ;;  %4941 = vpow2.f32 %v2888_v22 }
 0x97e   : > { %v4555_v23 = vpop.f32.mrf.mxu0  ;;  %4943 = vpow2.f32 %v2902_v33 }
 0x97f   : > { %2301 = vst.msk [vmem:[#allocation4 + $0x4] sm:$0xf] %vm2299_vm14, %v4285_v8  ;;  %v2885_v8 = vsub.f32 %v6067_v54, %v2873_v37  ;;  %v2886_v23 = vsub.f32 %v6099_v0, %v2876_v43  ;;  %v2894_v34 = vmul.f32 1.442695, %v2883_v7  ;;  %v3166_v54 = vsub.f32 %v6095_v62, %v3150_v4 }
 0x981   : > { %v2898_v1 = vmul.f32 1.442695, %v2885_v8  ;;  %v2900_v61 = vmul.f32 1.442695, %v2886_v23  ;;  %4945 = vpow2.f32 %v2894_v34  ;;  %v3177_v62 = vmul.f32 1.442695, %v3166_v54 }
 0x983   : > { %4947 = vpow2.f32 %v2898_v1 }
 0x984   : > { %4949 = vpow2.f32 %v2900_v61 }
 0x9b4   : > { %v4656_v38 = vpop.f32.mrf.mxu1 }
 0x9b5   : > { %v6197_v25 = vadd.f32 %v4656_v38, %v6191_v12  ;;  %v6228_v38 = vpop.xlane.xlu0 %3152 }
 0x9b6   : > { %v3660_v3 = vpop.f32.mrf.mxu1  ;;  %v3167_v34 = vsub.f32 %v6125_v24, %v6228_v38 }
 0x9b7   : > { %v6194_v9 = vadd.f32 %v3660_v3, %v6191_v12  ;;  %v3697_v48 = vsel %vm1977_vm13, %v6197_v25, -inf }
 0x9b8   : > { %v4657_v21 = vpop.f32.mrf.mxu1  ;;  %v3179_v38 = vmul.f32 1.442695, %v3167_v34 }
 0x9b9   : > { %v3691_v13 = vsel %vm1977_vm13, %v6194_v9, -inf  ;;  %v6205_v46 = vadd.f32 %v4657_v21, %v6191_v12  ;;  %v2884_v21 = vsub.f32 %v6091_v60, %v2870_v55  ;;  %v3159_v2 = vpop.xlane.xlu0 %3158  ;;  %v6252_v55 = vpop.eup %4937 }
 0x9ba   : > { %v3663_v5 = vpop.f32.mrf.mxu1  ;;  %3692 = vmax.xlane.f32.xlu0 %v3691_v13  ;;  %v2910_v49 = vsel %vm1977_vm13, %v6252_v55, 0.0  ;;  %v3169_v8 = vsub.f32 %v6135_v35, %v3159_v2 }
 0x9bb   : > { %v6202_v39 = vadd.f32 %v3663_v5, %v6191_v12  ;;  %v3700_v40 = vsel %vm1977_vm13, %v6205_v46, -inf  ;;  %v2896_v60 = vmul.f32 1.442695, %v2884_v21 }
 0x9bc   : > { %v3183_v54 = vmul.f32 1.442695, %v3169_v8 }
 0x9bd   : > { %v3694_v18 = vsel %vm1977_vm13, %v6202_v39, -inf  ;;  %4951 = vpow2.f32 %v2896_v60  ;;  %v3417_v31 = vpop.xlane.xlu0 %3416 }
 0x9be   : > { %3695 = vmax.xlane.f32.xlu1 %v3694_v18  ;;  %3698 = vmax.xlane.f32.xlu0 %v3697_v48  ;;  %v3162_v48 = vpop.xlane.xlu1 %3161  ;;  %4953 = vpow2.f32 %v3177_v62 }
 0x9bf   : > { %v3170_v17 = vsub.f32 %v6112_v29, %v3162_v48 }
 0x9c1   : > { %v3185_v7 = vmul.f32 1.442695, %v3170_v17 }
 0x9c2   : > { %3701 = vmax.xlane.f32.xlu1 %v3700_v40 }
 0x9cd   : > { %v6213_v6 = vpop.f32.mrf.mxu0 }
 0x9cf   : > { %v4566_v10 = vpop.f32.mrf.mxu0 }
 0x9d0   : > { %v3164_v10 = vsub.f32 %v6089_v15, %v3144_v52  ;;  %v6258_v52 = vpop.eup %4939 }
 0x9d1   : > { %v6215_v42 = vpop.f32.mrf.mxu0  ;;  %v6265_v4 = vpop.eup %4941 }
 0x9d2   : > { %v3173_v15 = vmul.f32 1.442695, %v3164_v10  ;;  %v6273_v22 = vpop.eup %4943  ;;  %v2904_v33 = vsel %vm1977_vm13, %v6265_v4, 0.0 }
 0x9d3   : > { %v4567_v27 = vpop.f32.mrf.mxu0  ;;  %v6278_v23 = vpop.eup %4945  ;;  %v2925_v1 = vsel %vm1977_vm13, %v6273_v22, 0.0 }
 0x9d4   : > { %v3165_v27 = vsub.f32 %v6117_v30, %v3147_v32  ;;  %v3163_v30 = vsub.f32 %v6110_v58, %v6218_v28  ;;  %4955 = vpow2.f32 %v3173_v15  ;;  %v3168_v58 = vsub.f32 %v6103_v36, %v6226_v47  ;;  %v6280_v36 = vpop.eup %4947 }
 0x9d5   : > { %v2907_v32 = vsel %vm1977_vm13, %v6258_v52, 0.0  ;;  %v6286_v35 = vpop.eup %4949  ;;  %v2913_v61 = vsel %vm1977_vm13, %v6278_v23, 0.0 }
 0x9d6   : > { %v3175_v19 = vmul.f32 1.442695, %v3165_v27  ;;  %v3171_v28 = vmul.f32 1.442695, %v3163_v30  ;;  %v3181_v47 = vmul.f32 1.442695, %v3168_v58 }
 0x9d7   : > { %v2922_v62 = vsel %vm1977_vm13, %v6286_v35, 0.0 }
 0x9d8   : > { %4957 = vpow2.f32 %v3175_v19 }
 0x9d9   : > { %4959 = vpow2.f32 %v3171_v28 }
 0x9da   : > { %4961 = vpow2.f32 %v3185_v7 }
 0x9db   : > { %4963 = vpow2.f32 %v3181_v47 }
 0x9dc   : > { %4965 = vpow2.f32 %v3183_v54 }
 0x9dd   : > { %4967 = vpow2.f32 %v3179_v38 }
 0x9f4   : > { %v4660_v20 = vpop.f32.mrf.mxu1 }
 0x9f5   : > { %v6236_v0 = vadd.f32 %v4660_v20, %v6191_v12 }
 0x9f6   : > { %v3676_v3 = vpop.f32.mrf.mxu1 }
 0x9f7   : > { %v6232_v13 = vadd.f32 %v3676_v3, %v6191_v12  ;;  %v3709_v37 = vsel %vm1977_vm13, %v6236_v0, -inf  ;;  %v3423_v3 = vpop.xlane.xlu0 %3422 }
 0x9f8   : > { %v4661_v5 = vpop.f32.mrf.mxu1  ;;  %v3441_v10 = vsub.f32 %v6152_v41, %v3423_v3 }
 0x9f9   : > { %v3703_v18 = vsel %vm1977_vm13, %v6232_v13, -inf  ;;  %v6246_v11 = vadd.f32 %v4661_v5, %v6191_v12 }
 0x9fa   : > { %v3679_v40 = vpop.f32.mrf.mxu1  ;;  %3704 = vmax.xlane.f32.xlu0 %v3703_v18  ;;  %v6293_v18 = vpop.eup %4951  ;;  %v3451_v41 = vmul.f32 1.442695, %v3441_v10 }
 0x9fb   : > { %v6241_v50 = vadd.f32 %v3679_v40, %v6191_v12  ;;  %v3420_v12 = vpop.xlane.xlu1 %3419  ;;  %v3712_v44 = vsel %vm1977_vm13, %v6246_v11, -inf  ;;  %v2919_v40 = vsel %vm1977_vm13, %v6280_v36, 0.0  ;;  %v6298_v60 = vpop.eup %4953  ;;  %v2916_v15 = vsel %vm1977_vm13, %v6293_v18, 0.0 }
 0x9fc   : > { %v3440_v24 = vsub.f32 %v6119_v59, %v3420_v12  ;;  %v3429_v2 = vpop.xlane.xlu0 %3428  ;;  %v6308_v30 = vpop.eup %4955 }
 0x9fd   : > { %v3706_v63 = vsel %vm1977_vm13, %v6241_v50, -inf  ;;  %v3443_v12 = vsub.f32 %v6160_v45, %v3429_v2  ;;  %v6313_v17 = vpop.eup %4957  ;;  %v4287_v2 = vpack.c.bf16 %v6215_v42, %v6215_v42 }
 0x9fe   : > { %3707 = vmax.xlane.f32.xlu1 %v3706_v63  ;;  %3710 = vmax.xlane.f32.xlu0 %v3709_v37  ;;  %v6254_v51 = vpop.f32.mrf.mxu0  ;;  %v3449_v59 = vmul.f32 1.442695, %v3440_v24  ;;  %v3439_v63 = vsub.f32 %v6143_v14, %v3417_v31  ;;  %v3193_v45 = vsel %vm1977_vm13, %v6313_v17, 0.0 }
 0x9ff   : > { %v3426_v20 = vpop.xlane.xlu1 %3425  ;;  %v3455_v58 = vmul.f32 1.442695, %v3443_v12 }
 0xa00   : > { %v4578_v43 = vpop.f32.mrf.mxu0  ;;  %v3442_v21 = vsub.f32 %v6127_v53, %v3426_v20  ;;  %v3447_v14 = vmul.f32 1.442695, %v3439_v63  ;;  %v3435_v63 = vpop.xlane.xlu0 %3434 }
 0xa01   : > { %v3196_v43 = vsel %vm1977_vm13, %v6298_v60, 0.0 }
 0xa02   : > { %3713 = vmax.xlane.f32.xlu1 %v3712_v44  ;;  %2911 = vadd.xlane.f32.xlu0 %v2910_v49  ;;  %v6267_v26 = vpop.f32.mrf.mxu0  ;;  %v3453_v53 = vmul.f32 1.442695, %v3442_v21  ;;  %v3190_v44 = vsel %vm1977_vm13, %v6308_v30, 0.0  ;;  %v6317_v49 = vpop.eup %4959 }
 0xa03   : > { %v3432_v19 = vpop.xlane.xlu1 %3431  ;;  %v6322_v28 = vpop.eup %4961  ;;  %v3187_v7 = vsel %vm1977_vm13, %v6317_v49, 0.0 }
 0xa04   : > { %v4579_v29 = vpop.f32.mrf.mxu0  ;;  %4969 = vpow2.f32 %v3453_v53  ;;  %v3444_v31 = vsub.f32 %v6137_v56, %v3432_v19  ;;  %v3208_v56 = vsel %vm1977_vm13, %v6322_v28, 0.0 }
 0xa05   : > { %4971 = vpow2.f32 %v3449_v59  ;;  %v6324_v29 = vpop.eup %4963  ;;  %v4286_v59 = vpack.c.bf16 %v6213_v6, %v6213_v6  ;;  %v4289_v6 = vpack.c.bf16 %v6267_v26, %v6267_v26 }
 0xa06   : > { %2905 = vadd.xlane.f32.xlu0 %v2904_v33  ;;  %2908 = vadd.xlane.f32.xlu1 %v2907_v32  ;;  %4973 = vpow2.f32 %v3451_v41  ;;  %v3457_v32 = vmul.f32 1.442695, %v3444_v31  ;;  %v6330_v8 = vpop.eup %4965  ;;  %v3202_v47 = vsel %vm1977_vm13, %v6324_v29, 0.0 }
 0xa07   : > { %4975 = vpow2.f32 %v3447_v14  ;;  %v6332_v33 = vpop.eup %4967  ;;  %v3205_v20 = vsel %vm1977_vm13, %v6330_v8, 0.0  ;;  %v3438_v19 = vpop.xlane.xlu1 %3437 }
 0xa08   : > { %4977 = vpow2.f32 %v3455_v58  ;;  %v3446_v14 = vsub.f32 %v6145_v16, %v3438_v19 }
 0xa09   : > { %4979 = vpow2.f32 %v3457_v32 }
 0xa0a   : > { %2914 = vadd.xlane.f32.xlu0 %v2913_v61  ;;  %2926 = vadd.xlane.f32.xlu1 %v2925_v1  ;;  %v6291_v5 = vpop.f32.mrf.mxu0  ;;  %v3199_v1 = vsel %vm1977_vm13, %v6332_v33, 0.0  ;;  %v3461_v26 = vmul.f32 1.442695, %v3446_v14 }
 0xa0c   : > { %v4590_v48 = vpop.f32.mrf.mxu0 }
 0xa0e   : > { %2923 = vadd.xlane.f32.xlu0 %v2922_v62  ;;  %2920 = vadd.xlane.f32.xlu1 %v2919_v40  ;;  %v6303_v27 = vpop.f32.mrf.mxu0 }
 0xa0f   : > { %v4291_v12 = vpack.c.bf16 %v6303_v27, %v6303_v27 }
 0xa10   : > { %v4591_v37 = vpop.f32.mrf.mxu0 }
 0xa11   : > { %v6338_v34 = vpop.eup %4969  ;;  %v4288_v37 = vpack.c.bf16 %v6254_v51, %v6254_v51 }
 0xa12   : > { %2917 = vadd.xlane.f32.xlu0 %v2916_v15  ;;  %3197 = vadd.xlane.f32.xlu1 %v3196_v43  ;;  %v6340_v3 = vpop.eup %4971  ;;  %v3472_v21 = vsel %vm1977_vm13, %v6338_v34, 0.0  ;;  %v4290_v15 = vpack.c.bf16 %v6291_v5, %v6291_v5  ;;  %v3445_v43 = vsub.f32 %v6165_v57, %v3435_v63 }
 0xa13   : > { %v6346_v54 = vpop.eup %4973  ;;  %v3466_v38 = vsel %vm1977_vm13, %v6340_v3, 0.0 }
 0xa14   : > { %v6348_v61 = vpop.eup %4975  ;;  %v3469_v24 = vsel %vm1977_vm13, %v6346_v54, 0.0 }
 0xa15   : > { %v6354_v48 = vpop.eup %4977  ;;  %v3463_v40 = vsel %vm1977_vm13, %v6348_v61, 0.0 }
 0xa16   : > { %3194 = vadd.xlane.f32.xlu0 %v3193_v45  ;;  %3191 = vadd.xlane.f32.xlu1 %v3190_v44  ;;  %v3475_v53 = vsel %vm1977_vm13, %v6354_v48, 0.0  ;;  %v6360_v10 = vpop.eup %4979  ;;  %v3459_v44 = vmul.f32 1.442695, %v3445_v43 }
 0xa17   : > { %v3478_v62 = vsel %vm1977_vm13, %v6360_v10, 0.0 }
 0xa1a   : > { %3188 = vadd.xlane.f32.xlu0 %v3187_v7  ;;  %3209 = vadd.xlane.f32.xlu1 %v3208_v56 }
 0xa1e   : > { %3206 = vadd.xlane.f32.xlu0 %v3205_v20  ;;  %3203 = vadd.xlane.f32.xlu1 %v3202_v47 }
 0xa22   : > { %3200 = vadd.xlane.f32.xlu0 %v3199_v1  ;;  %3473 = vadd.xlane.f32.xlu1 %v3472_v21 }
 0xa26   : > { %3470 = vadd.xlane.f32.xlu0 %v3469_v24  ;;  %3467 = vadd.xlane.f32.xlu1 %v3466_v38 }
 0xa2a   : > { %3464 = vadd.xlane.f32.xlu0 %v3463_v40  ;;  %3476 = vadd.xlane.f32.xlu1 %v3475_v53 }
 0xa2e   : > { %3479 = vadd.xlane.f32.xlu1 %v3478_v62 }
 0xa3f   : > { %2451 = vrot.lane.b32.xlu1 %v4287_v2, %s5119_s19 }
 0xa40   : > { %2449 = vrot.lane.b32.xlu0 %v4286_v59, %s5119_s19 }
 0xa43   : > { %v3693_v41 = vpop.xlane.xlu0 %3692  ;;  %2602 = vrot.lane.b32.xlu1 %v4288_v37, %s5120_s17 }
 0xa44   : > { %2755 = vrot.lane.b32.xlu0 %v4290_v15, %s5121_s22  ;;  %v3715_v58 = vsub.f32 %v6194_v9, %v3693_v41 }
 0xa46   : > { %v3723_v27 = vmul.f32 1.442695, %v3715_v58 }
 0xa47   : > { %v3699_v42 = vpop.xlane.xlu0 %3698  ;;  %2604 = vrot.lane.b32.xlu1 %v4289_v6, %s5120_s17  ;;  %v3696_v31 = vpop.xlane.xlu1 %3695 }
 0xa48   : > { %v3717_v51 = vsub.f32 %v6197_v25, %v3699_v42  ;;  %v3716_v25 = vsub.f32 %v6202_v39, %v3696_v31 }
 0xa4a   : > { %v3727_v5 = vmul.f32 1.442695, %v3717_v51  ;;  %v3725_v57 = vmul.f32 1.442695, %v3716_v25 }
 0xa4b   : > { %2757 = vrot.lane.b32.xlu1 %v4291_v12, %s5121_s22  ;;  %v3702_v7 = vpop.xlane.xlu1 %3701 }
 0xa4c   : > { %4981 = vpow2.f32 %v3727_v5  ;;  %v3718_v16 = vsub.f32 %v6205_v46, %v3702_v7 }
 0xa4d   : > { %4983 = vpow2.f32 %v3459_v44 }
 0xa4e   : > { %4985 = vpow2.f32 %v3461_v26  ;;  %v3729_v56 = vmul.f32 1.442695, %v3718_v16 }
 0xa4f   : > { %4987 = vpow2.f32 %v3723_v27 }
 0xa50   : > { %4989 = vpow2.f32 %v3725_v57 }
 0xa51   : > { %4991 = vpow2.f32 %v3729_v56 }
 0xa59   : > { %v6386_v45 = vpop.eup %4981 }
 0xa5a   : > { %v3745_v32 = vsel %vm1977_vm13, %v6386_v45, 0.0  ;;  %v6392_v20 = vpop.eup %4983 }
 0xa5b   : > { %v3481_v9 = vsel %vm1977_vm13, %v6392_v20, 0.0  ;;  %v6396_v47 = vpop.eup %4985 }
 0xa5c   : > { %v3484_v39 = vsel %vm1977_vm13, %v6396_v47, 0.0  ;;  %v6400_v1 = vpop.eup %4987 }
 0xa5d   : > { %v3739_v46 = vsel %vm1977_vm13, %v6400_v1, 0.0  ;;  %v6404_v21 = vpop.eup %4989 }
 0xa5e   : > { %v3742_v24 = vsel %vm1977_vm13, %v6404_v21, 0.0  ;;  %v6408_v38 = vpop.eup %4991 }
 0xa5f   : > { %v3748_v40 = vsel %vm1977_vm13, %v6408_v38, 0.0 }
 0xa63   : > { %3746 = vadd.xlane.f32.xlu0 %v3745_v32 }
 0xa6f   : > { %3482 = vadd.xlane.f32.xlu1 %v3481_v9 }
 0xa73   : > { %3485 = vadd.xlane.f32.xlu1 %v3484_v39 }
 0xa77   : > { %3740 = vadd.xlane.f32.xlu1 %v3739_v46 }
 0xa7b   : > { %3743 = vadd.xlane.f32.xlu1 %v3742_v24 }
 0xa7f   : > { %3749 = vadd.xlane.f32.xlu1 %v3748_v40 }
 0xa83   : > { %v6412_v53 = vpop.xlane.xlu0 %3704 }
 0xa87   : > { %v6414_v62 = vpop.xlane.xlu0 %3710  ;;  %v6416_v2 = vpop.xlane.xlu1 %3707 }
 0xa8b   : > { %v6418_v59 = vpop.xlane.xlu0 %2911  ;;  %v6420_v63 = vpop.xlane.xlu1 %3713 }
 0xa8f   : > { %v2906_v37 = vpop.xlane.xlu0 %2905  ;;  %v2909_v15 = vpop.xlane.xlu1 %2908 }
 0xa90   : > { %4993 = vrcp.f32 %v2906_v37 }
 0xa91   : > { %4995 = vrcp.f32 %v2909_v15 }
 0xa93   : > { %v6422_v41 = vpop.xlane.xlu0 %2914  ;;  %v6424_v6 = vpop.xlane.xlu1 %2926 }
 0xa97   : > { %v6426_v42 = vpop.xlane.xlu0 %2923  ;;  %v6428_v12 = vpop.xlane.xlu1 %2920 }
 0xa9b   : > { %v6430_v51 = vpop.xlane.xlu0 %2917  ;;  %v3198_v5 = vpop.xlane.xlu1 %3197 }
 0xa9c   : > { %4997 = vrcp.f32 %v3198_v5 }
 0xa9d   : > { %v4994_v43 = vpop.eup %4993 }
 0xa9e   : > { %v4996_v19 = vpop.eup %4995  ;;  %v2936_v31 = vmul.f32 %v4994_v43, %v6265_v4 }
 0xa9f   : > { %v3195_v14 = vpop.xlane.xlu0 %3194  ;;  %v6432_v44 = vpop.xlane.xlu1 %3191  ;;  %v2937_v26 = vmul.f32 %v4996_v19, %v6258_v52 }
 0xaa0   : > { %4999 = vrcp.f32 %v3195_v14 }
 0xaa1   : > { %v2944_v58 = vpack.c.bf16 %v2937_v26, %v2936_v31 }
 0xaa3   : > { %v6436_v27 = vpop.xlane.xlu0 %3188  ;;  %v3210_v25 = vpop.xlane.xlu1 %3209  ;;  %4604 = vmatprep.mubr.msk.bf16.mxu0 %vm1977_vm13, %v2944_v58 }
 0xaa4   : > { %5001 = vrcp.f32 %v3210_v25 }
 0xaa7   : > { %v3207_v32 = vpop.xlane.xlu0 %3206  ;;  %v3204_v7 = vpop.xlane.xlu1 %3203 }
 0xaa8   : > { %5003 = vrcp.f32 %v3207_v32 }
 0xaa9   : > { %5005 = vrcp.f32 %v3204_v7  ;;  %v4998_v57 = vpop.eup %4997 }
 0xaaa   : > { %v6440_v4 = vmul.f32 %v4998_v57, %v6298_v60 }
 0xaab   : > { %v3201_v16 = vpop.xlane.xlu0 %3200  ;;  %v3474_v56 = vpop.xlane.xlu1 %3473 }
 0xaac   : > { %5007 = vrcp.f32 %v3201_v16 }
 0xaad   : > { %v5000_v9 = vpop.eup %4999  ;;  %5009 = vrcp.f32 %v3474_v56 }
 0xaae   : > { %v6443_v52 = vmul.f32 %v5000_v9, %v6313_v17 }
 0xaaf   : > { %v3471_v39 = vpop.xlane.xlu0 %3470  ;;  %v3468_v46 = vpop.xlane.xlu1 %3467 }
 0xab0   : > { %v3228_v24 = vpack.c.bf16 %v6440_v4, %v6443_v52  ;;  %5011 = vrcp.f32 %v3471_v39 }
 0xab1   : > { %5013 = vrcp.f32 %v3468_v46  ;;  %v5002_v40 = vpop.eup %5001 }
 0xab2   : > { %v6451_v17 = vmul.f32 %v5002_v40, %v6322_v28 }
 0xab3   : > { %v3465_v37 = vpop.xlane.xlu0 %3464  ;;  %v3477_v15 = vpop.xlane.xlu1 %3476 }
 0xab4   : > { %5015 = vrcp.f32 %v3465_v37 }
 0xab5   : > { %v5004_v5 = vpop.eup %5003  ;;  %5017 = vrcp.f32 %v3477_v15 }
 0xab6   : > { %v6448_v60 = vmul.f32 %v5004_v5, %v6330_v8  ;;  %v5006_v43 = vpop.eup %5005 }
 0xab7   : > { %v3480_v19 = vpop.xlane.xlu1 %3479  ;;  %v2450_v14 = vpop.permute.xlu0 %2449  ;;  %v6459_v25 = vmul.f32 %v5006_v43, %v6324_v29  ;;  %v3720_v43 = vsub.f32 %v6241_v50, %v6416_v2 }
 0xab8   : > { %5019 = vrcp.f32 %v3480_v19  ;;  %2456 = vst.msk [vmem:[#allocation4] sm:$0xf] %vm2455_vm15, %v2450_v14  ;;  %v3230_v31 = vpack.c.bf16 %v6451_v17, %v6448_v60 }
 0xab9   : > { %v5008_v26 = vpop.eup %5007  ;;  %5021 = vrcp.f32 %v6422_v41 }
 0xaba   : > { %v6456_v58 = vmul.f32 %v5008_v26, %v6332_v33  ;;  %v5010_v8 = vpop.eup %5009  ;;  %5023 = vrcp.f32 %v6430_v51 }
 0xabb   : > { %v2452_v32 = vpop.permute.xlu1 %2451  ;;  %v6464_v57 = vmul.f32 %v5010_v8, %v6338_v34  ;;  %v2756_v9 = vpop.permute.xlu0 %2755  ;;  %5025 = vrcp.f32 %v6418_v59 }
 0xabc   : > { %2457 = vst.msk [vmem:[#allocation4 + $0x4] sm:$0xf] %vm2455_vm15, %v2452_v32  ;;  %v3229_v28 = vpack.c.bf16 %v6459_v25, %v6456_v58  ;;  %5027 = vrcp.f32 %v6428_v12 }
 0xabd   : > { %v5012_v7 = vpop.eup %5011  ;;  %5029 = vrcp.f32 %v6426_v42 }
 0xabe   : > { %v6467_v16 = vmul.f32 %v5012_v7, %v6346_v54  ;;  %v5014_v33 = vpop.eup %5013  ;;  %5031 = vrcp.f32 %v6436_v27 }
 0xabf   : > { %v2603_v56 = vpop.permute.xlu1 %2602  ;;  %v6477_v34 = vmul.f32 %v5014_v33, %v6340_v3  ;;  %5033 = vrcp.f32 %v6424_v6  ;;  %v3721_v33 = vsub.f32 %v6236_v0, %v6414_v62 }
 0xac0   : > { %v3504_v29 = vpack.c.bf16 %v6464_v57, %v6467_v16  ;;  %2609 = vst.msk [vmem:[#allocation4] sm:$0xf] %vm2608_vm1, %v2603_v56  ;;  %5035 = vrcp.f32 %v6432_v44 }
 0xac1   : > { %v5016_v39 = vpop.eup %5015  ;;  %2762 = vst.msk [vmem:[#allocation4] sm:$0xf] %vm2761_vm2, %v2756_v9  ;;  %v3735_v56 = vmul.f32 1.442695, %v3721_v33  ;;  %v3722_v9 = vsub.f32 %v6246_v11, %v6420_v63 }
 0xac2   : > { %v6474_v46 = vmul.f32 %v5016_v39, %v6348_v61  ;;  %v5018_v54 = vpop.eup %5017 }
 0xac3   : > { %v2605_v40 = vpop.permute.xlu1 %2604  ;;  %v6486_v61 = vmul.f32 %v5018_v54, %v6354_v48 }
 0xac4   : > { %2610 = vst.msk [vmem:[#allocation4 + $0x4] sm:$0xf] %vm2608_vm1, %v2605_v40  ;;  %v3503_v37 = vpack.c.bf16 %v6477_v34, %v6474_v46 }
 0xac5   : > { %v5020_v15 = vpop.eup %5019 }
 0xac6   : > { %v6489_v3 = vmul.f32 %v5020_v15, %v6360_v10  ;;  %v5022_v59 = vpop.eup %5021 }
 0xac7   : > { %v2758_v5 = vpop.permute.xlu1 %2757  ;;  %v5024_v12 = vpop.eup %5023  ;;  %v2939_v27 = vmul.f32 %v5022_v59, %v6278_v23  ;;  %v3733_v23 = vmul.f32 1.442695, %v3720_v43 }
 0xac8   : > { %2763 = vst.msk [vmem:[#allocation4 + $0x4] sm:$0xf] %vm2761_vm2, %v2758_v5  ;;  %v3505_v41 = vpack.c.bf16 %v6489_v3, %v6486_v61  ;;  %v5026_v51 = vpop.eup %5025  ;;  %v2940_v6 = vmul.f32 %v5024_v12, %v6293_v18 }
 0xac9   : > { %v5028_v42 = vpop.eup %5027  ;;  %v2938_v44 = vmul.f32 %v5026_v51, %v6252_v55  ;;  %v3719_v55 = vsub.f32 %v6232_v13, %v6412_v53  ;;  %5037 = vpow2.f32 %v3733_v23  ;;  %v3737_v13 = vmul.f32 1.442695, %v3722_v9 }
 0xaca   : > { %v2941_v19 = vmul.f32 %v5028_v42, %v6280_v36  ;;  %v5030_v26 = vpop.eup %5029  ;;  %5039 = vpow2.f32 %v3735_v56 }
 0xacb   : > { %v2945_v14 = vpack.c.bf16 %v2939_v27, %v2938_v44  ;;  %v5032_v32 = vpop.eup %5031  ;;  %v2942_v50 = vmul.f32 %v5030_v26, %v6286_v35  ;;  %v3731_v62 = vmul.f32 1.442695, %v3719_v55 }
 0xacc   : > { %v2946_v8 = vpack.c.bf16 %v2941_v19, %v2940_v6  ;;  %v5034_v7 = vpop.eup %5033  ;;  %v3219_v36 = vmul.f32 %v5032_v32, %v6317_v49 }
 0xacd   : > { %v5036_v18 = vpop.eup %5035  ;;  %v2943_v2 = vmul.f32 %v5034_v7, %v6273_v22  ;;  %5041 = vpow2.f32 %v3731_v62 }
 0xace   : > { %v3220_v0 = vmul.f32 %v5036_v18, %v6308_v30  ;;  %5043 = vpow2.f32 %v3737_v13 }
 0xacf   : > { %v4898_v48 = vld [vmem:[#allocation4] sm:$0xff]   ;;  %v2947_v39 = vpack.c.bf16 %v2943_v2, %v2942_v50 }
 0xad0   : > { %3507 = vrot.lane.b32.xlu1 %v4898_v48, %s5118_s16  ;;  %3231 = vrot.lane.b32.xlu0 %v4898_v48, %s5117_s15  ;;  %v2966_v10 = vsel %vm1977_vm13, %v4898_v48, 0  ;;  %v3227_v54 = vpack.c.bf16 %v3220_v0, %v3219_v36 }
 0xad1   : > { %4692 = vmatprep.subr.msk.bf16.mxu0 %vm1977_vm13, %v4898_v48 }
 0xad2   : > { %4603 = vmatpush3.bf16.xpose.msra.mxu0 %v2966_v10 }
 0xad6   : > { %v6523_v35 = vpop.eup %5037 }
 0xad7   : > { %v3754_v22 = vsel %vm1977_vm13, %v6523_v35, 0.0  ;;  %v6527_v49 = vpop.eup %5039 }
 0xad8   : > { %v3757_v30 = vsel %vm1977_vm13, %v6527_v49, 0.0 }
 0xad9   : > { %4605 = vmatmul.mubr.msk.bf16.vlgmr.msra.gmra.mxu0 %vm1977_vm13, %v2945_v14 }
 0xada   : > { %4608 = vmatprep.mubr.msk.bf16.mxu0 %vm1977_vm13, %v2946_v8  ;;  %v6529_v11 = vpop.eup %5041 }
 0xadb   : > { %v6533_v53 = vpop.eup %5043  ;;  %v3751_v63 = vsel %vm1977_vm13, %v6529_v11, 0.0 }
 0xadc   : > { %v3760_v40 = vsel %vm1977_vm13, %v6533_v53, 0.0 }
 0xae1   : > { %4609 = vmatmul.mubr.msk.bf16.gmra.mxu0 %vm1977_vm13, %v2947_v39 }
 0xae2   : > { %4624 = vmatprep.mubr.msk.bf16.mxu0 %vm1977_vm13, %v3227_v54 }
 0xaec   : > { %v3747_v12 = vpop.xlane.xlu0 %3746 }
 0xaef   : > { %3755 = vadd.xlane.f32.xlu0 %v3754_v22 }
 0xaf3   : > { %3758 = vadd.xlane.f32.xlu0 %v3757_v30 }
 0xaf4   : > { %3752 = vadd.xlane.f32.xlu1 %v3751_v63 }
 0xaf7   : > { %3761 = vadd.xlane.f32.xlu0 %v3760_v40  ;;  %v4899_v40 = vld [vmem:[%s6702_s10 + $0x18] sm:$0xff]  }
 0xaf8   : > { %v3483_v15 = vpop.xlane.xlu1 %3482  ;;  %4672 = vmatprep.subr.bf16.mxu1 %v4899_v40 }
 0xaf9   : > { %4673 = vmatpush3.bf16.msra.mxu1 %v4899_v40 }
 0xafc   : > { %v3486_v5 = vpop.xlane.xlu1 %3485 }
 0xafd   : > { %5045 = vrcp.f32 %v3486_v5 }
 0xb00   : > { %v3741_v59 = vpop.xlane.xlu1 %3740 }
 0xb04   : > { %v3744_v10 = vpop.xlane.xlu1 %3743 }
 0xb05   : > { %5047 = vrcp.f32 %v3744_v10 }
 0xb06   : > { %5049 = vrcp.f32 %v3483_v15  ;;  %v4900_v15 = vld [vmem:[%s6702_s10 + $0x10] sm:$0xff]  }
 0xb07   : > { %5051 = vrcp.f32 %v3741_v59  ;;  %4674 = vmatprep.subr.bf16.mxu1 %v4900_v15 }
 0xb08   : > { %v3750_v51 = vpop.xlane.xlu1 %3749  ;;  %4675 = vmatpush3.bf16.msra.mxu1 %v4900_v15 }
 0xb09   : > { %5053 = vrcp.f32 %v3750_v51 }
 0xb0a   : > { %v5046_v4 = vpop.eup %5045  ;;  %5055 = vrcp.f32 %v3747_v12  ;;  %v4901_v12 = vld [vmem:[%s6702_s10 + $0x8] sm:$0xff]  }
 0xb0b   : > { %v3502_v17 = vmul.f32 %v5046_v4, %v6396_v47  ;;  %4676 = vmatprep.subr.bf16.mxu1 %v4901_v12 }
 0xb0c   : > { %4677 = vmatpush3.bf16.msra.mxu1 %v4901_v12 }
 0xb0d   : > { %3783 = vrot.lane.b32.xlu0 %v4898_v48, %s5116_s21 }
 0xb12   : > { %v5048_v52 = vpop.eup %5047 }
 0xb42   : > { %v3232_v42 = vpop.permute.xlu0 %3231  ;;  %v3508_v6 = vpop.permute.xlu1 %3507 }
 0xb43   : > { %v3246_v27 = vsel %vm1977_vm13, %v3232_v42, 0  ;;  %4693 = vmatprep.subr.msk.bf16.mxu0 %vm1977_vm13, %v3232_v42  ;;  %v3522_v44 = vsel %vm1977_vm13, %v3508_v6, 0 }
 0xb44   : > { %4623 = vmatpush3.bf16.xpose.msra.mxu0 %v3246_v27 }
 0xb45   : > { %4694 = vmatprep.subr.msk.bf16.mxu0 %vm1977_vm13, %v3508_v6 }
 0xb4b   : > { %4625 = vmatmul.mubr.msk.bf16.vlgmr.msra.gmra.mxu0 %vm1977_vm13, %v3228_v24  ;;  %v5050_v24 = vpop.eup %5049 }
 0xb4c   : > { %4628 = vmatprep.mubr.msk.bf16.mxu0 %vm1977_vm13, %v3229_v28  ;;  %4643 = vmatpush3.bf16.xpose.msra.mxu0 %v3522_v44  ;;  %v5052_v60 = vpop.eup %5051  ;;  %v3501_v58 = vmul.f32 %v5050_v24, %v6392_v20  ;;  %v4902_v24 = vld [vmem:[%s6702_s10] sm:$0xff]  }
 0xb4d   : > { %v3771_v25 = vmul.f32 %v5052_v60, %v6400_v1  ;;  %4678 = vmatprep.subr.bf16.mxu1 %v4902_v24 }
 0xb4e   : > { %v3506_v28 = vpack.c.bf16 %v3502_v17, %v3501_v58  ;;  %4679 = vmatpush3.bf16.msra.mxu1 %v4902_v24 }
 0xb53   : > { %4629 = vmatmul.mubr.msk.bf16.gmra.mxu0 %vm1977_vm13, %v3230_v31  ;;  %v3772_v31 = vmul.f32 %v5048_v52, %v6404_v21  ;;  %v5054_v21 = vpop.eup %5053 }
 0xb54   : > { %4644 = vmatprep.mubr.msk.bf16.mxu0 %vm1977_vm13, %v3503_v37  ;;  %v5056_v34 = vpop.eup %5055  ;;  %v3774_v37 = vmul.f32 %v5054_v21, %v6408_v38 }
 0xb55   : > { %v3779_v46 = vpack.c.bf16 %v3772_v31, %v3771_v25  ;;  %v3773_v3 = vmul.f32 %v5056_v34, %v6386_v45 }
 0xb57   : > { %v3780_v48 = vpack.c.bf16 %v3774_v37, %v3773_v3 }
 0xb5b   : > { %4645 = vmatmul.mubr.msk.bf16.vlgmr.msra.gmra.mxu0 %vm1977_vm13, %v3504_v29 }
 0xb5c   : > { %4648 = vmatprep.mubr.msk.bf16.mxu0 %vm1977_vm13, %v3505_v41 }
 0xb63   : > { %4649 = vmatmul.mubr.msk.bf16.gmra.mxu0 %vm1977_vm13, %v3506_v28 }
 0xb64   : > { %4664 = vmatprep.mubr.msk.bf16.mxu0 %vm1977_vm13, %v3779_v46 }
 0xb78   : > { %v3756_v57 = vpop.xlane.xlu0 %3755 }
 0xb79   : > { %5057 = vrcp.f32 %v3756_v57 }
 0xb7c   : > { %v3759_v16 = vpop.xlane.xlu0 %3758 }
 0xb7d   : > { %v3753_v29 = vpop.xlane.xlu1 %3752 }
 0xb7e   : > { %5059 = vrcp.f32 %v3753_v29 }
 0xb7f   : > { %5061 = vrcp.f32 %v3759_v16 }
 0xb80   : > { %v3762_v47 = vpop.xlane.xlu0 %3761 }
 0xb81   : > { %5063 = vrcp.f32 %v3762_v47 }
 0xb84   : > { %v3784_v20 = vpop.permute.xlu0 %3783 }
 0xb85   : > { %v3798_v1 = vsel %vm1977_vm13, %v3784_v20, 0  ;;  %4695 = vmatprep.subr.msk.bf16.mxu0 %vm1977_vm13, %v3784_v20 }
 0xb86   : > { %4663 = vmatpush3.bf16.xpose.msra.mxu0 %v3798_v1  ;;  %v5058_v61 = vpop.eup %5057 }
 0xb87   : > { %v3776_v19 = vmul.f32 %v5058_v61, %v6523_v35 }
 0xb8b   : > { %v5060_v41 = vpop.eup %5059 }
 0xb8c   : > { %v3775_v43 = vmul.f32 %v5060_v41, %v6529_v11  ;;  %v5062_v14 = vpop.eup %5061 }
 0xb8d   : > { %4665 = vmatmul.mubr.msk.bf16.vlgmr.msra.gmra.mxu0 %vm1977_vm13, %v3780_v48  ;;  %v3777_v38 = vmul.f32 %v5062_v14, %v6527_v49 }
 0xb8e   : > { %v5064_v26 = vpop.eup %5063  ;;  %v3781_v8 = vpack.c.bf16 %v3776_v19, %v3775_v43 }
 0xb8f   : > { %v3778_v32 = vmul.f32 %v5064_v26, %v6533_v53 }
 0xb90   : > { %4668 = vmatprep.mubr.msk.bf16.mxu0 %vm1977_vm13, %v3781_v8 }
 0xb91   : > { %v3782_v7 = vpack.c.bf16 %v3778_v32, %v3777_v38 }
 0xb95   : > { %4669 = vmatmul.mubr.msk.bf16.gmra.mxu0 %vm1977_vm13, %v3782_v7 }
 0xb99   : > { %v6585_v45 = vpop.f32.mrf.mxu0 }
 0xb9b   : > { %v6587_v33 = vpop.f32.mrf.mxu0 }
 0xb9d   : > { %v6589_v23 = vpop.f32.mrf.mxu0 }
 0xb9e   : > { %v3034_v18 = vpack.c.bf16 %v6589_v23, %v6585_v45 }
 0xb9f   : > { %v6593_v55 = vpop.f32.mrf.mxu0 }
 0xba0   : > { %v3033_v50 = vpack.c.bf16 %v6593_v55, %v6587_v33 }
 0xba1   : > { %v6597_v36 = vpop.f32.mrf.mxu0 }
 0xba3   : > { %v6599_v2 = vpop.f32.mrf.mxu0 }
 0xba5   : > { %v6601_v56 = vpop.f32.mrf.mxu0 }
 0xba6   : > { %v3036_v9 = vpack.c.bf16 %v6601_v56, %v6597_v36  ;;  %v4271_v36 = vld [vmem:[%s6703_s11] ss:$0 sm:$0xff] }
 0xba7   : > { %v6605_v0 = vpop.f32.mrf.mxu0 }
 0xba8   : > { %v3035_v45 = vpack.c.bf16 %v6605_v0, %v6599_v2 }
 0xc0b   : > { %v4626_v62 = vpop.f32.mrf.mxu0 }
 0xc0d   : > { %v3282_v39 = vpop.f32.mrf.mxu0 }
 0xc0f   : > { %v4627_v54 = vpop.f32.mrf.mxu0 }
 0xc10   : > { %v3314_v13 = vpack.c.bf16 %v4627_v54, %v4626_v62 }
 0xc11   : > { %v3285_v35 = vpop.f32.mrf.mxu0 }
 0xc12   : > { %v3313_v22 = vpack.c.bf16 %v3285_v35, %v3282_v39  ;;  %3875 = vrot.lane.b32.xlu0 %v3314_v13, %s5119_s19 }
 0xc13   : > { %v4630_v49 = vpop.f32.mrf.mxu0 }
 0xc14   : > { %3873 = vrot.lane.b32.xlu1 %v3313_v22, %s5119_s19 }
 0xc15   : > { %v3298_v11 = vpop.f32.mrf.mxu0 }
 0xc17   : > { %v4631_v30 = vpop.f32.mrf.mxu0 }
 0xc18   : > { %v3316_v53 = vpack.c.bf16 %v4631_v30, %v4630_v49 }
 0xc19   : > { %v3301_v63 = vpop.f32.mrf.mxu0 }
 0xc1a   : > { %v3315_v5 = vpack.c.bf16 %v3301_v63, %v3298_v11  ;;  %3879 = vrot.lane.b32.xlu0 %v3316_v53, %s5119_s19 }
 0xc1b   : > { %v4646_v59 = vpop.f32.mrf.mxu0 }
 0xc1c   : > { %3877 = vrot.lane.b32.xlu1 %v3315_v5, %s5119_s19 }
 0xc1d   : > { %v3558_v10 = vpop.f32.mrf.mxu0 }
 0xc1f   : > { %v4647_v51 = vpop.f32.mrf.mxu0 }
 0xc20   : > { %v3590_v42 = vpack.c.bf16 %v4647_v51, %v4646_v59 }
 0xc21   : > { %v3561_v27 = vpop.f32.mrf.mxu0 }
 0xc22   : > { %3887 = vrot.lane.b32.xlu0 %v3590_v42, %s5120_s17  ;;  %v3589_v6 = vpack.c.bf16 %v3561_v27, %v3558_v10 }
 0xc23   : > { %v4650_v44 = vpop.f32.mrf.mxu0 }
 0xc25   : > { %v3574_v4 = vpop.f32.mrf.mxu0 }
 0xc26   : > { %3885 = vrot.lane.b32.xlu0 %v3589_v6, %s5120_s17 }
 0xc27   : > { %v4651_v52 = vpop.f32.mrf.mxu0 }
 0xc28   : > { %v3592_v16 = vpack.c.bf16 %v4651_v52, %v4650_v44 }
 0xc29   : > { %v3577_v60 = vpop.f32.mrf.mxu0 }
 0xc2a   : > { %v3591_v47 = vpack.c.bf16 %v3577_v60, %v3574_v4 }
 0xc4d   : > { %v4666_v17 = vpop.f32.mrf.mxu0 }
 0xc4f   : > { %v3834_v31 = vpop.f32.mrf.mxu0 }
 0xc51   : > { %v4667_v58 = vpop.f32.mrf.mxu0 }
 0xc52   : > { %v3866_v25 = vpack.c.bf16 %v4667_v58, %v4666_v17 }
 0xc53   : > { %v3837_v28 = vpop.f32.mrf.mxu0 }
 0xc54   : > { %v3865_v46 = vpack.c.bf16 %v3837_v28, %v3834_v31  ;;  %3899 = vrot.lane.b32.xlu0 %v3866_v25, %s5121_s22 }
 0xc55   : > { %v4670_v57 = vpop.f32.mrf.mxu0 }
 0xc56   : > { %3897 = vrot.lane.b32.xlu1 %v3865_v46, %s5121_s22 }
 0xc57   : > { %v3850_v29 = vpop.f32.mrf.mxu0 }
 0xc58   : > { %3891 = vrot.lane.b32.xlu0 %v3592_v16, %s5120_s17 }
 0xc59   : > { %v4671_v21 = vpop.f32.mrf.mxu0 }
 0xc5a   : > { %v3868_v20 = vpack.c.bf16 %v4671_v21, %v4670_v57  ;;  %3889 = vrot.lane.b32.xlu1 %v3591_v47, %s5120_s17 }
 0xc5b   : > { %v3853_v1 = vpop.f32.mrf.mxu0 }
 0xc5c   : > { %v3867_v34 = vpack.c.bf16 %v3853_v1, %v3850_v29  ;;  %3903 = vrot.lane.b32.xlu0 %v3868_v20, %s5121_s22 }
 0xc5e   : > { %3901 = vrot.lane.b32.xlu1 %v3867_v34, %s5121_s22 }
 0xc84   : > { %v3876_v37 = vpop.permute.xlu0 %3875 }
 0xc85   : > { %v3910_v26 = vsel %vm1977_vm13, %v3034_v18, %v3876_v37 }
 0xc86   : > { %v3874_v41 = vpop.permute.xlu1 %3873 }
 0xc87   : > { %v3907_v14 = vsel %vm1977_vm13, %v3033_v50, %v3874_v41 }
 0xc8c   : > { %v3880_v61 = vpop.permute.xlu0 %3879 }
 0xc8d   : > { %v3916_v55 = vsel %vm1977_vm13, %v3036_v9, %v3880_v61 }
 0xc8e   : > { %v3878_v43 = vpop.permute.xlu1 %3877 }
 0xc8f   : > { %v3913_v23 = vsel %vm1977_vm13, %v3035_v45, %v3878_v43 }
 0xc94   : > { %v3888_v3 = vpop.permute.xlu0 %3887 }
 0xc95   : > { %v3920_v38 = vsel %vm501_vm0, %v3910_v26, %v3888_v3 }
 0xc98   : > { %v3886_v48 = vpop.permute.xlu0 %3885 }
 0xc99   : > { %v3918_v8 = vsel %vm501_vm0, %v3907_v14, %v3886_v48 }
 0xcc6   : > { %v3900_v19 = vpop.permute.xlu0 %3899 }
 0xcc7   : > { %v3929_v62 = vsel %vm3925_vm3, %v3920_v38, %v3900_v19 }
 0xcc8   : > { %v3898_v32 = vpop.permute.xlu1 %3897 }
 0xcc9   : > { %v3927_v7 = vsel %vm3925_vm3, %v3918_v8, %v3898_v32 }
 0xcca   : > { %v3892_v39 = vpop.permute.xlu0 %3891  ;;  %4680 = vmatprep.mubr.msk.bf16.mxu1 %vm3973_vm4, %v3927_v7 }
 0xccb   : > { %4681 = vmatmul.mubr.msk.bf16.vlgmr.msra.gmra.mxu1 %vm3973_vm4, %v3929_v62  ;;  %v3924_v13 = vsel %vm501_vm0, %v3916_v55, %v3892_v39 }
 0xccc   : > { %v3890_v33 = vpop.permute.xlu1 %3889 }
 0xccd   : > { %v3922_v50 = vsel %vm501_vm0, %v3913_v23, %v3890_v33 }
 0xcce   : > { %v3904_v18 = vpop.permute.xlu0 %3903 }
 0xccf   : > { %v3933_v22 = vsel %vm3925_vm3, %v3924_v13, %v3904_v18 }
 0xcd0   : > { %v3902_v54 = vpop.permute.xlu1 %3901 }
 0xcd1   : > { %v3931_v35 = vsel %vm3925_vm3, %v3922_v50, %v3902_v54 }
 0xcd2   : > { %4684 = vmatprep.mubr.msk.bf16.mxu1 %vm3973_vm4, %v3931_v35 }
 0xcd3   : > { %4685 = vmatmul.mubr.msk.bf16.gmra.mxu1 %vm3973_vm4, %v3933_v22 }
 0xd8b   : > { %v4682_v2 = vpop.f32.mrf.mxu1 }
 0xd8c   : > { %v4025_v56 = vadd.f32 %v4682_v2, %v4271_v36 }
 0xd8d   : > { %v4016_v9 = vpop.f32.mrf.mxu1 }
 0xd8e   : > { %4049 = vst.msk [vmem:[%s5231_s20 + $0x10] sm:$0xff] %vm501_vm0, %v4025_v56  ;;  %v4017_v0 = vadd.f32 %v4271_v36, %v4016_v9 }
 0xd8f   : > { %v4683_v49 = vpop.f32.mrf.mxu1 }
 0xd90   : > { %4047 = vst.msk [vmem:[%s5231_s20] sm:$0xff] %vm501_vm0, %v4017_v0  ;;  %v4028_v11 = vadd.f32 %v4683_v49, %v4271_v36 }
 0xd91   : > { %v4019_v30 = vpop.f32.mrf.mxu1 }
 0xd92   : > { %4050 = vst.msk [vmem:[%s5231_s20 + $0x18] sm:$0xff] %vm501_vm0, %v4028_v11  ;;  %v4020_v53 = vadd.f32 %v4271_v36, %v4019_v30 }
 0xd93   : > { %v4686_v63 = vpop.f32.mrf.mxu1 }
 0xd94   : > { %4048 = vst.msk [vmem:[%s5231_s20 + $0x8] sm:$0xff] %vm501_vm0, %v4020_v53  ;;  %v4041_v40 = vadd.f32 %v4686_v63, %v4271_v36 }
 0xd95   : > { %v4032_v15 = vpop.f32.mrf.mxu1 }
 0xd96   : > { %4053 = vst.msk [vmem:[%s5231_s20 + $0x30] sm:$0xff] %vm501_vm0, %v4041_v40  ;;  %v4033_v5 = vadd.f32 %v4271_v36, %v4032_v15 }
 0xd97   : > { %v4687_v59 = vpop.f32.mrf.mxu1 }
 0xd98   : > { %4051 = vst.msk [vmem:[%s5231_s20 + $0x20] sm:$0xff] %vm501_vm0, %v4033_v5  ;;  %v4044_v10 = vadd.f32 %v4687_v59, %v4271_v36 }
 0xd99   : > { %v4035_v12 = vpop.f32.mrf.mxu1 }
 0xd9a   : > { %4054 = vst.msk [vmem:[%s5231_s20 + $0x38] sm:$0xff] %vm501_vm0, %v4044_v10  ;;  %v4036_v51 = vadd.f32 %v4271_v36, %v4035_v12 }
 0xd9c   : > { %4052 = vst.msk [vmem:[%s5231_s20 + $0x28] sm:$0xff] %vm501_vm0, %v4036_v51 }
 0xd9d PF: > { %s22_s25 = sadd.s32 1, %s5103_s25   ;;  %s6720_s21 = smov %s5095_s23 }
 0xd9e   : > { %p19_p8 = scmp.ge.s32.totalorder %s22_s25, 6   ;;  %s6721_s22 = smov %s5099_s24 }
 0xd9f   : > { %s6722_s23 = smov %s6725_s26  ;;  %s6723_s24 = smov %s6729_s27 }
 0xda0   :  { %21 = sbr.rel (!%p19_p8) target bundleno = 3 (0x3), region = 120 }

</bundles_post_ra>
